<compile_context>
chip_gen: v7x
topology: tpu7x:2x2x1
jax: 0.10.0
libtpu: 0.0.40
codegen_flags: <defaults>
</compile_context>

<pallas_src>
import functools

import jax
import jax.numpy as jnp
from jax.experimental import pallas as pl
from jax.experimental.pallas import tpu as pltpu


BACKBONE_OUT_CH = 256          # backbone.out_channels (FPN convention)
NUM_ANCHORS = 3                # RPN anchors per location
HEAD_PAD = 128                 # fused RPN head lanes: 3 (cls) + 12 (bbox) -> pad to 128
VMEM_LIMIT = 48 * 1024 * 1024  # explicit scoped-VMEM budget (safe on v5e/v6e/v7x)


def _round_up(x, m):
    return (x + m - 1) // m * m


def _shift_left_w(v, s):
    """Cyclic left shift by s along axis=1 (W). Wrapped columns only ever land
    in compute-padding ("junk") output columns which are sliced off outside."""
    return jnp.concatenate([v[:, s:, :], v[:, :s, :]], axis=1)


# ----------------------------- Pallas kernels ----------------------------- #

def _stem_conv_kernel(x_ref, w_ref, b_ref, o_ref, acc_ref):
    """Fused dual-backbone stem: 3x3 'same' conv over packed rgb||disp input.

    x_ref   : (H+2, Wc+2, 4)   bf16  zero-padded (1 row/col halo, right cols zero)
    w_ref   : (3, 3, 4, 512)   bf16  block-diag [W_rgb | 0 ; 0 | W_d]
    b_ref   : (1, 512)         f32
    o_ref   : (H, Wc, 512)     bf16  = concat(ReLU(conv_rgb), ReLU(conv_d))
    acc_ref : (H*Wc, 512)      f32   VMEM accumulator scratch
    """
    Ho, Wc, Cout = o_ref.shape
    Cin = x_ref.shape[-1]
    M = Ho * Wc
    acc_ref[...] = jnp.zeros_like(acc_ref)
    # Cin=4 slices are tiny (<= a few KB); hoisting kw shifts is not worth it here.
    for kh in range(3):
        for kw in range(3):
            lhs = x_ref[kh:kh + Ho, kw:kw + Wc, :].reshape(M, Cin)
            acc_ref[...] += jnp.dot(lhs, w_ref[kh, kw, :, :],
                                    preferred_element_type=jnp.float32)
    o = jnp.maximum(acc_ref[...] + b_ref[...], 0.0)
    o_ref[...] = o.reshape(Ho, Wc, Cout).astype(o_ref.dtype)


def _fused_trans_rpn_kernel(x_ref, ws_ref, bs_ref, wr_ref, br_ref, wh_ref, bh_ref,
                            feat_ref, head_ref,
                            xs_ref, acc_ref, featp_ref, fps_ref, *, w_valid):
    """sml_trans (3x3 VALID) + full RPN head in one kernel, all in VMEM.

    x_ref    : (H, Wc, 512)       bf16  stem output (concat features), cols >= w_valid+2 junk
    ws_ref   : (3, 3, 512, 256)   bf16  sml_trans weights
    bs_ref   : (1, 256)           f32
    wr_ref   : (3, 3, 256, 256)   bf16  RPN shared 3x3 conv
    br_ref   : (1, 256)           f32
    wh_ref   : (256, HEAD_PAD)    bf16  [cls(3) | bbox(12) | zeros]
    bh_ref   : (1, HEAD_PAD)      f32
    feat_ref : (Ho, Wc, 256)      f32   features output (valid cols < w_valid)
    head_ref : (Ho, Wc, HEAD_PAD) bf16  lane-dense fused head output
    scratch  : xs (2,H,Wc,512) bf16, acc (Ho*Wc,256) f32 (shared by both convs),
               featp (Ho+2,Wc,256) bf16, fps (2,Ho+2,Wc,256) bf16
    """
    H, Wc, Cin = x_ref.shape
    Ho, _, Cf = feat_ref.shape
    Ch = head_ref.shape[-1]
    M = Ho * Wc

    # ---- hoisted column shifts for sml_trans (kw = 1, 2) ----
    xv = x_ref[...]
    xs_ref[0] = _shift_left_w(xv, 1)
    xs_ref[1] = _shift_left_w(xv, 2)

    # ---- sml_trans: 3x3 VALID conv, f32 accumulation in VMEM scratch ----
    acc_ref[...] = jnp.zeros_like(acc_ref)
    for kh in range(3):
        acc_ref[...] += jnp.dot(x_ref[kh:kh + Ho, :, :].reshape(M, Cin),
                                ws_ref[kh, 0, :, :], preferred_element_type=jnp.float32)
        acc_ref[...] += jnp.dot(xs_ref[0, kh:kh + Ho, :, :].reshape(M, Cin),
                                ws_ref[kh, 1, :, :], preferred_element_type=jnp.float32)
        acc_ref[...] += jnp.dot(xs_ref[1, kh:kh + Ho, :, :].reshape(M, Cin),
                                ws_ref[kh, 2, :, :], preferred_element_type=jnp.float32)
    feat = (acc_ref[...] + bs_ref[...]).reshape(Ho, Wc, Cf)
    # zero the compute-padding columns so they behave as RPN zero-padding
    col = jax.lax.broadcasted_iota(jnp.int32, (Ho, Wc, Cf), 1)
    feat = jnp.where(col < w_valid, feat, 0.0)
    feat_ref[...] = feat                           # f32 features, no wrapper astype pass

    # ---- zero-row-padded bf16 feature canvas for the pad=1 RPN conv ----
    featp_ref[0:1] = jnp.zeros((1, Wc, Cf), featp_ref.dtype)
    featp_ref[Ho + 1:Ho + 2] = jnp.zeros((1, Wc, Cf), featp_ref.dtype)
    featp_ref[1:Ho + 1] = feat.astype(featp_ref.dtype)

    # hoisted column shifts for the RPN conv (kw=0 -> right shift 1, kw=2 -> left shift 1)
    fp = featp_ref[...]
    fps_ref[0] = _shift_left_w(fp, Wc - 1)         # featp[:, j-1]; col 0 reads a zeroed col
    fps_ref[1] = _shift_left_w(fp, 1)              # featp[:, j+1]

    # ---- RPN shared 3x3 conv (pad=1) + ReLU, reusing the accumulator ----
    acc_ref[...] = jnp.zeros_like(acc_ref)
    for kh in range(3):
        acc_ref[...] += jnp.dot(fps_ref[0, kh:kh + Ho, :, :].reshape(M, Cf),
                                wr_ref[kh, 0, :, :], preferred_element_type=jnp.float32)
        acc_ref[...] += jnp.dot(featp_ref[kh:kh + Ho, :, :].reshape(M, Cf),
                                wr_ref[kh, 1, :, :], preferred_element_type=jnp.float32)
        acc_ref[...] += jnp.dot(fps_ref[1, kh:kh + Ho, :, :].reshape(M, Cf),
                                wr_ref[kh, 2, :, :], preferred_element_type=jnp.float32)
    t = jnp.maximum(acc_ref[...] + br_ref[...], 0.0).astype(jnp.bfloat16)   # (M, 256)

    # ---- fused cls|bbox 1x1 heads: one lane-dense matmul, bf16 writeback ----
    heads = jnp.dot(t, wh_ref[...], preferred_element_type=jnp.float32) + bh_ref[...]
    head_ref[...] = heads.reshape(Ho, Wc, Ch).astype(head_ref.dtype)


# ----------------------------- pallas_call wrappers ----------------------------- #

def stem_conv(x4p, w, b):
    """x4p: (N, H+2, Wc+2, 4) bf16; w: (3,3,4,512) bf16; b: (512,) f32."""
    N, Hi, Wi, Cin = x4p.shape
    H, Wc = Hi - 2, Wi - 2
    Cout = w.shape[-1]
    return pl.pallas_call(
        _stem_conv_kernel,
        out_shape=jax.ShapeDtypeStruct((N, H, Wc, Cout), jnp.bfloat16),
        grid=(N,),
        in_specs=[
            pl.BlockSpec((None, Hi, Wi, Cin), lambda n: (n, 0, 0, 0)),
            pl.BlockSpec((3, 3, Cin, Cout), lambda n: (0, 0, 0, 0)),   # weights resident
            pl.BlockSpec((1, Cout), lambda n: (0, 0)),
        ],
        out_specs=pl.BlockSpec((None, H, Wc, Cout), lambda n: (n, 0, 0, 0)),
        scratch_shapes=[pltpu.VMEM((H * Wc, Cout), jnp.float32)],
        compiler_params=pltpu.CompilerParams(
            dimension_semantics=("parallel",),
            vmem_limit_bytes=VMEM_LIMIT),
    )(x4p, w, b.reshape(1, Cout))


def fused_trans_rpn(x, ws, bs, wr, br, wh, bh, *, w_valid):
    """x: (N, H, Wc, 512) bf16 stem output. Returns (features_f32, head_bf16)."""
    N, H, Wc, Cin = x.shape
    Ho = H - 2
    Cf = ws.shape[-1]
    Ch = wh.shape[-1]
    M = Ho * Wc
    kernel = functools.partial(_fused_trans_rpn_kernel, w_valid=w_valid)
    return pl.pallas_call(
        kernel,
        out_shape=(jax.ShapeDtypeStruct((N, Ho, Wc, Cf), jnp.float32),
                   jax.ShapeDtypeStruct((N, Ho, Wc, Ch), jnp.bfloat16)),
        grid=(N,),
        in_specs=[
            pl.BlockSpec((None, H, Wc, Cin), lambda n: (n, 0, 0, 0)),
            pl.BlockSpec((3, 3, Cin, Cf), lambda n: (0, 0, 0, 0)),
            pl.BlockSpec((1, Cf), lambda n: (0, 0)),
            pl.BlockSpec((3, 3, Cf, Cf), lambda n: (0, 0, 0, 0)),
            pl.BlockSpec((1, Cf), lambda n: (0, 0)),
            pl.BlockSpec((Cf, Ch), lambda n: (0, 0)),
            pl.BlockSpec((1, Ch), lambda n: (0, 0)),
        ],
        out_specs=[pl.BlockSpec((None, Ho, Wc, Cf), lambda n: (n, 0, 0, 0)),
                   pl.BlockSpec((None, Ho, Wc, Ch), lambda n: (n, 0, 0, 0))],
        scratch_shapes=[
            pltpu.VMEM((2, H, Wc, Cin), jnp.bfloat16),      # shifted sml_trans input
            pltpu.VMEM((M, Cf), jnp.float32),               # shared f32 accumulator
            pltpu.VMEM((Ho + 2, Wc, Cf), jnp.bfloat16),     # zero-row-padded features
            pltpu.VMEM((2, Ho + 2, Wc, Cf), jnp.bfloat16),  # shifted padded features
        ],
        compiler_params=pltpu.CompilerParams(
            dimension_semantics=("parallel",),
            vmem_limit_bytes=VMEM_LIMIT),
    )(x, ws, bs.reshape(1, Cf), wr, br.reshape(1, Cf), wh, bh.reshape(1, Ch))


# ----------------------------- parameter construction ----------------------------- #

def init_params(key):
    def conv_init(k, kh, kw, cin, cout, scale=0.05):
        kw_, kb_ = jax.random.split(k)
        w = scale * jax.random.normal(kw_, (kh, kw, cin, cout), jnp.float32)
        b = 0.01 * jax.random.normal(kb_, (cout,), jnp.float32)
        return w, b

    ks = jax.random.split(key, 6)
    p = {}
    # stand-in backbones (TODO(synk): real build_backbone(cfg) is a ResNet+FPN)
    p["backbone_rgb_w"], p["backbone_rgb_b"] = conv_init(ks[0], 3, 3, 3, BACKBONE_OUT_CH)
    p["backbone_d_w"],   p["backbone_d_b"]   = conv_init(ks[1], 3, 3, 1, BACKBONE_OUT_CH)
    # self.sml_trans = nn.Conv2d(512, 256, 3)  (no padding)
    p["sml_trans_w"],    p["sml_trans_b"]    = conv_init(ks[2], 3, 3, 2 * BACKBONE_OUT_CH, 256)
    # RPN head (shared conv + cls logits + bbox deltas)
    p["rpn_conv_w"],     p["rpn_conv_b"]     = conv_init(ks[3], 3, 3, 256, 256)
    p["rpn_cls_w"],      p["rpn_cls_b"]      = conv_init(ks[4], 1, 1, 256, NUM_ANCHORS)
    p["rpn_bbox_w"],     p["rpn_bbox_b"]     = conv_init(ks[5], 1, 1, 256, 4 * NUM_ANCHORS)
    return p


# ----------------------------- forward pass ----------------------------- #

def generalized_rcnn_2b_forward(params, images_nchw, disps, image_sizes):
    """
    images_nchw : (N, 3, H, W) float32   (ImageList.tensors)
    disps       : list of (1, h_k, w_k) float32 disparity maps
    image_sizes : list of (h, w) tuples  (ImageList.image_sizes)
    """
    N, _, H, W = images_nchw.shape

    # --- s0l / s1l max-size loop (mirrors the PyTorch loop) ---
    s0l = max(s[0] for s in image_sizes)
    s1l = max(s[1] for s in image_sizes)
    assert s0l <= H and s1l <= W, "disparity canvas exceeds padded image canvas"

    # --- disps_tensors = zeros(N, 1, s0l, s1l); paste each disparity top-left ---
    # (pad + stack instead of N sequential scatter updates)
    # NOTE: padded regions of smaller images are convolved like real pixels,
    # matching padded-batch PyTorch behavior (downstream consumers must mask).
    disps_tensors = jnp.stack(
        [jnp.pad(d, ((0, 0), (0, s0l - d.shape[1]), (0, s1l - d.shape[2])))
         for d in disps], axis=0)                               # (N, 1, s0l, s1l)
    if (s0l, s1l) != (H, W):   # align disparity canvas with the padded image canvas
        disps_tensors = jnp.pad(
            disps_tensors, ((0, 0), (0, 0), (0, H - s0l), (0, W - s1l)))

    # NCHW -> NHWC, pack rgb||disp into 4 channels, bf16 MXU operands
    # (explicit precision choice: bf16 operands, f32 accumulation).
    x4 = jnp.concatenate(
        [jnp.transpose(images_nchw, (0, 2, 3, 1)),
         jnp.transpose(disps_tensors, (0, 2, 3, 1))], axis=-1).astype(jnp.bfloat16)

    Wc = _round_up(W, 16)      # 16-aligned compute width (bf16 packs 2 rows/sublane)
    # spatial zero pad for the 3x3 'same' stem: 1 row halo, 1 left col, rest right
    x4p = jnp.pad(x4, ((0, 0), (1, 1), (1, Wc + 1 - W), (0, 0)))   # (N, H+2, Wc+2, 4)

    # --- block-diagonal stem weights: one conv emits concat(rgb, d) directly ---
    w_stem = jnp.zeros((3, 3, 4, 2 * BACKBONE_OUT_CH), jnp.float32)
    w_stem = w_stem.at[:, :, :3, :BACKBONE_OUT_CH].set(params["backbone_rgb_w"])
    w_stem = w_stem.at[:, :, 3:, BACKBONE_OUT_CH:].set(params["backbone_d_w"])
    b_stem = jnp.concatenate([params["backbone_rgb_b"], params["backbone_d_b"]])

    stem = stem_conv(x4p, w_stem.astype(jnp.bfloat16), b_stem)     # (N, H, Wc, 512) bf16

    # --- fused RPN head weights: [cls(3) | bbox(12) | zeros] -> 128 lanes ---
    wh = jnp.zeros((BACKBONE_OUT_CH, HEAD_PAD), jnp.float32)
    wh = wh.at[:, :NUM_ANCHORS].set(
        params["rpn_cls_w"].reshape(BACKBONE_OUT_CH, NUM_ANCHORS))
    wh = wh.at[:, NUM_ANCHORS:NUM_ANCHORS + 4 * NUM_ANCHORS].set(
        params["rpn_bbox_w"].reshape(BACKBONE_OUT_CH, 4 * NUM_ANCHORS))
    bh = jnp.zeros((HEAD_PAD,), jnp.float32)
    bh = bh.at[:NUM_ANCHORS].set(params["rpn_cls_b"])
    bh = bh.at[NUM_ANCHORS:NUM_ANCHORS + 4 * NUM_ANCHORS].set(params["rpn_bbox_b"])

    # --- single pallas_call: sml_trans conv3x3 + RPN conv3x3+ReLU + cls|bbox 1x1 ---
    Wo = W - 2
    feat, head = fused_trans_rpn(
        stem,
        params["sml_trans_w"].astype(jnp.bfloat16), params["sml_trans_b"],
        params["rpn_conv_w"].astype(jnp.bfloat16), params["rpn_conv_b"],
        wh.astype(jnp.bfloat16), bh, w_valid=Wo)

    features = (feat[:, :, :Wo, :],)                               # f32 (N, H-2, W-2, 256)
    head = head[:, :, :Wo, :]
    objectness = head[..., :NUM_ANCHORS].astype(jnp.float32)
    rpn_box_regression = head[..., NUM_ANCHORS:NUM_ANCHORS + 4 * NUM_ANCHORS].astype(jnp.float32)

    # TODO(synk): proposal decoding / NMS / ROIAlign / box+mask heads (BoxList
    #             outputs) have no clean Pallas equivalent; return features +
    #             raw RPN head outputs instead.
    return {
        "features": features,
        "objectness": (objectness,),
        "rpn_box_regression": (rpn_box_regression,),
    }


# ----------------------------- main ----------------------------- #

if __name__ == "__main__":
    key = jax.random.PRNGKey(0)
    k_img, k_d0, k_d1, k_par = jax.random.split(key, 4)

    N, H, W = 2, 16, 16
    images = jax.random.normal(k_img, (N, 3, H, W), jnp.float32)
    image_sizes = [(16, 16), (14, 12)]
    disps = [
        jax.random.normal(k_d0, (1, 16, 16), jnp.float32),
        jax.random.normal(k_d1, (1, 14, 12), jnp.float32),
    ]

    params = init_params(k_par)

    out = generalized_rcnn_2b_forward(params, images, disps, image_sizes)
    jax.block_until_ready(out)

    # sanity on shapes implied by the module
    assert out["features"][0].shape == (N, 14, 14, 256)            # 3x3 sml_trans, no pad
    assert out["objectness"][0].shape == (N, 14, 14, NUM_ANCHORS)
    assert out["rpn_box_regression"][0].shape == (N, 14, 14, 4 * NUM_ANCHORS)
    assert bool(jnp.all(jnp.isfinite(out["features"][0])))

    print("KERNEL_OK")
</pallas_src>

<mosaic_0001>
module attributes {stable_mosaic.version = 11 : i64} {
  func.func @_stem_conv_kernel(%arg0: i32, %arg1: memref<1x18x18x4xbf16, #tpu.memory_space<vmem>>, %arg2: memref<3x3x4x512xbf16, #tpu.memory_space<vmem>>, %arg3: memref<1x512xf32, #tpu.memory_space<vmem>>, %arg4: memref<1x16x16x512xbf16, #tpu.memory_space<vmem>>, %arg5: memref<256x512xf32, #tpu.memory_space<vmem>>) attributes {dimension_semantics = [#tpu.dimension_semantics<parallel>], iteration_bounds = array<i64: 2>, scalar_prefetch = 0 : i64, scratch_operands = 1 : i64, tpu.core_type = #tpu.core_type<tc>, window_params = [{transform_indices = @transform_0, window_bounds = array<i64: 1, 18, 18, 4>}, {pipeline_mode = #tpu.pipeline_mode<synchronous>, transform_indices = @transform_1, window_bounds = array<i64: 3, 3, 4, 512>}, {pipeline_mode = #tpu.pipeline_mode<synchronous>, transform_indices = @transform_2, window_bounds = array<i64: 1, 512>}, {transform_indices = @transform_3, window_bounds = array<i64: 1, 16, 16, 512>}]} {
    %cst = arith.constant 0.000000e+00 : f32
    %0 = vector.broadcast %cst : f32 to vector<256x512xf32>
    %c0 = arith.constant 0 : index
    %c0_0 = arith.constant 0 : index
    %1 = vector.load %arg5[%c0, %c0_0] : memref<256x512xf32, #tpu.memory_space<vmem>>, vector<256x512xf32>
    tpu.vector_store %arg5[%c0, %c0_0], %0 {strides = array<i32>} : memref<256x512xf32, #tpu.memory_space<vmem>>, vector<256x512xf32>,
    %c0_1 = arith.constant 0 : index
    %c0_2 = arith.constant 0 : index
    %c0_3 = arith.constant 0 : index
    %c0_4 = arith.constant 0 : index
    %2 = vector.load %arg1[%c0_1, %c0_2, %c0_3, %c0_4] : memref<1x18x18x4xbf16, #tpu.memory_space<vmem>>, vector<1x16x16x4xbf16>
    %3 = vector.shape_cast %2 : vector<1x16x16x4xbf16> to vector<16x16x4xbf16>
    %4 = vector.shape_cast %3 : vector<16x16x4xbf16> to vector<256x4xbf16>
    %c0_5 = arith.constant 0 : index
    %c0_6 = arith.constant 0 : index
    %5 = vector.load %arg5[%c0_5, %c0_6] : memref<256x512xf32, #tpu.memory_space<vmem>>, vector<256x512xf32>
    %c0_7 = arith.constant 0 : index
    %c0_8 = arith.constant 0 : index
    %c0_9 = arith.constant 0 : index
    %c0_10 = arith.constant 0 : index
    %6 = vector.load %arg2[%c0_7, %c0_8, %c0_9, %c0_10] : memref<3x3x4x512xbf16, #tpu.memory_space<vmem>>, vector<1x1x4x512xbf16>
    %7 = vector.shape_cast %6 : vector<1x1x4x512xbf16> to vector<4x512xbf16>
    %cst_11 = arith.constant dense<0.000000e+00> : vector<256x512xf32>
    %8 = tpu.matmul %4, %7, %cst_11 {dimension_numbers = #tpu.dot_dimension_numbers<[1], [0], [0], [1], [0, 0, 1, 1], [], []>} : vector<256x4xbf16>, vector<4x512xbf16>, vector<256x512xf32> -> vector<256x512xf32>
    %9 = arith.addf %5, %8 : vector<256x512xf32>
    %c0_12 = arith.constant 0 : index
    %c0_13 = arith.constant 0 : index
    %10 = vector.load %arg5[%c0_12, %c0_13] : memref<256x512xf32, #tpu.memory_space<vmem>>, vector<256x512xf32>
    tpu.vector_store %arg5[%c0_12, %c0_13], %9 {strides = array<i32>} : memref<256x512xf32, #tpu.memory_space<vmem>>, vector<256x512xf32>,
    %c0_14 = arith.constant 0 : index
    %c0_15 = arith.constant 0 : index
    %c1 = arith.constant 1 : index
    %c0_16 = arith.constant 0 : index
    %11 = vector.load %arg1[%c0_14, %c0_15, %c1, %c0_16] : memref<1x18x18x4xbf16, #tpu.memory_space<vmem>>, vector<1x16x16x4xbf16>
    %12 = vector.shape_cast %11 : vector<1x16x16x4xbf16> to vector<16x16x4xbf16>
    %13 = vector.shape_cast %12 : vector<16x16x4xbf16> to vector<256x4xbf16>
    %c0_17 = arith.constant 0 : index
    %c0_18 = arith.constant 0 : index
    %14 = vector.load %arg5[%c0_17, %c0_18] : memref<256x512xf32, #tpu.memory_space<vmem>>, vector<256x512xf32>
    %c0_19 = arith.constant 0 : index
    %c1_20 = arith.constant 1 : index
    %c0_21 = arith.constant 0 : index
    %c0_22 = arith.constant 0 : index
    %15 = vector.load %arg2[%c0_19, %c1_20, %c0_21, %c0_22] : memref<3x3x4x512xbf16, #tpu.memory_space<vmem>>, vector<1x1x4x512xbf16>
    %16 = vector.shape_cast %15 : vector<1x1x4x512xbf16> to vector<4x512xbf16>
    %cst_23 = arith.constant dense<0.000000e+00> : vector<256x512xf32>
    %17 = tpu.matmul %13, %16, %cst_23 {dimension_numbers = #tpu.dot_dimension_numbers<[1], [0], [0], [1], [0, 0, 1, 1], [], []>} : vector<256x4xbf16>, vector<4x512xbf16>, vector<256x512xf32> -> vector<256x512xf32>
    %18 = arith.addf %14, %17 : vector<256x512xf32>
    %c0_24 = arith.constant 0 : index
    %c0_25 = arith.constant 0 : index
    %19 = vector.load %arg5[%c0_24, %c0_25] : memref<256x512xf32, #tpu.memory_space<vmem>>, vector<256x512xf32>
    tpu.vector_store %arg5[%c0_24, %c0_25], %18 {strides = array<i32>} : memref<256x512xf32, #tpu.memory_space<vmem>>, vector<256x512xf32>,
    %c0_26 = arith.constant 0 : index
    %c0_27 = arith.constant 0 : index
    %c2 = arith.constant 2 : index
    %c0_28 = arith.constant 0 : index
    %20 = vector.load %arg1[%c0_26, %c0_27, %c2, %c0_28] : memref<1x18x18x4xbf16, #tpu.memory_space<vmem>>, vector<1x16x16x4xbf16>
    %21 = vector.shape_cast %20 : vector<1x16x16x4xbf16> to vector<16x16x4xbf16>
    %22 = vector.shape_cast %21 : vector<16x16x4xbf16> to vector<256x4xbf16>
    %c0_29 = arith.constant 0 : index
    %c0_30 = arith.constant 0 : index
    %23 = vector.load %arg5[%c0_29, %c0_30] : memref<256x512xf32, #tpu.memory_space<vmem>>, vector<256x512xf32>
    %c0_31 = arith.constant 0 : index
    %c2_32 = arith.constant 2 : index
    %c0_33 = arith.constant 0 : index
    %c0_34 = arith.constant 0 : index
    %24 = vector.load %arg2[%c0_31, %c2_32, %c0_33, %c0_34] : memref<3x3x4x512xbf16, #tpu.memory_space<vmem>>, vector<1x1x4x512xbf16>
    %25 = vector.shape_cast %24 : vector<1x1x4x512xbf16> to vector<4x512xbf16>
    %cst_35 = arith.constant dense<0.000000e+00> : vector<256x512xf32>
    %26 = tpu.matmul %22, %25, %cst_35 {dimension_numbers = #tpu.dot_dimension_numbers<[1], [0], [0], [1], [0, 0, 1, 1], [], []>} : vector<256x4xbf16>, vector<4x512xbf16>, vector<256x512xf32> -> vector<256x512xf32>
    %27 = arith.addf %23, %26 : vector<256x512xf32>
    %c0_36 = arith.constant 0 : index
    %c0_37 = arith.constant 0 : index
    %28 = vector.load %arg5[%c0_36, %c0_37] : memref<256x512xf32, #tpu.memory_space<vmem>>, vector<256x512xf32>
    tpu.vector_store %arg5[%c0_36, %c0_37], %27 {strides = array<i32>} : memref<256x512xf32, #tpu.memory_space<vmem>>, vector<256x512xf32>,
    %c0_38 = arith.constant 0 : index
    %c1_39 = arith.constant 1 : index
    %c0_40 = arith.constant 0 : index
    %c0_41 = arith.constant 0 : index
    %29 = vector.load %arg1[%c0_38, %c1_39, %c0_40, %c0_41] : memref<1x18x18x4xbf16, #tpu.memory_space<vmem>>, vector<1x16x16x4xbf16>
    %30 = vector.shape_cast %29 : vector<1x16x16x4xbf16> to vector<16x16x4xbf16>
    %31 = vector.shape_cast %30 : vector<16x16x4xbf16> to vector<256x4xbf16>
    %c0_42 = arith.constant 0 : index
    %c0_43 = arith.constant 0 : index
    %32 = vector.load %arg5[%c0_42, %c0_43] : memref<256x512xf32, #tpu.memory_space<vmem>>, vector<256x512xf32>
    %c1_44 = arith.constant 1 : index
    %c0_45 = arith.constant 0 : index
    %c0_46 = arith.constant 0 : index
    %c0_47 = arith.constant 0 : index
    %33 = vector.load %arg2[%c1_44, %c0_45, %c0_46, %c0_47] : memref<3x3x4x512xbf16, #tpu.memory_space<vmem>>, vector<1x1x4x512xbf16>
    %34 = vector.shape_cast %33 : vector<1x1x4x512xbf16> to vector<4x512xbf16>
    %cst_48 = arith.constant dense<0.000000e+00> : vector<256x512xf32>
    %35 = tpu.matmul %31, %34, %cst_48 {dimension_numbers = #tpu.dot_dimension_numbers<[1], [0], [0], [1], [0, 0, 1, 1], [], []>} : vector<256x4xbf16>, vector<4x512xbf16>, vector<256x512xf32> -> vector<256x512xf32>
    %36 = arith.addf %32, %35 : vector<256x512xf32>
    %c0_49 = arith.constant 0 : index
    %c0_50 = arith.constant 0 : index
    %37 = vector.load %arg5[%c0_49, %c0_50] : memref<256x512xf32, #tpu.memory_space<vmem>>, vector<256x512xf32>
    tpu.vector_store %arg5[%c0_49, %c0_50], %36 {strides = array<i32>} : memref<256x512xf32, #tpu.memory_space<vmem>>, vector<256x512xf32>,
    %c0_51 = arith.constant 0 : index
    %c1_52 = arith.constant 1 : index
    %c1_53 = arith.constant 1 : index
    %c0_54 = arith.constant 0 : index
    %38 = vector.load %arg1[%c0_51, %c1_52, %c1_53, %c0_54] : memref<1x18x18x4xbf16, #tpu.memory_space<vmem>>, vector<1x16x16x4xbf16>
    %39 = vector.shape_cast %38 : vector<1x16x16x4xbf16> to vector<16x16x4xbf16>
    %40 = vector.shape_cast %39 : vector<16x16x4xbf16> to vector<256x4xbf16>
    %c0_55 = arith.constant 0 : index
    %c0_56 = arith.constant 0 : index
    %41 = vector.load %arg5[%c0_55, %c0_56] : memref<256x512xf32, #tpu.memory_space<vmem>>, vector<256x512xf32>
    %c1_57 = arith.constant 1 : index
    %c1_58 = arith.constant 1 : index
    %c0_59 = arith.constant 0 : index
    %c0_60 = arith.constant 0 : index
    %42 = vector.load %arg2[%c1_57, %c1_58, %c0_59, %c0_60] : memref<3x3x4x512xbf16, #tpu.memory_space<vmem>>, vector<1x1x4x512xbf16>
    %43 = vector.shape_cast %42 : vector<1x1x4x512xbf16> to vector<4x512xbf16>
    %cst_61 = arith.constant dense<0.000000e+00> : vector<256x512xf32>
    %44 = tpu.matmul %40, %43, %cst_61 {dimension_numbers = #tpu.dot_dimension_numbers<[1], [0], [0], [1], [0, 0, 1, 1], [], []>} : vector<256x4xbf16>, vector<4x512xbf16>, vector<256x512xf32> -> vector<256x512xf32>
    %45 = arith.addf %41, %44 : vector<256x512xf32>
    %c0_62 = arith.constant 0 : index
    %c0_63 = arith.constant 0 : index
    %46 = vector.load %arg5[%c0_62, %c0_63] : memref<256x512xf32, #tpu.memory_space<vmem>>, vector<256x512xf32>
    tpu.vector_store %arg5[%c0_62, %c0_63], %45 {strides = array<i32>} : memref<256x512xf32, #tpu.memory_space<vmem>>, vector<256x512xf32>,
    %c0_64 = arith.constant 0 : index
    %c1_65 = arith.constant 1 : index
    %c2_66 = arith.constant 2 : index
    %c0_67 = arith.constant 0 : index
    %47 = vector.load %arg1[%c0_64, %c1_65, %c2_66, %c0_67] : memref<1x18x18x4xbf16, #tpu.memory_space<vmem>>, vector<1x16x16x4xbf16>
    %48 = vector.shape_cast %47 : vector<1x16x16x4xbf16> to vector<16x16x4xbf16>
    %49 = vector.shape_cast %48 : vector<16x16x4xbf16> to vector<256x4xbf16>
    %c0_68 = arith.constant 0 : index
    %c0_69 = arith.constant 0 : index
    %50 = vector.load %arg5[%c0_68, %c0_69] : memref<256x512xf32, #tpu.memory_space<vmem>>, vector<256x512xf32>
    %c1_70 = arith.constant 1 : index
    %c2_71 = arith.constant 2 : index
    %c0_72 = arith.constant 0 : index
    %c0_73 = arith.constant 0 : index
    %51 = vector.load %arg2[%c1_70, %c2_71, %c0_72, %c0_73] : memref<3x3x4x512xbf16, #tpu.memory_space<vmem>>, vector<1x1x4x512xbf16>
    %52 = vector.shape_cast %51 : vector<1x1x4x512xbf16> to vector<4x512xbf16>
    %cst_74 = arith.constant dense<0.000000e+00> : vector<256x512xf32>
    %53 = tpu.matmul %49, %52, %cst_74 {dimension_numbers = #tpu.dot_dimension_numbers<[1], [0], [0], [1], [0, 0, 1, 1], [], []>} : vector<256x4xbf16>, vector<4x512xbf16>, vector<256x512xf32> -> vector<256x512xf32>
    %54 = arith.addf %50, %53 : vector<256x512xf32>
    %c0_75 = arith.constant 0 : index
    %c0_76 = arith.constant 0 : index
    %55 = vector.load %arg5[%c0_75, %c0_76] : memref<256x512xf32, #tpu.memory_space<vmem>>, vector<256x512xf32>
    tpu.vector_store %arg5[%c0_75, %c0_76], %54 {strides = array<i32>} : memref<256x512xf32, #tpu.memory_space<vmem>>, vector<256x512xf32>,
    %c0_77 = arith.constant 0 : index
    %c2_78 = arith.constant 2 : index
    %c0_79 = arith.constant 0 : index
    %c0_80 = arith.constant 0 : index
    %56 = vector.load %arg1[%c0_77, %c2_78, %c0_79, %c0_80] : memref<1x18x18x4xbf16, #tpu.memory_space<vmem>>, vector<1x16x16x4xbf16>
    %57 = vector.shape_cast %56 : vector<1x16x16x4xbf16> to vector<16x16x4xbf16>
    %58 = vector.shape_cast %57 : vector<16x16x4xbf16> to vector<256x4xbf16>
    %c0_81 = arith.constant 0 : index
    %c0_82 = arith.constant 0 : index
    %59 = vector.load %arg5[%c0_81, %c0_82] : memref<256x512xf32, #tpu.memory_space<vmem>>, vector<256x512xf32>
    %c2_83 = arith.constant 2 : index
    %c0_84 = arith.constant 0 : index
    %c0_85 = arith.constant 0 : index
    %c0_86 = arith.constant 0 : index
    %60 = vector.load %arg2[%c2_83, %c0_84, %c0_85, %c0_86] : memref<3x3x4x512xbf16, #tpu.memory_space<vmem>>, vector<1x1x4x512xbf16>
    %61 = vector.shape_cast %60 : vector<1x1x4x512xbf16> to vector<4x512xbf16>
    %cst_87 = arith.constant dense<0.000000e+00> : vector<256x512xf32>
    %62 = tpu.matmul %58, %61, %cst_87 {dimension_numbers = #tpu.dot_dimension_numbers<[1], [0], [0], [1], [0, 0, 1, 1], [], []>} : vector<256x4xbf16>, vector<4x512xbf16>, vector<256x512xf32> -> vector<256x512xf32>
    %63 = arith.addf %59, %62 : vector<256x512xf32>
    %c0_88 = arith.constant 0 : index
    %c0_89 = arith.constant 0 : index
    %64 = vector.load %arg5[%c0_88, %c0_89] : memref<256x512xf32, #tpu.memory_space<vmem>>, vector<256x512xf32>
    tpu.vector_store %arg5[%c0_88, %c0_89], %63 {strides = array<i32>} : memref<256x512xf32, #tpu.memory_space<vmem>>, vector<256x512xf32>,
    %c0_90 = arith.constant 0 : index
    %c2_91 = arith.constant 2 : index
    %c1_92 = arith.constant 1 : index
    %c0_93 = arith.constant 0 : index
    %65 = vector.load %arg1[%c0_90, %c2_91, %c1_92, %c0_93] : memref<1x18x18x4xbf16, #tpu.memory_space<vmem>>, vector<1x16x16x4xbf16>
    %66 = vector.shape_cast %65 : vector<1x16x16x4xbf16> to vector<16x16x4xbf16>
    %67 = vector.shape_cast %66 : vector<16x16x4xbf16> to vector<256x4xbf16>
    %c0_94 = arith.constant 0 : index
    %c0_95 = arith.constant 0 : index
    %68 = vector.load %arg5[%c0_94, %c0_95] : memref<256x512xf32, #tpu.memory_space<vmem>>, vector<256x512xf32>
    %c2_96 = arith.constant 2 : index
    %c1_97 = arith.constant 1 : index
    %c0_98 = arith.constant 0 : index
    %c0_99 = arith.constant 0 : index
    %69 = vector.load %arg2[%c2_96, %c1_97, %c0_98, %c0_99] : memref<3x3x4x512xbf16, #tpu.memory_space<vmem>>, vector<1x1x4x512xbf16>
    %70 = vector.shape_cast %69 : vector<1x1x4x512xbf16> to vector<4x512xbf16>
    %cst_100 = arith.constant dense<0.000000e+00> : vector<256x512xf32>
    %71 = tpu.matmul %67, %70, %cst_100 {dimension_numbers = #tpu.dot_dimension_numbers<[1], [0], [0], [1], [0, 0, 1, 1], [], []>} : vector<256x4xbf16>, vector<4x512xbf16>, vector<256x512xf32> -> vector<256x512xf32>
    %72 = arith.addf %68, %71 : vector<256x512xf32>
    %c0_101 = arith.constant 0 : index
    %c0_102 = arith.constant 0 : index
    %73 = vector.load %arg5[%c0_101, %c0_102] : memref<256x512xf32, #tpu.memory_space<vmem>>, vector<256x512xf32>
    tpu.vector_store %arg5[%c0_101, %c0_102], %72 {strides = array<i32>} : memref<256x512xf32, #tpu.memory_space<vmem>>, vector<256x512xf32>,
    %c0_103 = arith.constant 0 : index
    %c2_104 = arith.constant 2 : index
    %c2_105 = arith.constant 2 : index
    %c0_106 = arith.constant 0 : index
    %74 = vector.load %arg1[%c0_103, %c2_104, %c2_105, %c0_106] : memref<1x18x18x4xbf16, #tpu.memory_space<vmem>>, vector<1x16x16x4xbf16>
    %75 = vector.shape_cast %74 : vector<1x16x16x4xbf16> to vector<16x16x4xbf16>
    %76 = vector.shape_cast %75 : vector<16x16x4xbf16> to vector<256x4xbf16>
    %c0_107 = arith.constant 0 : index
    %c0_108 = arith.constant 0 : index
    %77 = vector.load %arg5[%c0_107, %c0_108] : memref<256x512xf32, #tpu.memory_space<vmem>>, vector<256x512xf32>
    %c2_109 = arith.constant 2 : index
    %c2_110 = arith.constant 2 : index
    %c0_111 = arith.constant 0 : index
    %c0_112 = arith.constant 0 : index
    %78 = vector.load %arg2[%c2_109, %c2_110, %c0_111, %c0_112] : memref<3x3x4x512xbf16, #tpu.memory_space<vmem>>, vector<1x1x4x512xbf16>
    %79 = vector.shape_cast %78 : vector<1x1x4x512xbf16> to vector<4x512xbf16>
    %cst_113 = arith.constant dense<0.000000e+00> : vector<256x512xf32>
    %80 = tpu.matmul %76, %79, %cst_113 {dimension_numbers = #tpu.dot_dimension_numbers<[1], [0], [0], [1], [0, 0, 1, 1], [], []>} : vector<256x4xbf16>, vector<4x512xbf16>, vector<256x512xf32> -> vector<256x512xf32>
    %81 = arith.addf %77, %80 : vector<256x512xf32>
    %c0_114 = arith.constant 0 : index
    %c0_115 = arith.constant 0 : index
    %82 = vector.load %arg5[%c0_114, %c0_115] : memref<256x512xf32, #tpu.memory_space<vmem>>, vector<256x512xf32>
    tpu.vector_store %arg5[%c0_114, %c0_115], %81 {strides = array<i32>} : memref<256x512xf32, #tpu.memory_space<vmem>>, vector<256x512xf32>,
    %c0_116 = arith.constant 0 : index
    %c0_117 = arith.constant 0 : index
    %83 = vector.load %arg5[%c0_116, %c0_117] : memref<256x512xf32, #tpu.memory_space<vmem>>, vector<256x512xf32>
    %c0_118 = arith.constant 0 : index
    %c0_119 = arith.constant 0 : index
    %84 = vector.load %arg3[%c0_118, %c0_119] : memref<1x512xf32, #tpu.memory_space<vmem>>, vector<1x512xf32>
    %85 = vector.broadcast %84 : vector<1x512xf32> to vector<256x512xf32>
    %86 = arith.addf %83, %85 : vector<256x512xf32>
    %cst_120 = arith.constant 0.000000e+00 : f32
    %87 = vector.broadcast %cst_120 : f32 to vector<256x512xf32>
    %88 = arith.maximumf %86, %87 : vector<256x512xf32>
    %89 = vector.shape_cast %88 : vector<256x512xf32> to vector<16x16x512xf32>
    %90 = arith.truncf %89 : vector<16x16x512xf32> to vector<16x16x512xbf16>
    %c0_121 = arith.constant 0 : index
    %c0_122 = arith.constant 0 : index
    %c0_123 = arith.constant 0 : index
    %c0_124 = arith.constant 0 : index
    %91 = vector.load %arg4[%c0_121, %c0_122, %c0_123, %c0_124] : memref<1x16x16x512xbf16, #tpu.memory_space<vmem>>, vector<1x16x16x512xbf16>
    %92 = vector.shape_cast %91 : vector<1x16x16x512xbf16> to vector<16x16x512xbf16>
    %93 = vector.shape_cast %90 : vector<16x16x512xbf16> to vector<1x16x16x512xbf16>
    tpu.vector_store %arg4[%c0_121, %c0_122, %c0_123, %c0_124], %93 {strides = array<i32>} : memref<1x16x16x512xbf16, #tpu.memory_space<vmem>>, vector<1x16x16x512xbf16>,
    return
  }
  func.func @transform_0(%arg0: i32) -> (i32, i32, i32, i32) {
    %c0_i32 = arith.constant 0 : i32
    %c0_i32_0 = arith.constant 0 : i32
    %c0_i32_1 = arith.constant 0 : i32
    %c0_i32_2 = arith.constant 0 : i32
    return %arg0, %c0_i32, %c0_i32_0, %c0_i32_1 : i32, i32, i32, i32
  }
  func.func @transform_1(%arg0: i32) -> (i32, i32, i32, i32) {
    %c0_i32 = arith.constant 0 : i32
    %c0_i32_0 = arith.constant 0 : i32
    %c0_i32_1 = arith.constant 0 : i32
    %c0_i32_2 = arith.constant 0 : i32
    %c0_i32_3 = arith.constant 0 : i32
    return %c0_i32, %c0_i32_0, %c0_i32_1, %c0_i32_2 : i32, i32, i32, i32
  }
  func.func @transform_2(%arg0: i32) -> (i32, i32) {
    %c0_i32 = arith.constant 0 : i32
    %c0_i32_0 = arith.constant 0 : i32
    %c0_i32_1 = arith.constant 0 : i32
    return %c0_i32, %c0_i32_0 : i32, i32
  }
  func.func @transform_3(%arg0: i32) -> (i32, i32, i32, i32) {
    %c0_i32 = arith.constant 0 : i32
    %c0_i32_0 = arith.constant 0 : i32
    %c0_i32_1 = arith.constant 0 : i32
    %c0_i32_2 = arith.constant 0 : i32
    return %arg0, %c0_i32, %c0_i32_0, %c0_i32_1 : i32, i32, i32, i32
  }
}

</mosaic_0001>

<bundles_post_ra>
// kernel: tpu_custom_call.1
= control target key start
LH: loop header
LB: loop body
LE: loop exit
PB: predicated region body
PF: predicated region fallthrough
CT: control target
= control target key end

     0   :  { %8 = vsyncpa [#allocation4], 0  ;;  %s15326_s0 = inlined_call_operand.vmem [shape: bf16[2,18,18,4], index: 0, kind: input, shape index: {}]   ;;  %s15327_s1 = inlined_call_operand.vmem [shape: bf16[3,3,4,512], index: 1, kind: input, shape index: {}]   ;;  %s15328_s2 = inlined_call_operand.vmem [shape: f32[1,512], index: 2, kind: input, shape index: {}]   ;;  %s15329_s3 = inlined_call_operand.hbm [shape: bf16[2,16,16,512], index: 3, kind: output, shape index: {}]  }
   0x1   :  { %10 = vsyncpa [#allocation4 + $0x1], 0  ;;  %s13547_s12 = smov 0   ;;  %s13549_s13 = smov 0  }
   0x2   :  { %s13551_s14 = smov 0   ;;  %s13553_s15 = smov 0  }
   0x3 LB: > { %s13568_s16 = sadd.s32 4294967295, %s13520_s15   ;;  %s11431_s17 = sadd.s32 4294967294, %s13520_s15   ;;  %s13520_s15 = sphi %s13553_s15, %s15339_s15   ;;  %s13516_s14 = sphi %s13551_s14, %s15338_s14   ;;  %s13512_s13 = sphi %s13549_s13, %s15337_s13   ;;  %s13508_s12 = sphi %s13547_s12, %s15336_s12  }
   0x4   : > { %s13572_s18 = sadd.s32 1, %s13520_s15   ;;  %s91_s19 = sadd.s32 1, %s13516_s14 }
   0x5   : > { %s88_s20 = ssub.s32 %s13520_s15, %s13572_s18  ;;  %p101_p0 = scmp.ne.s32.totalorder %s13516_s14, %s13512_s13 }
   0x6   : > { %p89_p1 = scmp.eq.s32.totalorder %s88_s20, 0  ;;  %p102_p2 = scmp.eq.s32.totalorder %s13568_s16, 1 }
   0x7   : > { %p107_p3 = scmp.ne.s32.totalorder %s13512_s13, %s13508_s12  ;;  %p108_p4 = scmp.eq.s32.totalorder %s11431_s17, 1 }
   0x8   : > { %s13583_s21 = scalar_select %p89_p1, %s13516_s14, %s91_s19  }
   0x9   : > { %p13585_p5 = por %p102_p2, %p101_p0  ;;  %p13589_p6 = por %p108_p4, %p107_p3 }
   0xa   : > { %p11434_p7 = scmp.ge.s32.totalorder %s13520_s15, 1  ;;  %p140_p8 = scmp.lt.s32.totalorder %s13520_s15, 3 }
   0xc   : > { %p141_p9 = pnand %p11434_p7, %p140_p8 }
   0xd   : > { %v458_v0 = vld [vmem:[%s15327_s1] sm:$0xff] (!%p141_p9)  ;;  %v544_v1 = vlaneseq (!%p141_p9)  ;;  %v13522_v2 = vmov (!%p141_p9), 1983009808   ;;  %p164_p10 = scmp.lt.s32.totalorder (!%p141_p9), %s13568_s16, 1  ;;  %v11487_v4 = vld [vmem:[%s15327_s1 + $0x8] sm:$0xff] (!%p141_p9)  ;;  %v13523_v6 = vmov (!%p141_p9), 0  }
   0xe   : > { %144 = sbr.rel (%p141_p9) target bundleno = 1408 (0x580), region = 32  ;;  %v542_v3 = vunpack.c.l.s4 (!%p141_p9), %v13522_v2  ;;  %651 = vmatprep.mubr.bf16.mxu0 (!%p141_p9), %v13523_v6  ;;  %844 = vmatprep.mubr.bf16.mxu1 (!%p141_p9), %v13523_v6  ;;  %v540_v8 = vcombine.high (!%p141_p9), %v458_v0, %v458_v0  ;;  %v1875_v9 = vcombine.high (!%p141_p9), %v11487_v4, %v11487_v4  ;;  %vm606_vm0 = vcmask (!%p141_p9), 1041408   ;;  %v11554_v25 = vld [vmem:[%s15327_s1 + $0x10] sm:$0xff] (!%p141_p9)  ;;  %s161_s4 = sand.u32 (!%p141_p9), 1, %s13512_s13  }
   0xf   : > { %v13602_v5 = vshrl.u32 (!%p141_p9), %v544_v1, 7  ;;  %vm557_vm1 = vcmask (!%p141_p9), 31744   ;;  %v2984_v28 = vcombine.high (!%p141_p9), %v11554_v25, %v11554_v25  ;;  %vm1309_vm2 = vsmask.f32 (!%p141_p9), 3328  ;;  %s12332_s7 = sshll.u32 (!%p141_p9), %s13568_s16, 13  ;;  %s13524_s19 = smov (!%p141_p9), [#allocation3]  }
  0x10   : > { %v543_v7 = vunpack.c.0.s8 (!%p141_p9), %v542_v3  ;;  %vm1310_vm3 = vsmask.f32 (!%p141_p9), 7440  ;;  %vm2690_vm5 = vcmask (!%p141_p9), 1042432   ;;  %vm2691_vm6 = vcmask (!%p141_p9), 1046532   ;;  %s15275_s11 = scalar_lea.hbm (!%p141_p9), %s15329_s3, %s12332_s7  ;;  %s13462_s20 = sshll.u32 (!%p141_p9), %s13524_s19, 4  ;;  %s13463_s20 = int_to_ptr.vmem [resolvable:$false] %s13462_s20 }
  0x11   : > { %vm13724_vm4 = vmor (!%p141_p9), %vm1309_vm2, %vm1310_vm3  ;;  %s13464_s24 = scalar_lea.vmem (!%p141_p9), %s13463_s20, 16384 }
  0x12   : > { %v13608_v10 = vsub.s32 (!%p141_p9), %v543_v7, %v13602_v5  ;;  %vm13920_vm7 = vmor (!%p141_p9), %vm2690_vm5, %vm2691_vm6 }
  0x14   : > { %v547_v11 = vrot.slane (!%p141_p9), %v458_v0, %v13608_v10  ;;  %v554_v12 = vrot.slane (!%p141_p9), %v540_v8, %v13608_v10  ;;  %v1882_v13 = vrot.slane (!%p141_p9), %v11487_v4, %v13608_v10  ;;  %v1889_v14 = vrot.slane (!%p141_p9), %v1875_v9, %v13608_v10 }
  0x15   : > { %s165_s28 = scalar_select %p164_p10, %s13568_s16, 1  ;;  %v13642_v27 = vrot.slane %v11554_v25, %v13608_v10  ;;  %v13647_v30 = vrot.slane %v2984_v28, %v13608_v10 }
  0x16   : > { %v555_v15 = vcombine.high %v547_v11, %v547_v11  ;;  %v556_v16 = vcombine.high %v554_v12, %v554_v12  ;;  %v608_v17 = vsel %vm606_vm0, %v547_v11, 0  ;;  %v614_v18 = vsel %vm606_vm0, %v554_v12, 0  ;;  %s15285_s16 = scalar_lea.sflag [#allocation4], %s161_s4 }
  0x17   : > { %s13357_s29 = smul.u32 216, %s165_s28  ;;  %v1890_v20 = vcombine.high %v1882_v13, %v1882_v13  ;;  %v1891_v21 = vcombine.high %v1889_v14, %v1889_v14  ;;  %v1941_v22 = vsel %vm606_vm0, %v1882_v13, 0  ;;  %v1947_v23 = vsel %vm606_vm0, %v1889_v14, 0 }
  0x18   : > { %11453 = vmatprep.subr.msk.bf16.mxu0 %vm606_vm0, %v555_v15  ;;  %11470 = vmatprep.subr.msk.bf16.mxu1 %vm606_vm0, %v556_v16  ;;  %v2999_v29 = vcombine.high %v13642_v27, %v13642_v27  ;;  %v3000_v31 = vcombine.high %v13647_v30, %v13647_v30 }
  0x19   : > { %s13615_s5 = scalar_lea.vmem %s15326_s0, %s13357_s29  ;;  %620 = vmatpush1.bf16.msra.mxu0 %v608_v17  ;;  %813 = vmatpush1.bf16.msra.mxu1 %v614_v18 }
  0x1a   : > { %v13402_v19 = vld [vmem:[%s13615_s5] sm:$0xff]   ;;  %11504 = vmatprep.subr.msk.bf16.mxu0 %vm606_vm0, %v1890_v20  ;;  %11521 = vmatprep.subr.msk.bf16.mxu1 %vm606_vm0, %v1891_v21  ;;  %v13404_v24 = vld [vmem:[%s13615_s5 + $0xc] sm:$0xff]   ;;  %v13405_v26 = vld [vmem:[%s13615_s5 + $0x18] sm:$0xff]  }
  0x1b   : > { %v13406_v32 = vld [vmem:[%s13615_s5 + $0x24] sm:$0xff]   ;;  %v13407_v33 = vld [vmem:[%s13615_s5 + $0x30] sm:$0xff]   ;;  %v13408_v34 = vld [vmem:[%s13615_s5 + $0x3c] sm:$0xff]  }
  0x1c   : > { %11454 = vmatmul.mubr.msk.bf16.vlgmr.msra.gmra.mrb[0].mxu0 %vm557_vm1, %v13402_v19  ;;  %11471 = vmatmul.mubr.msk.bf16.vlgmr.msra.gmra.mrb[0].mxu1 %vm557_vm1, %v13402_v19  ;;  %v13409_v35 = vld [vmem:[%s13615_s5 + $0x48] sm:$0xff]   ;;  %v13410_v36 = vld [vmem:[%s13615_s5 + $0x54] sm:$0xff]   ;;  %v13411_v37 = vld [vmem:[%s13615_s5 + $0x60] sm:$0xff]  }
  0x1d   : > { %1953 = vmatpush1.bf16.msra.mxu0 %v1941_v22  ;;  %2146 = vmatpush1.bf16.msra.mxu1 %v1947_v23  ;;  %v13412_v38 = vld [vmem:[%s13615_s5 + $0x6c] sm:$0xff]   ;;  %v13413_v39 = vld [vmem:[%s13615_s5 + $0x78] sm:$0xff]   ;;  %v13414_v40 = vld [vmem:[%s13615_s5 + $0x84] sm:$0xff]  }
  0x1e   : > { %661 = vmatprep.mubr.bf16.mxu0 %v13523_v6  ;;  %854 = vmatprep.mubr.bf16.mxu1 %v13523_v6  ;;  %v13415_v41 = vld [vmem:[%s13615_s5 + $0x90] sm:$0xff]   ;;  %v13416_v42 = vld [vmem:[%s13615_s5 + $0x9c] sm:$0xff]   ;;  %v1262_v44 = vld [vmem:[%s13615_s5 + $0x4] sm:$0xf] }
  0x1f   : > { %11571 = vmatprep.subr.msk.bf16.mxu0 %vm606_vm0, %v2999_v29  ;;  %11588 = vmatprep.subr.msk.bf16.mxu1 %vm606_vm0, %v3000_v31  ;;  %v1261_v43 = vld [vmem:[%s13615_s5] sm:$0xf]  ;;  %v1322_v47 = vshll.u32 %v1262_v44, 16  ;;  %v1326_v48 = vshrl.u32 %v1262_v44, 16  ;;  %v1263_v49 = vld [vmem:[%s13615_s5 + $0x8] sm:$0x1] }
  0x20   : > { %v1313_v45 = vshrl.u32 %v1261_v43, 16  ;;  %v1316_v46 = vshll.u32 %v1261_v43, 16  ;;  %v13417_v54 = vld [vmem:[%s13615_s5 + $0xa8] sm:$0xff]   ;;  %v1265_v56 = vld [vmem:[%s13615_s5 + $0x10] sm:$0xf]  ;;  %v1332_v57 = vshll.u32 %v1263_v49, 16 }
  0x21   : > { %v1324_v52 = vrot.slane %v1322_v47, 5  ;;  %v1328_v53 = vrot.slane %v1326_v48, 4  ;;  %v1264_v55 = vld [vmem:[%s13615_s5 + $0xc] sm:$0xf]  ;;  %v1346_v62 = vshll.u32 %v1265_v56, 16  ;;  %v1350_v63 = vshrl.u32 %v1265_v56, 16 }
  0x22   : > { %v1315_v50 = vrot.slane %v1313_v45, 4  ;;  %v1318_v51 = vrot.slane %v1316_v46, 5  ;;  %v1337_v60 = vshrl.u32 %v1264_v55, 16  ;;  %v1340_v61 = vshll.u32 %v1264_v55, 16  ;;  %v1266_v3 = vld [vmem:[%s13615_s5 + $0x14] sm:$0x1] }
  0x23   : > { %v1329_v59 = vor.u32 %v1328_v53, %v1324_v52  ;;  %v1334_v0 = vrot.slane %v1332_v57, 5  ;;  %v13418_v8 = vld [vmem:[%s13615_s5 + $0xb4] sm:$0xff]   ;;  %v1348_v11 = vrot.slane %v1346_v62, 5  ;;  %v1352_v12 = vrot.slane %v1350_v63, 4  ;;  %v1268_v14 = vld [vmem:[%s13615_s5 + $0x1c] sm:$0xf] }
  0x24   : > { %11455 = vmatmul.mubr.msk.bf16.gmra.mrb[4].mxu0 %vm557_vm1, %v13404_v24  ;;  %11472 = vmatmul.mubr.msk.bf16.gmra.mrb[4].mxu1 %vm557_vm1, %v13404_v24  ;;  %v1319_v58 = vor.u32 %v1318_v51, %v1315_v50  ;;  %v1339_v4 = vrot.slane %v1337_v60, 4  ;;  %v1342_v7 = vrot.slane %v1340_v61, 5  ;;  %v1267_v13 = vld [vmem:[%s13615_s5 + $0x18] sm:$0xf]  ;;  %v1356_v15 = vshll.u32 %v1266_v3, 16 }
  0x25   : > { %671 = vmatprep.mubr.bf16.mxu0 %v13523_v6  ;;  %864 = vmatprep.mubr.bf16.mxu1 %v13523_v6  ;;  %v1330_v2 = vrot.slane %v1329_v59, 4  ;;  %v1361_v19 = vshrl.u32 %v1267_v13, 16  ;;  %v1353_v20 = vor.u32 %v1352_v12, %v1348_v11  ;;  %v1364_v21 = vshll.u32 %v1267_v13, 16  ;;  %v1269_v28 = vld [vmem:[%s13615_s5 + $0x20] sm:$0x1] }
  0x26   : > { %v1320_v1 = vrot.slane %v1319_v58, 4  ;;  %v1343_v18 = vor.u32 %v1342_v7, %v1339_v4  ;;  %v1370_v22 = vshll.u32 %v1268_v14, 16  ;;  %v1374_v23 = vshrl.u32 %v1268_v14, 16  ;;  %v1273_v50 = vld [vmem:[%s13615_s5 + $0x30] sm:$0xf] }
  0x27   : > { %v1335_v17 = vsel %vm13724_vm4, %v1330_v2, %v1334_v0  ;;  %v1363_v29 = vrot.slane %v1361_v19, 4  ;;  %v1354_v31 = vrot.slane %v1353_v20, 4  ;;  %v1274_v57 = vld [vmem:[%s13615_s5 + $0x34] sm:$0xf]  ;;  %v1272_v62 = vld [vmem:[%s13615_s5 + $0x2c] sm:$0x1] }
  0x28   : > { %v1325_v16 = vsel %vm13724_vm4, %v1320_v1, %v1324_v52  ;;  %v1344_v25 = vrot.slane %v1343_v18, 4  ;;  %v1409_v63 = vshrl.u32 %v1273_v50, 16  ;;  %v1412_v0 = vshll.u32 %v1273_v50, 16  ;;  %v1275_v14 = vld [vmem:[%s13615_s5 + $0x38] sm:$0x1] }
  0x29   : > { %v11488_v24 = vcombine.low %v1325_v16, %v1335_v17  ;;  %v1418_v1 = vshll.u32 %v1274_v57, 16  ;;  %v1422_v2 = vshrl.u32 %v1274_v57, 16  ;;  %v1276_v17 = vld [vmem:[%s13615_s5 + $0x3c] sm:$0xf]  ;;  %v1277_v19 = vld [vmem:[%s13615_s5 + $0x40] sm:$0xf] }
  0x2a   : > { %v1411_v12 = vrot.slane %v1409_v63, 4  ;;  %v1414_v13 = vrot.slane %v1412_v0, 5  ;;  %v1282_v63 = vld [vmem:[%s13615_s5 + $0x54] sm:$0xf]  ;;  %v1283_v0 = vld [vmem:[%s13615_s5 + $0x58] sm:$0xf] }
  0x2b   : > { %v1424_v16 = vrot.slane %v1422_v2, 4 }
  0x2c   : > { %11456 = vmatmul.mubr.msk.bf16.gmra.mrb[8].mxu0 %vm557_vm1, %v13405_v26  ;;  %11473 = vmatmul.mubr.msk.bf16.gmra.mrb[8].mxu1 %vm557_vm1, %v13405_v26  ;;  %v1358_v26 = vrot.slane %v1356_v15, 5  ;;  %v1420_v15 = vrot.slane %v1418_v1, 5 }
  0x2d   : > { %681 = vmatprep.mubr.bf16.mxu0 %v13523_v6  ;;  %874 = vmatprep.mubr.bf16.mxu1 %v13523_v6 }
  0x34   : > { %11457 = vmatmul.mubr.msk.bf16.gmra.mrb[12].mxu0 %vm557_vm1, %v13406_v32  ;;  %11474 = vmatmul.mubr.msk.bf16.gmra.mrb[12].mxu1 %vm557_vm1, %v13406_v32  ;;  %v1366_v32 = vrot.slane %v1364_v21, 5 }
  0x35   : > { %691 = vmatprep.mubr.bf16.mxu0 %v13523_v6  ;;  %884 = vmatprep.mubr.bf16.mxu1 %v13523_v6 }
  0x36   : > { %v1367_v43 = vor.u32 %v1366_v32, %v1363_v29  ;;  %v1442_v29 = vshll.u32 %v1277_v19, 16 }
  0x3c   : > { %11458 = vmatmul.mubr.msk.bf16.gmra.mrb[16].mxu0 %vm557_vm1, %v13407_v33  ;;  %11475 = vmatmul.mubr.msk.bf16.gmra.mrb[16].mxu1 %vm557_vm1, %v13407_v33  ;;  %v1372_v33 = vrot.slane %v1370_v22, 5 }
  0x3d   : > { %701 = vmatprep.mubr.bf16.mxu0 %v13523_v6  ;;  %894 = vmatprep.mubr.bf16.mxu1 %v13523_v6 }
  0x44   : > { %11459 = vmatmul.mubr.msk.bf16.gmra.mrb[20].mxu0 %vm557_vm1, %v13408_v34  ;;  %11476 = vmatmul.mubr.msk.bf16.gmra.mrb[20].mxu1 %vm557_vm1, %v13408_v34  ;;  %v1376_v34 = vrot.slane %v1374_v23, 4  ;;  %v1415_v23 = vor.u32 %v1414_v13, %v1411_v12  ;;  %v1490_v12 = vshll.u32 %v1283_v0, 16  ;;  %v1494_v13 = vshrl.u32 %v1283_v0, 16  ;;  %v1290_v0 = vld [vmem:[%s13615_s5 + $0x74] sm:$0x1] }
  0x45   : > { %711 = vmatprep.mubr.bf16.mxu0 %v13523_v6  ;;  %904 = vmatprep.mubr.bf16.mxu1 %v13523_v6 }
  0x46   : > { %v1377_v44 = vor.u32 %v1376_v34, %v1372_v33  ;;  %v1416_v34 = vrot.slane %v1415_v23, 4  ;;  %v1496_v23 = vrot.slane %v1494_v13, 4 }
  0x48   : > { %v1378_v58 = vrot.slane %v1377_v44, 4  ;;  %v1280_v44 = vld [vmem:[%s13615_s5 + $0x4c] sm:$0xf] }
  0x4c   : > { %11460 = vmatmul.mubr.msk.bf16.gmra.mrb[24].mxu0 %vm557_vm1, %v13409_v35  ;;  %11477 = vmatmul.mubr.msk.bf16.gmra.mrb[24].mxu1 %vm557_vm1, %v13409_v35  ;;  %v1270_v35 = vld [vmem:[%s13615_s5 + $0x24] sm:$0xf] }
  0x4d   : > { %721 = vmatprep.mubr.bf16.mxu0 %v13523_v6  ;;  %914 = vmatprep.mubr.bf16.mxu1 %v13523_v6 }
  0x54   : > { %11461 = vmatmul.mubr.msk.bf16.gmra.mrb[28].mxu0 %vm557_vm1, %v13410_v36  ;;  %11478 = vmatmul.mubr.msk.bf16.gmra.mrb[28].mxu1 %vm557_vm1, %v13410_v36  ;;  %v3050_v36 = vsel %vm606_vm0, %v13642_v27, 0  ;;  %v1388_v27 = vshll.u32 %v1270_v35, 16 }
  0x55   : > { %731 = vmatprep.mubr.bf16.mxu0 %v13523_v6  ;;  %924 = vmatprep.mubr.bf16.mxu1 %v13523_v6 }
  0x56   : > { %v1390_v56 = vrot.slane %v1388_v27, 5 }
  0x5c   : > { %11462 = vmatmul.mubr.msk.bf16.gmra.mrb[32].mxu0 %vm557_vm1, %v13411_v37  ;;  %11479 = vmatmul.mubr.msk.bf16.gmra.mrb[32].mxu1 %vm557_vm1, %v13411_v37  ;;  %v3056_v37 = vsel %vm606_vm0, %v13647_v30, 0  ;;  %v11637_v30 = vld [vmem:[%s15327_s1 + $0x18] sm:$0xff] }
  0x5d   : > { %741 = vmatprep.mubr.bf16.mxu0 %v13523_v6  ;;  %934 = vmatprep.mubr.bf16.mxu1 %v13523_v6  ;;  %v13755_v47 = vrot.slane %v11637_v30, %v13608_v10  ;;  %v3947_v48 = vcombine.high %v11637_v30, %v11637_v30  ;;  %v1421_v30 = vsel %vm13724_vm4, %v1416_v34, %v1420_v15 }
  0x5f   : > { %v3962_v51 = vcombine.high %v13755_v47, %v13755_v47  ;;  %v13763_v52 = vrot.slane %v3947_v48, %v13608_v10 }
  0x61   : > { %v3963_v61 = vcombine.high %v13763_v52, %v13763_v52 }
  0x64   : > { %11463 = vmatmul.mubr.msk.bf16.gmra.mrb[36].mxu0 %vm557_vm1, %v13412_v38  ;;  %11480 = vmatmul.mubr.msk.bf16.gmra.mrb[36].mxu1 %vm557_vm1, %v13412_v38  ;;  %v1271_v38 = vld [vmem:[%s13615_s5 + $0x28] sm:$0xf] }
  0x65   : > { %751 = vmatprep.mubr.bf16.mxu0 %v13523_v6  ;;  %944 = vmatprep.mubr.bf16.mxu1 %v13523_v6  ;;  %v1394_v45 = vshll.u32 %v1271_v38, 16  ;;  %v1398_v46 = vshrl.u32 %v1271_v38, 16  ;;  %v1278_v38 = vld [vmem:[%s13615_s5 + $0x44] sm:$0x1] }
  0x66   : > { %v1452_v27 = vshll.u32 %v1278_v38, 16 }
  0x67   : > { %v1396_v59 = vrot.slane %v1394_v45, 5  ;;  %v1400_v60 = vrot.slane %v1398_v46, 4 }
  0x68   : > { %v1454_v57 = vrot.slane %v1452_v27, 5 }
  0x6c   : > { %11464 = vmatmul.mubr.msk.bf16.gmra.mrb[40].mxu0 %vm557_vm1, %v13413_v39  ;;  %11481 = vmatmul.mubr.msk.bf16.gmra.mrb[40].mxu1 %vm557_vm1, %v13413_v39  ;;  %v1349_v39 = vsel %vm13724_vm4, %v1344_v25, %v1348_v11  ;;  %v1404_v11 = vshll.u32 %v1272_v62, 16  ;;  %v1433_v25 = vshrl.u32 %v1276_v17, 16  ;;  %v1281_v62 = vld [vmem:[%s13615_s5 + $0x50] sm:$0x1] }
  0x6d   : > { %761 = vmatprep.mubr.bf16.mxu0 %v13523_v6  ;;  %954 = vmatprep.mubr.bf16.mxu1 %v13523_v6 }
  0x6e   : > { %v1406_v22 = vrot.slane %v1404_v11, 5  ;;  %v1484_v11 = vshll.u32 %v1282_v63, 16 }
  0x74   : > { %11465 = vmatmul.mubr.msk.bf16.gmra.mrb[44].mxu0 %vm557_vm1, %v13414_v40  ;;  %11482 = vmatmul.mubr.msk.bf16.gmra.mrb[44].mxu1 %vm557_vm1, %v13414_v40  ;;  %v1380_v40 = vshll.u32 %v1269_v28, 16  ;;  %v1436_v28 = vshll.u32 %v1276_v17, 16 }
  0x75   : > { %771 = vmatprep.mubr.bf16.mxu0 %v13523_v6  ;;  %964 = vmatprep.mubr.bf16.mxu1 %v13523_v6 }
  0x76   : > { %v1382_v49 = vrot.slane %v1380_v40, 5  ;;  %v1444_v40 = vrot.slane %v1442_v29, 5 }
  0x78   : > { %v1383_v7 = vsel %vm13724_vm4, %v1378_v58, %v1382_v49 }
  0x7c   : > { %11466 = vmatmul.mubr.msk.bf16.gmra.mrb[48].mxu0 %vm557_vm1, %v13415_v41  ;;  %11483 = vmatmul.mubr.msk.bf16.gmra.mrb[48].mxu1 %vm557_vm1, %v13415_v41  ;;  %v1385_v41 = vshrl.u32 %v1270_v35, 16 }
  0x7d   : > { %781 = vmatprep.mubr.bf16.mxu0 %v13523_v6  ;;  %974 = vmatprep.mubr.bf16.mxu1 %v13523_v6 }
  0x7e   : > { %v1387_v55 = vrot.slane %v1385_v41, 4 }
  0x80   : > { %v1391_v3 = vor.u32 %v1390_v56, %v1387_v55 }
  0x82   : > { %v1392_v20 = vrot.slane %v1391_v3, 4 }
  0x84   : > { %11467 = vmatmul.mubr.msk.bf16.gmra.mrb[52].mxu0 %vm557_vm1, %v13416_v42  ;;  %11484 = vmatmul.mubr.msk.bf16.gmra.mrb[52].mxu1 %vm557_vm1, %v13416_v42  ;;  %v1359_v42 = vsel %vm13724_vm4, %v1354_v31, %v1358_v26  ;;  %v1425_v26 = vor.u32 %v1424_v16, %v1420_v15  ;;  %v1446_v31 = vshrl.u32 %v1277_v19, 16  ;;  %v1397_v32 = vsel %vm13724_vm4, %v1392_v20, %v1396_v59  ;;  %v1286_v15 = vld [vmem:[%s13615_s5 + $0x64] sm:$0xf] }
  0x85   : > { %791 = vmatprep.mubr.bf16.mxu0 %v13523_v6  ;;  %984 = vmatprep.mubr.bf16.mxu1 %v13523_v6  ;;  %v11489_v53 = vcombine.low %v1349_v39, %v1359_v42  ;;  %v1438_v39 = vrot.slane %v1436_v28, 5  ;;  %v1514_v28 = vshll.u32 %v1286_v15, 16  ;;  %v1518_v29 = vshrl.u32 %v1286_v15, 16 }
  0x86   : > { %v1448_v41 = vrot.slane %v1446_v31, 4 }
  0x87   : > { %v1516_v38 = vrot.slane %v1514_v28, 5 }
  0x88   : > { %v1449_v48 = vor.u32 %v1448_v41, %v1444_v40 }
  0x8a   : > { %v1450_v56 = vrot.slane %v1449_v48, 4 }
  0x8c   : > { %11468 = vmatmul.mubr.msk.bf16.gmra.mrb[56].mxu0 %vm557_vm1, %v13417_v54  ;;  %11485 = vmatmul.mubr.msk.bf16.gmra.mrb[56].mxu1 %vm557_vm1, %v13417_v54  ;;  %v1368_v54 = vrot.slane %v1367_v43, 4  ;;  %v1279_v43 = vld [vmem:[%s13615_s5 + $0x48] sm:$0xf]  ;;  %v1455_v2 = vsel %vm13724_vm4, %v1450_v56, %v1454_v57 }
  0x8d   : > { %801 = vmatprep.mubr.bf16.mxu0 %v13523_v6  ;;  %994 = vmatprep.mubr.bf16.mxu1 %v13523_v6  ;;  %v1457_v49 = vshrl.u32 %v1279_v43, 16  ;;  %v1460_v50 = vshll.u32 %v1279_v43, 16  ;;  %v1289_v43 = vld [vmem:[%s13615_s5 + $0x70] sm:$0xf] }
  0x8e   : > { %v1373_v4 = vsel %vm13724_vm4, %v1368_v54, %v1372_v33 }
  0x8f   : > { %v11490_v18 = vcombine.low %v1373_v4, %v1383_v7  ;;  %v1459_v58 = vrot.slane %v1457_v49, 4  ;;  %v1476_v7 = vshll.u32 %v1281_v62, 16 }
  0x91   : > { %v1478_v19 = vrot.slane %v1476_v7, 5 }
  0x94   : > { %11469 = vmatmul.mubr.msk.bf16.gmra.mrb[60].mxu0 %vm557_vm1, %v13418_v8  ;;  %11486 = vmatmul.mubr.msk.bf16.gmra.mrb[60].mxu1 %vm557_vm1, %v13418_v8  ;;  %v1401_v8 = vor.u32 %v1400_v60, %v1396_v59  ;;  %v1462_v59 = vrot.slane %v1460_v50, 5 }
  0x95   : > { %1984 = vmatprep.mubr.bf16.mxu0 %v13523_v6  ;;  %2177 = vmatprep.mubr.bf16.mxu1 %v13523_v6 }
  0x96   : > { %v1402_v21 = vrot.slane %v1401_v8, 4  ;;  %v1463_v3 = vor.u32 %v1462_v59, %v1459_v58  ;;  %v1481_v8 = vshrl.u32 %v1282_v63, 16 }
  0x98   : > { %v1407_v33 = vsel %vm13724_vm4, %v1402_v21, %v1406_v22  ;;  %v1464_v17 = vrot.slane %v1463_v3, 4  ;;  %v1483_v20 = vrot.slane %v1481_v8, 4  ;;  %v1486_v21 = vrot.slane %v1484_v11, 5 }
  0x99   : > { %v11491_v42 = vcombine.low %v1397_v32, %v1407_v33  ;;  %v1492_v22 = vrot.slane %v1490_v12, 5  ;;  %v1548_v11 = vshll.u32 %v1290_v0, 16  ;;  %v1300_v0 = vld [vmem:[%s13615_s5 + $0x9c] sm:$0xf] }
  0x9a   : > { %v1487_v33 = vor.u32 %v1486_v21, %v1483_v20 }
  0x9b   : > { %v1497_v34 = vor.u32 %v1496_v23, %v1492_v22 }
  0x9c   : > { %11505 = vmatmul.mubr.msk.bf16.vlgmr.msra.gmra.mrb[0].mxu0 %vm557_vm1, %v11488_v24  ;;  %11522 = vmatmul.mubr.msk.bf16.vlgmr.msra.gmra.mrb[0].mxu1 %vm557_vm1, %v11488_v24  ;;  %v1428_v24 = vshll.u32 %v1275_v14, 16  ;;  %v1285_v14 = vld [vmem:[%s13615_s5 + $0x60] sm:$0xf] }
  0x9d   : > { %3062 = vmatpush1.bf16.msra.mxu0 %v3050_v36  ;;  %3255 = vmatpush1.bf16.msra.mxu1 %v3056_v37  ;;  %v1435_v36 = vrot.slane %v1433_v25, 4  ;;  %v1426_v37 = vrot.slane %v1425_v26, 4  ;;  %v1505_v25 = vshrl.u32 %v1285_v14, 16  ;;  %v1508_v26 = vshll.u32 %v1285_v14, 16 }
  0x9e   : > { %1994 = vmatprep.mubr.bf16.mxu0 %v13523_v6  ;;  %2187 = vmatprep.mubr.bf16.mxu1 %v13523_v6  ;;  %v1430_v35 = vrot.slane %v1428_v24, 5  ;;  %v1284_v24 = vld [vmem:[%s13615_s5 + $0x5c] sm:$0x1]  ;;  %v1498_v27 = vrot.slane %v1497_v34, 4 }
  0x9f   : > { %11654 = vmatprep.subr.msk.bf16.mxu0 %vm606_vm0, %v3962_v51  ;;  %11671 = vmatprep.subr.msk.bf16.mxu1 %vm606_vm0, %v3963_v61  ;;  %v1439_v46 = vor.u32 %v1438_v39, %v1435_v36  ;;  %v1466_v51 = vshll.u32 %v1280_v44, 16  ;;  %v1507_v36 = vrot.slane %v1505_v25, 4  ;;  %v1520_v39 = vrot.slane %v1518_v29, 4  ;;  %v1294_v25 = vld [vmem:[%s13615_s5 + $0x84] sm:$0xf] }
  0xa0   : > { %v1431_v45 = vsel %vm13724_vm4, %v1426_v37, %v1430_v35  ;;  %v1500_v35 = vshll.u32 %v1284_v24, 16  ;;  %v1510_v37 = vrot.slane %v1508_v26, 5  ;;  %v1293_v24 = vld [vmem:[%s13615_s5 + $0x80] sm:$0x1]  ;;  %v1295_v26 = vld [vmem:[%s13615_s5 + $0x88] sm:$0xf] }
  0xa1   : > { %v11492_v54 = vcombine.low %v1421_v30, %v1431_v45  ;;  %v1440_v55 = vrot.slane %v1439_v46, 4  ;;  %v1468_v60 = vrot.slane %v1466_v51, 5  ;;  %v1521_v46 = vor.u32 %v1520_v39, %v1516_v38  ;;  %v1298_v39 = vld [vmem:[%s13615_s5 + $0x94] sm:$0xf] }
  0xa2   : > { %v1502_v30 = vrot.slane %v1500_v35, 5  ;;  %v1511_v45 = vor.u32 %v1510_v37, %v1507_v36  ;;  %v1538_v51 = vshll.u32 %v1289_v43, 16  ;;  %v1577_v34 = vshrl.u32 %v1294_v25, 16 }
  0xa3   : > { %v1445_v1 = vsel %vm13724_vm4, %v1440_v55, %v1444_v40  ;;  %v1469_v31 = vsel %vm13724_vm4, %v1464_v17, %v1468_v60  ;;  %v1287_v40 = vld [vmem:[%s13615_s5 + $0x68] sm:$0x1]  ;;  %v1522_v57 = vrot.slane %v1521_v46, 4  ;;  %v1580_v35 = vshll.u32 %v1294_v25, 16  ;;  %v1296_v46 = vld [vmem:[%s13615_s5 + $0x8c] sm:$0x1] }
  0xa4   : > { %11506 = vmatmul.mubr.msk.bf16.gmra.mrb[4].mxu0 %vm557_vm1, %v11489_v53  ;;  %11523 = vmatmul.mubr.msk.bf16.gmra.mrb[4].mxu1 %vm557_vm1, %v11489_v53  ;;  %v1470_v53 = vshrl.u32 %v1280_v44, 16  ;;  %v11493_v16 = vcombine.low %v1445_v1, %v1455_v2  ;;  %v1488_v44 = vrot.slane %v1487_v33, 4  ;;  %v1524_v48 = vshll.u32 %v1287_v40, 16  ;;  %v1291_v1 = vld [vmem:[%s13615_s5 + $0x78] sm:$0xf] }
  0xa5   : > { %2004 = vmatprep.mubr.bf16.mxu0 %v13523_v6  ;;  %2197 = vmatprep.mubr.bf16.mxu1 %v13523_v6  ;;  %v1503_v55 = vsel %vm13724_vm4, %v1498_v27, %v1502_v30  ;;  %v1512_v56 = vrot.slane %v1511_v45, 4  ;;  %v1292_v2 = vld [vmem:[%s13615_s5 + $0x7c] sm:$0xf]  ;;  %v1553_v12 = vshrl.u32 %v1291_v1, 16  ;;  %v1556_v13 = vshll.u32 %v1291_v1, 16 }
  0xa6   : > { %v1472_v61 = vrot.slane %v1470_v53, 4  ;;  %v1542_v53 = vshrl.u32 %v1289_v43, 16  ;;  %v1526_v58 = vrot.slane %v1524_v48, 5  ;;  %v1562_v14 = vshll.u32 %v1292_v2, 16  ;;  %v1301_v1 = vld [vmem:[%s13615_s5 + $0xa0] sm:$0xf] }
  0xa7   : > { %v1517_v3 = vsel %vm13724_vm4, %v1512_v56, %v1516_v38  ;;  %v1566_v15 = vshrl.u32 %v1292_v2, 16  ;;  %v1555_v20 = vrot.slane %v1553_v12, 4  ;;  %v1558_v21 = vrot.slane %v1556_v13, 5  ;;  %v1297_v38 = vld [vmem:[%s13615_s5 + $0x90] sm:$0xf] }
  0xa8   : > { %v1473_v4 = vor.u32 %v1472_v61, %v1468_v60  ;;  %v1540_v61 = vrot.slane %v1538_v51, 5  ;;  %v1544_v62 = vrot.slane %v1542_v53, 4  ;;  %v1572_v33 = vshll.u32 %v1293_v24, 16 }
  0xa9   : > { %v1568_v23 = vrot.slane %v1566_v15, 4  ;;  %v1586_v36 = vshll.u32 %v1295_v26, 16  ;;  %v1590_v37 = vshrl.u32 %v1295_v26, 16  ;;  %v1582_v27 = vrot.slane %v1580_v35, 5  ;;  %v1302_v26 = vld [vmem:[%s13615_s5 + $0xa4] sm:$0x1] }
  0xaa   : > { %v1545_v8 = vor.u32 %v1544_v62, %v1540_v61  ;;  %v1574_v43 = vrot.slane %v1572_v33, 5  ;;  %v1601_v48 = vshrl.u32 %v1297_v38, 16  ;;  %v1614_v51 = vshrl.u32 %v1298_v39, 16  ;;  %v1299_v62 = vld [vmem:[%s13615_s5 + $0x98] sm:$0x1] }
  0xab   : > { %v1588_v30 = vrot.slane %v1586_v36, 5  ;;  %v1592_v45 = vrot.slane %v1590_v37, 4  ;;  %v1625_v12 = vshrl.u32 %v1300_v0, 16  ;;  %v1628_v13 = vshll.u32 %v1300_v0, 16 }
  0xac   : > { %11507 = vmatmul.mubr.msk.bf16.gmra.mrb[8].mxu0 %vm557_vm1, %v11490_v18  ;;  %11524 = vmatmul.mubr.msk.bf16.gmra.mrb[8].mxu1 %vm557_vm1, %v11490_v18  ;;  %v1474_v18 = vrot.slane %v1473_v4, 4  ;;  %v1527_v4 = vsel %vm13724_vm4, %v1522_v57, %v1526_v58  ;;  %v1596_v57 = vshll.u32 %v1296_v46, 16  ;;  %v1603_v58 = vrot.slane %v1601_v48, 4  ;;  %v1305_v46 = vld [vmem:[%s13615_s5 + $0xb0] sm:$0x1] }
  0xad   : > { %2014 = vmatprep.mubr.bf16.mxu0 %v13523_v6  ;;  %2207 = vmatprep.mubr.bf16.mxu1 %v13523_v6  ;;  %v1593_v56 = vor.u32 %v1592_v45, %v1588_v30  ;;  %v1638_v15 = vshrl.u32 %v1301_v1, 16  ;;  %v1644_v35 = vshll.u32 %v1302_v26, 16  ;;  %v1306_v48 = vld [vmem:[%s13615_s5 + $0xb4] sm:$0xf] }
  0xae   : > { %v1479_v32 = vsel %vm13724_vm4, %v1474_v18, %v1478_v19  ;;  %v1546_v18 = vrot.slane %v1545_v8, 4  ;;  %v1550_v19 = vrot.slane %v1548_v11, 5  ;;  %v1620_v11 = vshll.u32 %v1299_v62, 16 }
  0xaf   : > { %v11494_v41 = vcombine.low %v1469_v31, %v1479_v32  ;;  %v1559_v31 = vor.u32 %v1558_v21, %v1555_v20  ;;  %v1627_v21 = vrot.slane %v1625_v12, 4  ;;  %v1640_v24 = vrot.slane %v1638_v15, 4 }
  0xb0   : > { %v1551_v29 = vsel %vm13724_vm4, %v1546_v18, %v1550_v19  ;;  %v1622_v20 = vrot.slane %v1620_v11, 5 }
  0xb4   : > { %11508 = vmatmul.mubr.msk.bf16.gmra.mrb[12].mxu0 %vm557_vm1, %v11491_v42  ;;  %11525 = vmatmul.mubr.msk.bf16.gmra.mrb[12].mxu1 %vm557_vm1, %v11491_v42  ;;  %v1288_v42 = vld [vmem:[%s13615_s5 + $0x6c] sm:$0xf] }
  0xb5   : > { %2024 = vmatprep.mubr.bf16.mxu0 %v13523_v6  ;;  %2217 = vmatprep.mubr.bf16.mxu1 %v13523_v6  ;;  %v1529_v49 = vshrl.u32 %v1288_v42, 16  ;;  %v1532_v50 = vshll.u32 %v1288_v42, 16 }
  0xb7   : > { %v1531_v59 = vrot.slane %v1529_v49, 4  ;;  %v1534_v60 = vrot.slane %v1532_v50, 5  ;;  %v1604_v49 = vshll.u32 %v1297_v38, 16  ;;  %v1610_v50 = vshll.u32 %v1298_v39, 16 }
  0xb9   : > { %v1535_v7 = vor.u32 %v1534_v60, %v1531_v59  ;;  %v1606_v59 = vrot.slane %v1604_v49, 5  ;;  %v1612_v60 = vrot.slane %v1610_v50, 5  ;;  %v1307_v49 = vld [vmem:[%s13615_s5 + $0xb8] sm:$0xf] }
  0xbb   : > { %v1536_v17 = vrot.slane %v1535_v7, 4  ;;  %v1607_v7 = vor.u32 %v1606_v59, %v1603_v58  ;;  %v1682_v58 = vshll.u32 %v1307_v49, 16  ;;  %v1686_v59 = vshrl.u32 %v1307_v49, 16 }
  0xbc   : > { %11509 = vmatmul.mubr.msk.bf16.gmra.mrb[16].mxu0 %vm557_vm1, %v11492_v54  ;;  %11526 = vmatmul.mubr.msk.bf16.gmra.mrb[16].mxu1 %vm557_vm1, %v11492_v54  ;;  %v1493_v54 = vsel %vm13724_vm4, %v1488_v44, %v1492_v22  ;;  %v1564_v22 = vrot.slane %v1562_v14, 5  ;;  %v1579_v44 = vrot.slane %v1577_v34, 4  ;;  %v1634_v14 = vshll.u32 %v1301_v1, 16 }
  0xbd   : > { %2034 = vmatprep.mubr.bf16.mxu0 %v13523_v6  ;;  %2227 = vmatprep.mubr.bf16.mxu1 %v13523_v6  ;;  %v11495_v63 = vcombine.low %v1493_v54, %v1503_v55  ;;  %v1541_v28 = vsel %vm13724_vm4, %v1536_v17, %v1540_v61  ;;  %v1616_v61 = vrot.slane %v1614_v51, 4  ;;  %v1608_v18 = vrot.slane %v1607_v7, 4 }
  0xbe   : > { %v1569_v32 = vor.u32 %v1568_v23, %v1564_v22  ;;  %v11497_v40 = vcombine.low %v1541_v28, %v1551_v29  ;;  %v1583_v55 = vor.u32 %v1582_v27, %v1579_v44  ;;  %v1636_v23 = vrot.slane %v1634_v14, 5  ;;  %v1303_v28 = vld [vmem:[%s13615_s5 + $0xa8] sm:$0xf]  ;;  %v1304_v29 = vld [vmem:[%s13615_s5 + $0xac] sm:$0xf] }
  0xbf   : > { %v1617_v8 = vor.u32 %v1616_v61, %v1612_v60  ;;  %v1649_v36 = vshrl.u32 %v1303_v28, 16  ;;  %v1652_v37 = vshll.u32 %v1303_v28, 16  ;;  %v1658_v38 = vshll.u32 %v1304_v29, 16 }
  0xc0   : > { %v1570_v42 = vrot.slane %v1569_v32, 4  ;;  %v1584_v2 = vrot.slane %v1583_v55, 4  ;;  %v1641_v34 = vor.u32 %v1640_v24, %v1636_v23  ;;  %v1662_v39 = vshrl.u32 %v1304_v29, 16 }
  0xc1   : > { %v1618_v19 = vrot.slane %v1617_v8, 4  ;;  %v1651_v44 = vrot.slane %v1649_v36, 4  ;;  %v1654_v27 = vrot.slane %v1652_v37, 5  ;;  %v1668_v55 = vshll.u32 %v1305_v46, 16  ;;  %v2599_v36 = vld [vmem:[%s13615_s5 + $0x14] sm:$0x1] }
  0xc2   : > { %v1575_v54 = vsel %vm13724_vm4, %v1570_v42, %v1574_v43  ;;  %v1642_v42 = vrot.slane %v1641_v34, 4  ;;  %v1646_v43 = vrot.slane %v1644_v35, 5  ;;  %v1664_v45 = vrot.slane %v1662_v39, 4  ;;  %v2597_v34 = vld [vmem:[%s13615_s5 + $0xc] sm:$0xe] }
  0xc3   : > { %v1623_v32 = vsel %vm13724_vm4, %v1618_v19, %v1622_v20  ;;  %v2600_v46 = vld [vmem:[%s13615_s5 + $0x18] sm:$0xe] }
  0xc4   : > { %11510 = vmatmul.mubr.msk.bf16.gmra.mrb[20].mxu0 %vm557_vm1, %v11493_v16  ;;  %11527 = vmatmul.mubr.msk.bf16.gmra.mrb[20].mxu1 %vm557_vm1, %v11493_v16  ;;  %v11496_v16 = vcombine.low %v1517_v3, %v1527_v4  ;;  %v1594_v3 = vrot.slane %v1593_v56, 4  ;;  %v1598_v4 = vrot.slane %v1596_v57, 5  ;;  %v1647_v51 = vsel %vm13724_vm4, %v1642_v42, %v1646_v43  ;;  %v2601_v43 = vld [vmem:[%s13615_s5 + $0x1c] sm:$0xf] }
  0xc5   : > { %2044 = vmatprep.mubr.bf16.mxu0 %v13523_v6  ;;  %2237 = vmatprep.mubr.bf16.mxu1 %v13523_v6  ;;  %v1673_v56 = vshrl.u32 %v1306_v48, 16  ;;  %v1676_v57 = vshll.u32 %v1306_v48, 16  ;;  %v4019_v42 = vsel %vm606_vm0, %v13763_v52, 0  ;;  %v2602_v48 = vld [vmem:[%s13615_s5 + $0x20] sm:$0x1] }
  0xc6   : > { %v1599_v17 = vsel %vm13724_vm4, %v1594_v3, %v1598_v4  ;;  %v1688_v3 = vrot.slane %v1686_v59, 4  ;;  %v1308_v4 = vld [vmem:[%s13615_s5 + $0xbc] sm:$0x1] }
  0xc7   : > { %v1675_v0 = vrot.slane %v1673_v56, 4  ;;  %v1678_v1 = vrot.slane %v1676_v57, 5  ;;  %v2604_v57 = vld [vmem:[%s13615_s5 + $0x28] sm:$0xf] }
  0xc9   : > { %v1679_v11 = vor.u32 %v1678_v1, %v1675_v0 }
  0xcb   : > { %v1680_v15 = vrot.slane %v1679_v11, 4  ;;  %v2606_v11 = vld [vmem:[%s13615_s5 + $0x30] sm:$0xe] }
  0xcc   : > { %11511 = vmatmul.mubr.msk.bf16.gmra.mrb[24].mxu0 %vm557_vm1, %v11494_v41  ;;  %11528 = vmatmul.mubr.msk.bf16.gmra.mrb[24].mxu1 %vm557_vm1, %v11494_v41  ;;  %v1560_v41 = vrot.slane %v1559_v31, 4  ;;  %v1613_v31 = vsel %vm13724_vm4, %v1608_v18, %v1612_v60  ;;  %v2595_v18 = vld [vmem:[%s13615_s5 + $0x4] sm:$0xf] }
  0xcd   : > { %2054 = vmatprep.mubr.bf16.mxu0 %v13523_v6  ;;  %2247 = vmatprep.mubr.bf16.mxu1 %v13523_v6 }
  0xce   : > { %v1565_v53 = vsel %vm13724_vm4, %v1560_v41, %v1564_v22  ;;  %v1630_v22 = vrot.slane %v1628_v13, 5  ;;  %v1692_v13 = vshll.u32 %v1308_v4, 16 }
  0xd0   : > { %v1631_v33 = vor.u32 %v1630_v22, %v1627_v21  ;;  %v2695_v21 = vrot.slane %v2595_v18, 5  ;;  %v2594_v22 = vld [vmem:[%s13615_s5] sm:$0xe] }
  0xd2   : > { %v1632_v41 = vrot.slane %v1631_v33, 4  ;;  %v2697_v26 = vrot.slane %v2695_v21, 4 }
  0xd4   : > { %11512 = vmatmul.mubr.msk.bf16.gmra.mrb[28].mxu0 %vm557_vm1, %v11495_v63  ;;  %11529 = vmatmul.mubr.msk.bf16.gmra.mrb[28].mxu1 %vm557_vm1, %v11495_v63  ;;  %v11498_v63 = vcombine.low %v1565_v53, %v1575_v54  ;;  %v1637_v50 = vsel %vm13724_vm4, %v1632_v41, %v1636_v23  ;;  %v1655_v53 = vor.u32 %v1654_v27, %v1651_v44  ;;  %v2596_v23 = vld [vmem:[%s13615_s5 + $0x8] sm:$0x1]  ;;  %v4013_v41 = vsel %vm606_vm0, %v13755_v47, 0  ;;  %v11736_v27 = vld [vmem:[%s15327_s1 + $0x20] sm:$0xff] }
  0xd5   : > { %2064 = vmatprep.mubr.bf16.mxu0 %v13523_v6  ;;  %2257 = vmatprep.mubr.bf16.mxu1 %v13523_v6  ;;  %v11501_v60 = vcombine.low %v1637_v50, %v1647_v51  ;;  %v2698_v28 = vrot.slane %v2596_v23, 5  ;;  %v13950_v52 = vrot.slane %v11736_v27, %v13608_v10 }
  0xd6   : > { %v1656_v61 = vrot.slane %v1655_v53, 4  ;;  %v11540_v53 = vrot.slane %v2600_v46, 9 }
  0xd7   : > { %v2699_v33 = vsel %vm13920_vm7, %v2697_v26, %v2698_v28  ;;  %v5292_v49 = vcombine.high %v13950_v52, %v13950_v52  ;;  %v2613_v28 = vld [vmem:[%s13615_s5 + $0x4c] sm:$0xf] }
  0xdc   : > { %11513 = vmatmul.mubr.msk.bf16.gmra.mrb[32].mxu0 %vm557_vm1, %v11496_v16  ;;  %11530 = vmatmul.mubr.msk.bf16.gmra.mrb[32].mxu1 %vm557_vm1, %v11496_v16  ;;  %v1589_v16 = vsel %vm13724_vm4, %v1584_v2, %v1588_v30  ;;  %v1660_v30 = vrot.slane %v1658_v38, 5  ;;  %v1684_v2 = vrot.slane %v1682_v58, 5  ;;  %v11539_v38 = vrot.slane %v2597_v34, 9  ;;  %v2612_v34 = vld [vmem:[%s13615_s5 + $0x48] sm:$0xe] }
  0xdd   : > { %2074 = vmatprep.mubr.bf16.mxu0 %v13523_v6  ;;  %2267 = vmatprep.mubr.bf16.mxu1 %v13523_v6  ;;  %v11499_v25 = vcombine.low %v1589_v16, %v1599_v17  ;;  %v1694_v17 = vrot.slane %v1692_v13, 5 }
  0xde   : > { %v1665_v54 = vor.u32 %v1664_v45, %v1660_v30  ;;  %v1661_v7 = vsel %vm13724_vm4, %v1656_v61, %v1660_v30  ;;  %v1689_v12 = vor.u32 %v1688_v3, %v1684_v2  ;;  %v1685_v19 = vsel %vm13724_vm4, %v1680_v15, %v1684_v2  ;;  %v2603_v61 = vld [vmem:[%s13615_s5 + $0x24] sm:$0xe]  ;;  %v2607_v3 = vld [vmem:[%s13615_s5 + $0x34] sm:$0xf] }
  0xdf   : > { %v2709_v30 = vrot.slane %v2601_v43, 5  ;;  %v5277_v45 = vcombine.high %v11736_v27, %v11736_v27  ;;  %v11541_v0 = vrot.slane %v2603_v61, 9  ;;  %v2617_v27 = vld [vmem:[%s13615_s5 + $0x5c] sm:$0x1] }
  0xe0   : > { %v1666_v62 = vrot.slane %v1665_v54, 4  ;;  %v1690_v16 = vrot.slane %v1689_v12, 4  ;;  %v2608_v12 = vld [vmem:[%s13615_s5 + $0x38] sm:$0x1]  ;;  %v2747_v46 = vrot.slane %v2617_v27, 5 }
  0xe1   : > { %v13959_v50 = vrot.slane %v5277_v45, %v13608_v10  ;;  %v2711_v54 = vrot.slane %v2709_v30, 4  ;;  %v2710_v58 = vsel %vm13920_vm7, %v11540_v53, %v2709_v30 }
  0xe2   : > { %v1695_v20 = vsel %vm13724_vm4, %v1690_v16, %v1694_v17  ;;  %v2726_v16 = vrot.slane %v2608_v12, 5  ;;  %v2610_v17 = vld [vmem:[%s13615_s5 + $0x40] sm:$0xf] }
  0xe3   : > { %v11503_v24 = vcombine.low %v1685_v19, %v1695_v20  ;;  %v5293_v56 = vcombine.high %v13959_v50, %v13959_v50  ;;  %v2730_v20 = vrot.slane %v2610_v17, 5 }
  0xe4   : > { %11514 = vmatmul.mubr.msk.bf16.gmra.mrb[36].mxu0 %vm557_vm1, %v11497_v40  ;;  %11531 = vmatmul.mubr.msk.bf16.gmra.mrb[36].mxu1 %vm557_vm1, %v11497_v40  ;;  %v11500_v40 = vcombine.low %v1613_v31, %v1623_v32  ;;  %v2598_v31 = vld [vmem:[%s13615_s5 + $0x10] sm:$0xf] }
  0xe5   : > { %2084 = vmatprep.mubr.bf16.mxu0 %v13523_v6  ;;  %2277 = vmatprep.mubr.bf16.mxu1 %v13523_v6  ;;  %v2702_v35 = vrot.slane %v2598_v31, 5 }
  0xe7   : > { %v2704_v39 = vrot.slane %v2702_v35, 4  ;;  %v2703_v44 = vsel %vm13920_vm7, %v11539_v38, %v2702_v35  ;;  %v2614_v35 = vld [vmem:[%s13615_s5 + $0x50] sm:$0x1] }
  0xec   : > { %11515 = vmatmul.mubr.msk.bf16.gmra.mrb[40].mxu0 %vm557_vm1, %v11498_v63  ;;  %11532 = vmatmul.mubr.msk.bf16.gmra.mrb[40].mxu1 %vm557_vm1, %v11498_v63  ;;  %v1670_v63 = vrot.slane %v1668_v55, 5  ;;  %v2712_v55 = vrot.slane %v2602_v48, 5  ;;  %v2619_v48 = vld [vmem:[%s13615_s5 + $0x64] sm:$0xf] }
  0xed   : > { %2094 = vmatprep.mubr.bf16.mxu0 %v13523_v6  ;;  %2287 = vmatprep.mubr.bf16.mxu1 %v13523_v6  ;;  %v2751_v53 = vrot.slane %v2619_v48, 5 }
  0xee   : > { %v1671_v8 = vsel %vm13724_vm4, %v1666_v62, %v1670_v63  ;;  %v2713_v59 = vsel %vm13920_vm7, %v2711_v54, %v2712_v55  ;;  %v2605_v62 = vld [vmem:[%s13615_s5 + $0x2c] sm:$0x1]  ;;  %v2618_v54 = vld [vmem:[%s13615_s5 + $0x60] sm:$0xe]  ;;  %v2620_v55 = vld [vmem:[%s13615_s5 + $0x68] sm:$0x1] }
  0xef   : > { %v11502_v14 = vcombine.low %v1661_v7, %v1671_v8  ;;  %v11557_v63 = vcombine.low %v2710_v58, %v2713_v59  ;;  %v2719_v2 = vrot.slane %v2605_v62, 5  ;;  %v2723_v8 = vrot.slane %v2607_v3, 5 }
  0xf0   : > { %v2753_v58 = vrot.slane %v2751_v53, 4  ;;  %v2754_v59 = vrot.slane %v2620_v55, 5 }
  0xf1   : > { %v2725_v15 = vrot.slane %v2723_v8, 4 }
  0xf2   : > { %v2755_v62 = vsel %vm13920_vm7, %v2753_v58, %v2754_v59  ;;  %v2638_v58 = vld [vmem:[%s13615_s5 + $0xb0] sm:$0x1] }
  0xf3   : > { %v2727_v19 = vsel %vm13920_vm7, %v2725_v15, %v2726_v16  ;;  %v2626_v15 = vld [vmem:[%s13615_s5 + $0x80] sm:$0x1] }
  0xf4   : > { %11516 = vmatmul.mubr.msk.bf16.gmra.mrb[44].mxu0 %vm557_vm1, %v11499_v25  ;;  %11533 = vmatmul.mubr.msk.bf16.gmra.mrb[44].mxu1 %vm557_vm1, %v11499_v25  ;;  %v11538_v25 = vrot.slane %v2594_v22, 9  ;;  %v2611_v22 = vld [vmem:[%s13615_s5 + $0x44] sm:$0x1] }
  0xf5   : > { %2104 = vmatprep.mubr.bf16.mxu0 %v13523_v6  ;;  %2297 = vmatprep.mubr.bf16.mxu1 %v13523_v6  ;;  %v2733_v26 = vrot.slane %v2611_v22, 5 }
  0xf6   : > { %v2696_v32 = vsel %vm13920_vm7, %v11538_v25, %v2695_v21  ;;  %v2609_v21 = vld [vmem:[%s13615_s5 + $0x3c] sm:$0xe]  ;;  %v2732_v25 = vrot.slane %v2730_v20, 4 }
  0xf7   : > { %v11555_v37 = vcombine.low %v2696_v32, %v2699_v33  ;;  %v2737_v33 = vrot.slane %v2613_v28, 5 }
  0xf8   : > { %v2734_v32 = vsel %vm13920_vm7, %v2732_v25, %v2733_v26  ;;  %v2629_v25 = vld [vmem:[%s13615_s5 + $0x8c] sm:$0x1] }
  0xf9   : > { %v2739_v38 = vrot.slane %v2737_v33, 4 }
  0xfc   : > { %11517 = vmatmul.mubr.msk.bf16.gmra.mrb[48].mxu0 %vm557_vm1, %v11500_v40  ;;  %11534 = vmatmul.mubr.msk.bf16.gmra.mrb[48].mxu1 %vm557_vm1, %v11500_v40  ;;  %v2705_v40 = vrot.slane %v2599_v36, 5 }
  0xfd   : > { %2114 = vmatprep.mubr.bf16.mxu0 %v13523_v6  ;;  %2307 = vmatprep.mubr.bf16.mxu1 %v13523_v6 }
  0xfe   : > { %v2706_v47 = vsel %vm13920_vm7, %v2704_v39, %v2705_v40  ;;  %v2740_v39 = vrot.slane %v2614_v35, 5  ;;  %v2616_v40 = vld [vmem:[%s13615_s5 + $0x58] sm:$0xf] }
  0xff   : > { %v11556_v51 = vcombine.low %v2703_v44, %v2706_v47  ;;  %v2744_v43 = vrot.slane %v2616_v40, 5  ;;  %v2615_v44 = vld [vmem:[%s13615_s5 + $0x54] sm:$0xe] }
 0x100   : > { %v11545_v30 = vrot.slane %v2615_v44, 9 }
 0x101   : > { %v2746_v45 = vrot.slane %v2744_v43, 4 }
 0x104   : > { %11518 = vmatmul.mubr.msk.bf16.gmra.mrb[52].mxu0 %vm557_vm1, %v11501_v60  ;;  %11535 = vmatmul.mubr.msk.bf16.gmra.mrb[52].mxu1 %vm557_vm1, %v11501_v60  ;;  %v2716_v60 = vrot.slane %v2604_v57, 5  ;;  %v11546_v57 = vrot.slane %v2618_v54, 9 }
 0x105   : > { %2124 = vmatprep.mubr.bf16.mxu0 %v13523_v6  ;;  %2317 = vmatprep.mubr.bf16.mxu1 %v13523_v6 }
 0x106   : > { %v2718_v1 = vrot.slane %v2716_v60, 4  ;;  %v2717_v4 = vsel %vm13920_vm7, %v11541_v0, %v2716_v60  ;;  %v2622_v60 = vld [vmem:[%s13615_s5 + $0x70] sm:$0xf]  ;;  %v2752_v61 = vsel %vm13920_vm7, %v11546_v57, %v2751_v53  ;;  %v2621_v0 = vld [vmem:[%s13615_s5 + $0x6c] sm:$0xe] }
 0x107   : > { %v11547_v3 = vrot.slane %v2621_v0, 9  ;;  %v2637_v53 = vld [vmem:[%s13615_s5 + $0xac] sm:$0xf]  ;;  %v2636_v57 = vld [vmem:[%s13615_s5 + $0xa8] sm:$0xe] }
 0x108   : > { %v2720_v7 = vsel %vm13920_vm7, %v2718_v1, %v2719_v2  ;;  %v2623_v1 = vld [vmem:[%s13615_s5 + $0x74] sm:$0x1]  ;;  %v11563_v2 = vcombine.low %v2752_v61, %v2755_v62  ;;  %v2796_v62 = vrot.slane %v2638_v58, 5 }
 0x109   : > { %v11558_v13 = vcombine.low %v2717_v4, %v2720_v7  ;;  %v2761_v7 = vrot.slane %v2623_v1, 5 }
 0x10c   : > { %11519 = vmatmul.mubr.msk.bf16.gmra.mrb[56].mxu0 %vm557_vm1, %v11502_v14  ;;  %11536 = vmatmul.mubr.msk.bf16.gmra.mrb[56].mxu1 %vm557_vm1, %v11502_v14  ;;  %v11542_v14 = vrot.slane %v2606_v11, 9 }
 0x10d   : > { %2134 = vmatprep.mubr.bf16.mxu0 %v13523_v6  ;;  %2327 = vmatprep.mubr.bf16.mxu1 %v13523_v6 }
 0x10e   : > { %v2724_v18 = vsel %vm13920_vm7, %v11542_v14, %v2723_v8  ;;  %v2625_v8 = vld [vmem:[%s13615_s5 + $0x7c] sm:$0xf]  ;;  %v2624_v14 = vld [vmem:[%s13615_s5 + $0x78] sm:$0xe] }
 0x10f   : > { %v11559_v23 = vcombine.low %v2724_v18, %v2727_v19  ;;  %v11548_v17 = vrot.slane %v2624_v14, 9  ;;  %v2768_v19 = vrot.slane %v2626_v15, 5 }
 0x114   : > { %11520 = vmatmul.mubr.msk.bf16.gmra.mrb[60].mxu0 %vm557_vm1, %v11503_v24  ;;  %11537 = vmatmul.mubr.msk.bf16.gmra.mrb[60].mxu1 %vm557_vm1, %v11503_v24  ;;  %v11543_v24 = vrot.slane %v2609_v21, 9 }
 0x115   : > { %3093 = vmatprep.mubr.bf16.mxu0 %v13523_v6  ;;  %3286 = vmatprep.mubr.bf16.mxu1 %v13523_v6 }
 0x116   : > { %v2731_v31 = vsel %vm13920_vm7, %v11543_v24, %v2730_v20  ;;  %v2628_v20 = vld [vmem:[%s13615_s5 + $0x88] sm:$0xf]  ;;  %v2627_v24 = vld [vmem:[%s13615_s5 + $0x84] sm:$0xe] }
 0x117   : > { %v11560_v36 = vcombine.low %v2731_v31, %v2734_v32  ;;  %v11549_v28 = vrot.slane %v2627_v24, 9  ;;  %v2775_v32 = vrot.slane %v2629_v25, 5  ;;  %v13424_v24 = vld [vmem:[%s13615_s5 + $0x24] sm:$0xff]   ;;  %v13425_v25 = vld [vmem:[%s13615_s5 + $0x30] sm:$0xff]  }
 0x11c   : > { %11572 = vmatmul.mubr.msk.bf16.vlgmr.msra.gmra.mrb[0].mxu0 %vm557_vm1, %v11555_v37  ;;  %11589 = vmatmul.mubr.msk.bf16.vlgmr.msra.gmra.mrb[0].mxu1 %vm557_vm1, %v11555_v37  ;;  %v11544_v37 = vrot.slane %v2612_v34, 9 }
 0x11d   : > { %4025 = vmatpush1.bf16.msra.mxu0 %v4013_v41  ;;  %4218 = vmatpush1.bf16.msra.mxu1 %v4019_v42  ;;  %v2741_v42 = vsel %vm13920_vm7, %v2739_v38, %v2740_v39  ;;  %v2632_v38 = vld [vmem:[%s13615_s5 + $0x98] sm:$0x1] }
 0x11e   : > { %3103 = vmatprep.mubr.bf16.mxu0 %v13523_v6  ;;  %3296 = vmatprep.mubr.bf16.mxu1 %v13523_v6  ;;  %v2738_v41 = vsel %vm13920_vm7, %v11544_v37, %v2737_v33  ;;  %v2631_v33 = vld [vmem:[%s13615_s5 + $0x94] sm:$0xf]  ;;  %v2630_v37 = vld [vmem:[%s13615_s5 + $0x90] sm:$0xe] }
 0x11f   : > { %11753 = vmatprep.subr.msk.bf16.mxu0 %vm606_vm0, %v5292_v49  ;;  %11770 = vmatprep.subr.msk.bf16.mxu1 %vm606_vm0, %v5293_v56  ;;  %v11561_v47 = vcombine.low %v2738_v41, %v2741_v42  ;;  %v2745_v49 = vsel %vm13920_vm7, %v11545_v30, %v2744_v43  ;;  %v11550_v40 = vrot.slane %v2630_v37, 9  ;;  %v2782_v42 = vrot.slane %v2632_v38, 5  ;;  %v2634_v43 = vld [vmem:[%s13615_s5 + $0xa0] sm:$0xf]  ;;  %v2633_v30 = vld [vmem:[%s13615_s5 + $0x9c] sm:$0xe] }
 0x120   : > { %v11551_v48 = vrot.slane %v2633_v30, 9  ;;  %v13434_v37 = vld [vmem:[%s13615_s5 + $0x9c] sm:$0xff]   ;;  %v11688_v38 = vld [vmem:[%s13615_s5 + $0xc] sm:$0xf] }
 0x124   : > { %11573 = vmatmul.mubr.msk.bf16.gmra.mrb[4].mxu0 %vm557_vm1, %v11556_v51  ;;  %11590 = vmatmul.mubr.msk.bf16.gmra.mrb[4].mxu1 %vm557_vm1, %v11556_v51  ;;  %v2748_v51 = vsel %vm13920_vm7, %v2746_v45, %v2747_v46  ;;  %v2635_v45 = vld [vmem:[%s13615_s5 + $0xa4] sm:$0x1] }
 0x125   : > { %3113 = vmatprep.mubr.bf16.mxu0 %v13523_v6  ;;  %3306 = vmatprep.mubr.bf16.mxu1 %v13523_v6  ;;  %v11562_v56 = vcombine.low %v2745_v49, %v2748_v51  ;;  %v2789_v51 = vrot.slane %v2635_v45, 5 }
 0x12c   : > { %11574 = vmatmul.mubr.msk.bf16.gmra.mrb[8].mxu0 %vm557_vm1, %v11557_v63  ;;  %11591 = vmatmul.mubr.msk.bf16.gmra.mrb[8].mxu1 %vm557_vm1, %v11557_v63  ;;  %v2758_v63 = vrot.slane %v2622_v60, 5  ;;  %v11552_v60 = vrot.slane %v2636_v57, 9 }
 0x12d   : > { %3123 = vmatprep.mubr.bf16.mxu0 %v13523_v6  ;;  %3316 = vmatprep.mubr.bf16.mxu1 %v13523_v6 }
 0x12e   : > { %v2760_v4 = vrot.slane %v2758_v63, 4  ;;  %v2759_v11 = vsel %vm13920_vm7, %v11547_v3, %v2758_v63  ;;  %v2640_v63 = vld [vmem:[%s13615_s5 + $0xb8] sm:$0xf]  ;;  %v2639_v3 = vld [vmem:[%s13615_s5 + $0xb4] sm:$0xe] }
 0x130   : > { %v2762_v12 = vsel %vm13920_vm7, %v2760_v4, %v2761_v7  ;;  %v2641_v4 = vld [vmem:[%s13615_s5 + $0xbc] sm:$0x1] }
 0x131   : > { %v11564_v16 = vcombine.low %v2759_v11, %v2762_v12  ;;  %v2803_v12 = vrot.slane %v2641_v4, 5  ;;  %v11693_v4 = vld [vmem:[%s13615_s5 + $0x20] sm:$0x1] }
 0x134   : > { %11575 = vmatmul.mubr.msk.bf16.gmra.mrb[12].mxu0 %vm557_vm1, %v11558_v13  ;;  %11592 = vmatmul.mubr.msk.bf16.gmra.mrb[12].mxu1 %vm557_vm1, %v11558_v13  ;;  %v2765_v13 = vrot.slane %v2625_v8, 5  ;;  %v11553_v8 = vrot.slane %v2639_v3, 9  ;;  %v13437_v3 = vld [vmem:[%s13615_s5 + $0xc0] sm:$0xff]  }
 0x135   : > { %3133 = vmatprep.mubr.bf16.mxu0 %v13523_v6  ;;  %3326 = vmatprep.mubr.bf16.mxu1 %v13523_v6 }
 0x136   : > { %v2767_v18 = vrot.slane %v2765_v13, 4  ;;  %v2766_v21 = vsel %vm13920_vm7, %v11548_v17, %v2765_v13  ;;  %v5343_v17 = vsel %vm606_vm0, %v13950_v52, 0 }
 0x138   : > { %v2769_v22 = vsel %vm13920_vm7, %v2767_v18, %v2768_v19  ;;  %v5349_v18 = vsel %vm606_vm0, %v13959_v50, 0  ;;  %v11851_v19 = vld [vmem:[%s15327_s1 + $0x28] sm:$0xff] }
 0x139   : > { %v11565_v26 = vcombine.low %v2766_v21, %v2769_v22  ;;  %v6383_v21 = vcombine.high %v11851_v19, %v11851_v19  ;;  %v13423_v22 = vld [vmem:[%s13615_s5 + $0x18] sm:$0xff]  }
 0x13b   : > { %v14138_v50 = vrot.slane %v6383_v21, %v13608_v10 }
 0x13c   : > { %11576 = vmatmul.mubr.msk.bf16.gmra.mrb[16].mxu0 %vm557_vm1, %v11559_v23  ;;  %11593 = vmatmul.mubr.msk.bf16.gmra.mrb[16].mxu1 %vm557_vm1, %v11559_v23  ;;  %v2772_v23 = vrot.slane %v2628_v20, 5  ;;  %v14131_v20 = vrot.slane %v11851_v19, %v13608_v10 }
 0x13d   : > { %3143 = vmatprep.mubr.bf16.mxu0 %v13523_v6  ;;  %3336 = vmatprep.mubr.bf16.mxu1 %v13523_v6 }
 0x13e   : > { %v2774_v31 = vrot.slane %v2772_v23, 4  ;;  %v2773_v34 = vsel %vm13920_vm7, %v11549_v28, %v2772_v23  ;;  %v6398_v52 = vcombine.high %v14131_v20, %v14131_v20  ;;  %v6399_v23 = vcombine.high %v14138_v50, %v14138_v50  ;;  %v13427_v28 = vld [vmem:[%s13615_s5 + $0x48] sm:$0xff]  }
 0x140   : > { %v2776_v35 = vsel %vm13920_vm7, %v2774_v31, %v2775_v32  ;;  %v13428_v31 = vld [vmem:[%s13615_s5 + $0x54] sm:$0xff]   ;;  %v13429_v32 = vld [vmem:[%s13615_s5 + $0x60] sm:$0xff]  }
 0x141   : > { %v11566_v39 = vcombine.low %v2773_v34, %v2776_v35  ;;  %v13431_v34 = vld [vmem:[%s13615_s5 + $0x78] sm:$0xff]   ;;  %v13432_v35 = vld [vmem:[%s13615_s5 + $0x84] sm:$0xff]  }
 0x144   : > { %11577 = vmatmul.mubr.msk.bf16.gmra.mrb[20].mxu0 %vm557_vm1, %v11560_v36  ;;  %11594 = vmatmul.mubr.msk.bf16.gmra.mrb[20].mxu1 %vm557_vm1, %v11560_v36  ;;  %v2779_v36 = vrot.slane %v2631_v33, 5  ;;  %v13430_v33 = vld [vmem:[%s13615_s5 + $0x6c] sm:$0xff]  }
 0x145   : > { %3153 = vmatprep.mubr.bf16.mxu0 %v13523_v6  ;;  %3346 = vmatprep.mubr.bf16.mxu1 %v13523_v6 }
 0x146   : > { %v2781_v41 = vrot.slane %v2779_v36, 4  ;;  %v2780_v44 = vsel %vm13920_vm7, %v11550_v40, %v2779_v36  ;;  %v13433_v36 = vld [vmem:[%s13615_s5 + $0x90] sm:$0xff]   ;;  %v13435_v40 = vld [vmem:[%s13615_s5 + $0xa8] sm:$0xff]  }
 0x148   : > { %v2783_v27 = vsel %vm13920_vm7, %v2781_v41, %v2782_v42  ;;  %v4715_v41 = vshrl.u32 %v11688_v38, 16  ;;  %v4718_v42 = vshll.u32 %v11688_v38, 16 }
 0x149   : > { %v11567_v46 = vcombine.low %v2780_v44, %v2783_v27 }
 0x14a   : > { %v4717_v27 = vrot.slane %v4715_v41, 4 }
 0x14c   : > { %11578 = vmatmul.mubr.msk.bf16.gmra.mrb[24].mxu0 %vm557_vm1, %v11561_v47  ;;  %11595 = vmatmul.mubr.msk.bf16.gmra.mrb[24].mxu1 %vm557_vm1, %v11561_v47  ;;  %v2786_v47 = vrot.slane %v2634_v43, 5 }
 0x14d   : > { %3163 = vmatprep.mubr.bf16.mxu0 %v13523_v6  ;;  %3356 = vmatprep.mubr.bf16.mxu1 %v13523_v6 }
 0x14e   : > { %v2788_v49 = vrot.slane %v2786_v47, 4  ;;  %v2787_v54 = vsel %vm13920_vm7, %v11551_v48, %v2786_v47  ;;  %v4720_v47 = vrot.slane %v4718_v42, 5  ;;  %v13436_v48 = vld [vmem:[%s13615_s5 + $0xb4] sm:$0xff]  }
 0x150   : > { %v2790_v55 = vsel %vm13920_vm7, %v2788_v49, %v2789_v51  ;;  %v11691_v49 = vld [vmem:[%s13615_s5 + $0x18] sm:$0xf]  ;;  %v11692_v51 = vld [vmem:[%s13615_s5 + $0x1c] sm:$0xf] }
 0x151   : > { %v11568_v59 = vcombine.low %v2787_v54, %v2790_v55  ;;  %v4742_v57 = vshll.u32 %v11691_v49, 16  ;;  %v4748_v58 = vshll.u32 %v11692_v51, 16 }
 0x154   : > { %11579 = vmatmul.mubr.msk.bf16.gmra.mrb[28].mxu0 %vm557_vm1, %v11562_v56  ;;  %11596 = vmatmul.mubr.msk.bf16.gmra.mrb[28].mxu1 %vm557_vm1, %v11562_v56  ;;  %v2793_v56 = vrot.slane %v2637_v53, 5  ;;  %v4721_v53 = vor.u32 %v4720_v47, %v4717_v27 }
 0x155   : > { %3173 = vmatprep.mubr.bf16.mxu0 %v13523_v6  ;;  %3366 = vmatprep.mubr.bf16.mxu1 %v13523_v6 }
 0x156   : > { %v2795_v61 = vrot.slane %v2793_v56, 4  ;;  %v2794_v0 = vsel %vm13920_vm7, %v11552_v60, %v2793_v56  ;;  %v4739_v56 = vshrl.u32 %v11691_v49, 16  ;;  %v4722_v60 = vrot.slane %v4721_v53, 4 }
 0x158   : > { %v2797_v1 = vsel %vm13920_vm7, %v2795_v61, %v2796_v62 }
 0x159   : > { %v11569_v7 = vcombine.low %v2794_v0, %v2797_v1  ;;  %v4744_v0 = vrot.slane %v4742_v57, 5  ;;  %v4750_v1 = vrot.slane %v4748_v58, 5 }
 0x15c   : > { %11580 = vmatmul.mubr.msk.bf16.gmra.mrb[32].mxu0 %vm557_vm1, %v11563_v2  ;;  %11597 = vmatmul.mubr.msk.bf16.gmra.mrb[32].mxu1 %vm557_vm1, %v11563_v2  ;;  %v2800_v2 = vrot.slane %v2640_v63, 5  ;;  %v4741_v63 = vrot.slane %v4739_v56, 4 }
 0x15d   : > { %3183 = vmatprep.mubr.bf16.mxu0 %v13523_v6  ;;  %3376 = vmatprep.mubr.bf16.mxu1 %v13523_v6 }
 0x15e   : > { %v2802_v11 = vrot.slane %v2800_v2, 4  ;;  %v2801_v13 = vsel %vm13920_vm7, %v11553_v8, %v2800_v2  ;;  %v11695_v8 = vld [vmem:[%s13615_s5 + $0x28] sm:$0xf] }
 0x15f   : > { %v4776_v19 = vshrl.u32 %v11695_v8, 16 }
 0x160   : > { %v2804_v14 = vsel %vm13920_vm7, %v2802_v11, %v2803_v12 }
 0x161   : > { %v11570_v15 = vcombine.low %v2801_v13, %v2804_v14  ;;  %v4745_v13 = vor.u32 %v4744_v0, %v4741_v63 }
 0x164   : > { %11581 = vmatmul.mubr.msk.bf16.gmra.mrb[36].mxu0 %vm557_vm1, %v11564_v16  ;;  %11598 = vmatmul.mubr.msk.bf16.gmra.mrb[36].mxu1 %vm557_vm1, %v11564_v16  ;;  %v13421_v16 = vld [vmem:[%s13615_s5 + $0xc] sm:$0xff]  }
 0x165   : > { %3193 = vmatprep.mubr.bf16.mxu0 %v13523_v6  ;;  %3386 = vmatprep.mubr.bf16.mxu1 %v13523_v6 }
 0x16c   : > { %11582 = vmatmul.mubr.msk.bf16.gmra.mrb[40].mxu0 %vm557_vm1, %v11565_v26  ;;  %11599 = vmatmul.mubr.msk.bf16.gmra.mrb[40].mxu1 %vm557_vm1, %v11565_v26  ;;  %v13426_v26 = vld [vmem:[%s13615_s5 + $0x3c] sm:$0xff]  }
 0x16d   : > { %3203 = vmatprep.mubr.bf16.mxu0 %v13523_v6  ;;  %3396 = vmatprep.mubr.bf16.mxu1 %v13523_v6 }
 0x174   : > { %11583 = vmatmul.mubr.msk.bf16.gmra.mrb[44].mxu0 %vm557_vm1, %v11566_v39  ;;  %11600 = vmatmul.mubr.msk.bf16.gmra.mrb[44].mxu1 %vm557_vm1, %v11566_v39  ;;  %v11689_v39 = vld [vmem:[%s13615_s5 + $0x10] sm:$0xf] }
 0x175   : > { %3213 = vmatprep.mubr.bf16.mxu0 %v13523_v6  ;;  %3406 = vmatprep.mubr.bf16.mxu1 %v13523_v6  ;;  %v4724_v43 = vshll.u32 %v11689_v39, 16  ;;  %v4728_v44 = vshrl.u32 %v11689_v39, 16 }
 0x177   : > { %v4726_v30 = vrot.slane %v4724_v43, 5  ;;  %v4730_v45 = vrot.slane %v4728_v44, 4 }
 0x179   : > { %v4731_v54 = vor.u32 %v4730_v45, %v4726_v30  ;;  %v4727_v11 = vsel %vm13724_vm4, %v4722_v60, %v4726_v30  ;;  %v11700_v30 = vld [vmem:[%s13615_s5 + $0x3c] sm:$0xf]  ;;  %v11701_v45 = vld [vmem:[%s13615_s5 + $0x40] sm:$0xf] }
 0x17a   : > { %v4811_v60 = vshrl.u32 %v11700_v30, 16  ;;  %v4824_v63 = vshrl.u32 %v11701_v45, 16 }
 0x17b   : > { %v4732_v61 = vrot.slane %v4731_v54, 4 }
 0x17c   : > { %11584 = vmatmul.mubr.msk.bf16.gmra.mrb[48].mxu0 %vm557_vm1, %v11567_v46  ;;  %11601 = vmatmul.mubr.msk.bf16.gmra.mrb[48].mxu1 %vm557_vm1, %v11567_v46  ;;  %v11690_v46 = vld [vmem:[%s13615_s5 + $0x14] sm:$0x1] }
 0x17d   : > { %3223 = vmatprep.mubr.bf16.mxu0 %v13523_v6  ;;  %3416 = vmatprep.mubr.bf16.mxu1 %v13523_v6  ;;  %v4734_v55 = vshll.u32 %v11690_v46, 16 }
 0x17f   : > { %v4736_v62 = vrot.slane %v4734_v55, 5 }
 0x181   : > { %v4737_v12 = vsel %vm13724_vm4, %v4732_v61, %v4736_v62  ;;  %v4814_v61 = vshll.u32 %v11700_v30, 16  ;;  %v4820_v62 = vshll.u32 %v11701_v45, 16 }
 0x182   : > { %v11737_v21 = vcombine.low %v4727_v11, %v4737_v12  ;;  %v4826_v12 = vrot.slane %v4824_v63, 4 }
 0x183   : > { %v4822_v11 = vrot.slane %v4820_v62, 5  ;;  %v11710_v62 = vld [vmem:[%s13615_s5 + $0x64] sm:$0xf] }
 0x184   : > { %11585 = vmatmul.mubr.msk.bf16.gmra.mrb[52].mxu0 %vm557_vm1, %v11568_v59  ;;  %11602 = vmatmul.mubr.msk.bf16.gmra.mrb[52].mxu1 %vm557_vm1, %v11568_v59  ;;  %v4752_v59 = vshrl.u32 %v11692_v51, 16 }
 0x185   : > { %3233 = vmatprep.mubr.bf16.mxu0 %v13523_v6  ;;  %3426 = vmatprep.mubr.bf16.mxu1 %v13523_v6 }
 0x186   : > { %v4754_v2 = vrot.slane %v4752_v59, 4  ;;  %v11699_v59 = vld [vmem:[%s13615_s5 + $0x38] sm:$0x1] }
 0x188   : > { %v4755_v14 = vor.u32 %v4754_v2, %v4750_v1 }
 0x18c   : > { %11586 = vmatmul.mubr.msk.bf16.gmra.mrb[56].mxu0 %vm557_vm1, %v11569_v7  ;;  %11603 = vmatmul.mubr.msk.bf16.gmra.mrb[56].mxu1 %vm557_vm1, %v11569_v7  ;;  %v11694_v7 = vld [vmem:[%s13615_s5 + $0x24] sm:$0xf] }
 0x18d   : > { %3243 = vmatprep.mubr.bf16.mxu0 %v13523_v6  ;;  %3436 = vmatprep.mubr.bf16.mxu1 %v13523_v6 }
 0x194   : > { %11587 = vmatmul.mubr.msk.bf16.gmra.mrb[60].mxu0 %vm557_vm1, %v11570_v15  ;;  %11604 = vmatmul.mubr.msk.bf16.gmra.mrb[60].mxu1 %vm557_vm1, %v11570_v15  ;;  %v4758_v15 = vshll.u32 %v11693_v4, 16  ;;  %v4806_v4 = vshll.u32 %v11699_v59, 16 }
 0x195   : > { %4056 = vmatprep.mubr.bf16.mxu0 %v13523_v6  ;;  %4249 = vmatprep.mubr.bf16.mxu1 %v13523_v6 }
 0x19c   : > { %11655 = vmatmul.mubr.msk.bf16.vlgmr.msra.gmra.mrb[0].mxu0 %vm557_vm1, %v13421_v16  ;;  %11672 = vmatmul.mubr.msk.bf16.vlgmr.msra.gmra.mrb[0].mxu1 %vm557_vm1, %v13421_v16  ;;  %v4763_v16 = vshrl.u32 %v11694_v7, 16 }
 0x19d   : > { %5355 = vmatpush1.bf16.msra.mxu0 %v5343_v17  ;;  %5548 = vmatpush1.bf16.msra.mxu1 %v5349_v18  ;;  %v4766_v17 = vshll.u32 %v11694_v7, 16  ;;  %v4772_v18 = vshll.u32 %v11695_v8, 16  ;;  %v4813_v7 = vrot.slane %v4811_v60, 4  ;;  %v4816_v8 = vrot.slane %v4814_v61, 5  ;;  %v11708_v60 = vld [vmem:[%s13615_s5 + $0x5c] sm:$0x1] }
 0x19e   : > { %4066 = vmatprep.mubr.bf16.mxu0 %v13523_v6  ;;  %4259 = vmatprep.mubr.bf16.mxu1 %v13523_v6  ;;  %v11709_v61 = vld [vmem:[%s13615_s5 + $0x60] sm:$0xf] }
 0x19f   : > { %11868 = vmatprep.subr.msk.bf16.mxu0 %vm606_vm0, %v6398_v52  ;;  %11885 = vmatprep.subr.msk.bf16.mxu1 %vm606_vm0, %v6399_v23  ;;  %v4746_v52 = vrot.slane %v4745_v13, 4  ;;  %v4760_v23 = vrot.slane %v4758_v15, 5  ;;  %v11702_v13 = vld [vmem:[%s13615_s5 + $0x44] sm:$0x1]  ;;  %v11703_v15 = vld [vmem:[%s13615_s5 + $0x48] sm:$0xf] }
 0x1a4   : > { %11656 = vmatmul.mubr.msk.bf16.gmra.mrb[4].mxu0 %vm557_vm1, %v13423_v22  ;;  %11673 = vmatmul.mubr.msk.bf16.gmra.mrb[4].mxu1 %vm557_vm1, %v13423_v22  ;;  %v4756_v22 = vrot.slane %v4755_v14, 4 }
 0x1a5   : > { %4076 = vmatprep.mubr.bf16.mxu0 %v13523_v6  ;;  %4269 = vmatprep.mubr.bf16.mxu1 %v13523_v6 }
 0x1ac   : > { %11657 = vmatmul.mubr.msk.bf16.gmra.mrb[8].mxu0 %vm557_vm1, %v13424_v24  ;;  %11674 = vmatmul.mubr.msk.bf16.gmra.mrb[8].mxu1 %vm557_vm1, %v13424_v24  ;;  %v11696_v24 = vld [vmem:[%s13615_s5 + $0x2c] sm:$0x1] }
 0x1ad   : > { %4086 = vmatprep.mubr.bf16.mxu0 %v13523_v6  ;;  %4279 = vmatprep.mubr.bf16.mxu1 %v13523_v6  ;;  %v4782_v38 = vshll.u32 %v11696_v24, 16  ;;  %v4838_v24 = vshll.u32 %v11703_v15, 16 }
 0x1af   : > { %v4784_v53 = vrot.slane %v4782_v38, 5 }
 0x1b4   : > { %11658 = vmatmul.mubr.msk.bf16.gmra.mrb[12].mxu0 %vm557_vm1, %v13425_v25  ;;  %11675 = vmatmul.mubr.msk.bf16.gmra.mrb[12].mxu1 %vm557_vm1, %v13425_v25  ;;  %v4765_v25 = vrot.slane %v4763_v16, 4  ;;  %v11704_v16 = vld [vmem:[%s13615_s5 + $0x4c] sm:$0xf] }
 0x1b5   : > { %4096 = vmatprep.mubr.bf16.mxu0 %v13523_v6  ;;  %4289 = vmatprep.mubr.bf16.mxu1 %v13523_v6 }
 0x1bc   : > { %11659 = vmatmul.mubr.msk.bf16.gmra.mrb[16].mxu0 %vm557_vm1, %v13426_v26  ;;  %11676 = vmatmul.mubr.msk.bf16.gmra.mrb[16].mxu1 %vm557_vm1, %v13426_v26  ;;  %v4768_v26 = vrot.slane %v4766_v17, 5 }
 0x1bd   : > { %4106 = vmatprep.mubr.bf16.mxu0 %v13523_v6  ;;  %4299 = vmatprep.mubr.bf16.mxu1 %v13523_v6 }
 0x1be   : > { %v4769_v39 = vor.u32 %v4768_v26, %v4765_v25  ;;  %v4844_v25 = vshll.u32 %v11704_v16, 16  ;;  %v4848_v26 = vshrl.u32 %v11704_v16, 16 }
 0x1c0   : > { %v4770_v49 = vrot.slane %v4769_v39, 4  ;;  %v4850_v38 = vrot.slane %v4848_v26, 4 }
 0x1c4   : > { %11660 = vmatmul.mubr.msk.bf16.gmra.mrb[20].mxu0 %vm557_vm1, %v13427_v28  ;;  %11677 = vmatmul.mubr.msk.bf16.gmra.mrb[20].mxu1 %vm557_vm1, %v13427_v28  ;;  %v4774_v28 = vrot.slane %v4772_v18, 5 }
 0x1c5   : > { %4116 = vmatprep.mubr.bf16.mxu0 %v13523_v6  ;;  %4309 = vmatprep.mubr.bf16.mxu1 %v13523_v6 }
 0x1c6   : > { %v4775_v0 = vsel %vm13724_vm4, %v4770_v49, %v4774_v28 }
 0x1cc   : > { %11661 = vmatmul.mubr.msk.bf16.gmra.mrb[24].mxu0 %vm557_vm1, %v13428_v31  ;;  %11678 = vmatmul.mubr.msk.bf16.gmra.mrb[24].mxu1 %vm557_vm1, %v13428_v31  ;;  %v4778_v31 = vrot.slane %v4776_v19, 4  ;;  %v4808_v19 = vrot.slane %v4806_v4, 5  ;;  %v4883_v4 = vshrl.u32 %v11709_v61, 16 }
 0x1cd   : > { %4126 = vmatprep.mubr.bf16.mxu0 %v13523_v6  ;;  %4319 = vmatprep.mubr.bf16.mxu1 %v13523_v6 }
 0x1d4   : > { %11662 = vmatmul.mubr.msk.bf16.gmra.mrb[28].mxu0 %vm557_vm1, %v13429_v32  ;;  %11679 = vmatmul.mubr.msk.bf16.gmra.mrb[28].mxu1 %vm557_vm1, %v13429_v32  ;;  %v11697_v32 = vld [vmem:[%s13615_s5 + $0x30] sm:$0xf] }
 0x1d5   : > { %4136 = vmatprep.mubr.bf16.mxu0 %v13523_v6  ;;  %4329 = vmatprep.mubr.bf16.mxu1 %v13523_v6  ;;  %v4790_v41 = vshll.u32 %v11697_v32, 16 }
 0x1d7   : > { %v4792_v55 = vrot.slane %v4790_v41, 5  ;;  %v11707_v41 = vld [vmem:[%s13615_s5 + $0x58] sm:$0xf] }
 0x1d8   : > { %v4872_v49 = vshrl.u32 %v11707_v41, 16 }
 0x1da   : > { %v4874_v59 = vrot.slane %v4872_v49, 4 }
 0x1dc   : > { %11663 = vmatmul.mubr.msk.bf16.gmra.mrb[32].mxu0 %vm557_vm1, %v13430_v33  ;;  %11680 = vmatmul.mubr.msk.bf16.gmra.mrb[32].mxu1 %vm557_vm1, %v13430_v33  ;;  %v6449_v33 = vsel %vm606_vm0, %v14131_v20, 0  ;;  %v4787_v20 = vshrl.u32 %v11697_v32, 16 }
 0x1dd   : > { %4146 = vmatprep.mubr.bf16.mxu0 %v13523_v6  ;;  %4339 = vmatprep.mubr.bf16.mxu1 %v13523_v6 }
 0x1de   : > { %v4789_v54 = vrot.slane %v4787_v20, 4  ;;  %v11706_v20 = vld [vmem:[%s13615_s5 + $0x54] sm:$0xf] }
 0x1df   : > { %v4859_v30 = vshrl.u32 %v11706_v20, 16  ;;  %v4862_v45 = vshll.u32 %v11706_v20, 16  ;;  %v11715_v20 = vld [vmem:[%s13615_s5 + $0x78] sm:$0xf] }
 0x1e0   : > { %v4793_v2 = vor.u32 %v4792_v55, %v4789_v54 }
 0x1e2   : > { %v4794_v17 = vrot.slane %v4793_v2, 4 }
 0x1e4   : > { %11664 = vmatmul.mubr.msk.bf16.gmra.mrb[36].mxu0 %vm557_vm1, %v13431_v34  ;;  %11681 = vmatmul.mubr.msk.bf16.gmra.mrb[36].mxu1 %vm557_vm1, %v13431_v34  ;;  %v6455_v34 = vsel %vm606_vm0, %v14138_v50, 0  ;;  %v11934_v50 = vld [vmem:[%s15327_s1 + $0x30] sm:$0xff] }
 0x1e5   : > { %4156 = vmatprep.mubr.bf16.mxu0 %v13523_v6  ;;  %4349 = vmatprep.mubr.bf16.mxu1 %v13523_v6  ;;  %v14248_v44 = vrot.slane %v11934_v50, %v13608_v10  ;;  %v7346_v27 = vcombine.high %v11934_v50, %v11934_v50 }
 0x1e7   : > { %v7361_v46 = vcombine.high %v14248_v44, %v14248_v44 }
 0x1ec   : > { %11665 = vmatmul.mubr.msk.bf16.gmra.mrb[40].mxu0 %vm557_vm1, %v13432_v35  ;;  %11682 = vmatmul.mubr.msk.bf16.gmra.mrb[40].mxu1 %vm557_vm1, %v13432_v35  ;;  %v11698_v35 = vld [vmem:[%s13615_s5 + $0x34] sm:$0xf] }
 0x1ed   : > { %4166 = vmatprep.mubr.bf16.mxu0 %v13523_v6  ;;  %4359 = vmatprep.mubr.bf16.mxu1 %v13523_v6  ;;  %v4796_v42 = vshll.u32 %v11698_v35, 16  ;;  %v4800_v43 = vshrl.u32 %v11698_v35, 16 }
 0x1ef   : > { %v4798_v56 = vrot.slane %v4796_v42, 5  ;;  %v4802_v57 = vrot.slane %v4800_v43, 4 }
 0x1f4   : > { %11666 = vmatmul.mubr.msk.bf16.gmra.mrb[44].mxu0 %vm557_vm1, %v13433_v36  ;;  %11683 = vmatmul.mubr.msk.bf16.gmra.mrb[44].mxu1 %vm557_vm1, %v13433_v36  ;;  %v4751_v36 = vsel %vm13724_vm4, %v4746_v52, %v4750_v1  ;;  %v4827_v52 = vor.u32 %v4826_v12, %v4822_v11  ;;  %v11712_v12 = vld [vmem:[%s13615_s5 + $0x6c] sm:$0xf] }
 0x1f5   : > { %4176 = vmatprep.mubr.bf16.mxu0 %v13523_v6  ;;  %4369 = vmatprep.mubr.bf16.mxu1 %v13523_v6 }
 0x1fc   : > { %11667 = vmatmul.mubr.msk.bf16.gmra.mrb[48].mxu0 %vm557_vm1, %v13434_v37  ;;  %11684 = vmatmul.mubr.msk.bf16.gmra.mrb[48].mxu1 %vm557_vm1, %v13434_v37  ;;  %v4761_v37 = vsel %vm13724_vm4, %v4756_v22, %v4760_v23  ;;  %v4830_v22 = vshll.u32 %v11702_v13, 16  ;;  %v4835_v23 = vshrl.u32 %v11703_v15, 16  ;;  %v11713_v13 = vld [vmem:[%s13615_s5 + $0x70] sm:$0xf] }
 0x1fd   : > { %4186 = vmatprep.mubr.bf16.mxu0 %v13523_v6  ;;  %4379 = vmatprep.mubr.bf16.mxu1 %v13523_v6  ;;  %v11738_v47 = vcombine.low %v4751_v36, %v4761_v37  ;;  %v4840_v36 = vrot.slane %v4838_v24, 5  ;;  %v4846_v37 = vrot.slane %v4844_v25, 5  ;;  %v4910_v24 = vshll.u32 %v11712_v12, 16 }
 0x1fe   : > { %v4837_v35 = vrot.slane %v4835_v23, 4  ;;  %v4907_v23 = vshrl.u32 %v11712_v12, 16  ;;  %v4916_v25 = vshll.u32 %v11713_v13, 16  ;;  %v4920_v26 = vshrl.u32 %v11713_v13, 16 }
 0x200   : > { %v4841_v43 = vor.u32 %v4840_v36, %v4837_v35  ;;  %v4909_v35 = vrot.slane %v4907_v23, 4  ;;  %v4912_v36 = vrot.slane %v4910_v24, 5  ;;  %v11720_v23 = vld [vmem:[%s13615_s5 + $0x8c] sm:$0x1]  ;;  %v11721_v24 = vld [vmem:[%s13615_s5 + $0x90] sm:$0xf] }
 0x204   : > { %11668 = vmatmul.mubr.msk.bf16.gmra.mrb[52].mxu0 %vm557_vm1, %v13435_v40  ;;  %11685 = vmatmul.mubr.msk.bf16.gmra.mrb[52].mxu1 %vm557_vm1, %v13435_v40  ;;  %v4779_v40 = vor.u32 %v4778_v31, %v4774_v28  ;;  %v4799_v28 = vsel %vm13724_vm4, %v4794_v17, %v4798_v56 }
 0x205   : > { %4196 = vmatprep.mubr.bf16.mxu0 %v13523_v6  ;;  %4389 = vmatprep.mubr.bf16.mxu1 %v13523_v6 }
 0x206   : > { %v4780_v51 = vrot.slane %v4779_v40, 4  ;;  %v11705_v40 = vld [vmem:[%s13615_s5 + $0x50] sm:$0x1] }
 0x208   : > { %v4785_v1 = vsel %vm13724_vm4, %v4780_v51, %v4784_v53  ;;  %v4842_v53 = vrot.slane %v4841_v43, 4 }
 0x209   : > { %v11739_v14 = vcombine.low %v4775_v0, %v4785_v1 }
 0x20a   : > { %v4847_v63 = vsel %vm13724_vm4, %v4842_v53, %v4846_v37 }
 0x20c   : > { %11669 = vmatmul.mubr.msk.bf16.gmra.mrb[56].mxu0 %vm557_vm1, %v13436_v48  ;;  %11686 = vmatmul.mubr.msk.bf16.gmra.mrb[56].mxu1 %vm557_vm1, %v13436_v48  ;;  %v14257_v48 = vrot.slane %v7346_v27, %v13608_v10  ;;  %v4851_v27 = vor.u32 %v4850_v38, %v4846_v37  ;;  %v4918_v37 = vrot.slane %v4916_v25, 5  ;;  %v4922_v38 = vrot.slane %v4920_v26, 4  ;;  %v11722_v25 = vld [vmem:[%s13615_s5 + $0x94] sm:$0xf] }
 0x20d   : > { %4206 = vmatprep.mubr.bf16.mxu0 %v13523_v6  ;;  %4399 = vmatprep.mubr.bf16.mxu1 %v13523_v6 }
 0x20e   : > { %v7362_v58 = vcombine.high %v14257_v48, %v14257_v48  ;;  %v4852_v54 = vrot.slane %v4851_v27, 4  ;;  %v4913_v27 = vor.u32 %v4912_v36, %v4909_v35  ;;  %v4982_v35 = vshll.u32 %v11721_v24, 16 }
 0x20f   : > { %v4988_v36 = vshll.u32 %v11722_v25, 16 }
 0x214   : > { %11670 = vmatmul.mubr.msk.bf16.gmra.mrb[60].mxu0 %vm557_vm1, %v13437_v3  ;;  %11687 = vmatmul.mubr.msk.bf16.gmra.mrb[60].mxu1 %vm557_vm1, %v13437_v3  ;;  %v4803_v3 = vor.u32 %v4802_v57, %v4798_v56  ;;  %v4861_v56 = vrot.slane %v4859_v30, 4  ;;  %v4864_v57 = vrot.slane %v4862_v45, 5  ;;  %v4931_v45 = vshrl.u32 %v11715_v20, 16 }
 0x215   : > { %5386 = vmatprep.mubr.bf16.mxu0 %v13523_v6  ;;  %5579 = vmatprep.mubr.bf16.mxu1 %v13523_v6 }
 0x216   : > { %v4804_v18 = vrot.slane %v4803_v3, 4  ;;  %v4865_v1 = vor.u32 %v4864_v57, %v4861_v56  ;;  %v4878_v3 = vshll.u32 %v11708_v60, 16 }
 0x218   : > { %v4809_v31 = vsel %vm13724_vm4, %v4804_v18, %v4808_v19  ;;  %v4866_v15 = vrot.slane %v4865_v1, 4  ;;  %v4880_v17 = vrot.slane %v4878_v3, 5  ;;  %v4885_v18 = vrot.slane %v4883_v4, 4  ;;  %v11719_v1 = vld [vmem:[%s13615_s5 + $0x88] sm:$0xf] }
 0x219   : > { %v11740_v39 = vcombine.low %v4799_v28, %v4809_v31  ;;  %v4964_v13 = vshll.u32 %v11719_v1, 16 }
 0x21c   : > { %11754 = vmatmul.mubr.msk.bf16.vlgmr.msra.gmra.mrb[0].mxu0 %vm557_vm1, %v11737_v21  ;;  %11771 = vmatmul.mubr.msk.bf16.vlgmr.msra.gmra.mrb[0].mxu1 %vm557_vm1, %v11737_v21  ;;  %v4817_v21 = vor.u32 %v4816_v8, %v4813_v7  ;;  %v4886_v7 = vshll.u32 %v11709_v61, 16  ;;  %v4892_v8 = vshll.u32 %v11710_v62, 16 }
 0x21d   : > { %6461 = vmatpush1.bf16.msra.mxu0 %v6449_v33  ;;  %6654 = vmatpush1.bf16.msra.mxu1 %v6455_v34  ;;  %v4828_v33 = vrot.slane %v4827_v52, 4  ;;  %v4832_v34 = vrot.slane %v4830_v22, 5  ;;  %v11711_v22 = vld [vmem:[%s13615_s5 + $0x68] sm:$0x1] }
 0x21e   : > { %5396 = vmatprep.mubr.bf16.mxu0 %v13523_v6  ;;  %5589 = vmatprep.mubr.bf16.mxu1 %v13523_v6  ;;  %v4818_v32 = vrot.slane %v4817_v21, 4  ;;  %v4888_v19 = vrot.slane %v4886_v7, 5  ;;  %v4894_v21 = vrot.slane %v4892_v8, 5 }
 0x21f   : > { %11951 = vmatprep.subr.msk.bf16.mxu0 %vm606_vm0, %v7361_v46  ;;  %11968 = vmatprep.subr.msk.bf16.mxu1 %vm606_vm0, %v7362_v58  ;;  %v4833_v42 = vsel %vm13724_vm4, %v4828_v33, %v4832_v34  ;;  %v4868_v46 = vshll.u32 %v11707_v41, 16  ;;  %v4902_v34 = vshll.u32 %v11711_v22, 16  ;;  %v11716_v41 = vld [vmem:[%s13615_s5 + $0x7c] sm:$0xf] }
 0x220   : > { %v4823_v50 = vsel %vm13724_vm4, %v4818_v32, %v4822_v11  ;;  %v4896_v11 = vshrl.u32 %v11710_v62, 16  ;;  %v4889_v32 = vor.u32 %v4888_v19, %v4885_v18  ;;  %v4940_v49 = vshll.u32 %v11716_v41, 16 }
 0x221   : > { %v11741_v51 = vcombine.low %v4823_v50, %v4833_v42  ;;  %v4870_v58 = vrot.slane %v4868_v46, 5  ;;  %v4904_v43 = vrot.slane %v4902_v34, 5  ;;  %v4934_v46 = vshll.u32 %v11715_v20, 16 }
 0x222   : > { %v4898_v52 = vrot.slane %v4896_v11, 4  ;;  %v4890_v50 = vrot.slane %v4889_v32, 4  ;;  %v4942_v60 = vrot.slane %v4940_v49, 5  ;;  %v4979_v34 = vshrl.u32 %v11721_v24, 16 }
 0x223   : > { %v4875_v2 = vor.u32 %v4874_v59, %v4870_v58  ;;  %v4871_v28 = vsel %vm13724_vm4, %v4866_v15, %v4870_v58  ;;  %v4933_v58 = vrot.slane %v4931_v45, 4  ;;  %v4936_v59 = vrot.slane %v4934_v46, 5 }
 0x224   : > { %11755 = vmatmul.mubr.msk.bf16.gmra.mrb[4].mxu0 %vm557_vm1, %v11738_v47  ;;  %11772 = vmatmul.mubr.msk.bf16.gmra.mrb[4].mxu1 %vm557_vm1, %v11738_v47  ;;  %v4854_v47 = vshll.u32 %v11705_v40, 16  ;;  %v4899_v33 = vor.u32 %v4898_v52, %v4894_v21  ;;  %v4895_v53 = vsel %vm13724_vm4, %v4890_v50, %v4894_v21  ;;  %v4966_v52 = vrot.slane %v4964_v13, 5 }
 0x225   : > { %5406 = vmatprep.mubr.bf16.mxu0 %v13523_v6  ;;  %5599 = vmatprep.mubr.bf16.mxu1 %v13523_v6  ;;  %v4876_v16 = vrot.slane %v4875_v2, 4  ;;  %v4937_v4 = vor.u32 %v4936_v59, %v4933_v58 }
 0x226   : > { %v4856_v55 = vrot.slane %v4854_v47, 5  ;;  %v4900_v42 = vrot.slane %v4899_v33, 4  ;;  %v4923_v47 = vor.u32 %v4922_v38, %v4918_v37  ;;  %v4974_v33 = vshll.u32 %v11720_v23, 16  ;;  %v11724_v38 = vld [vmem:[%s13615_s5 + $0x9c] sm:$0xf] }
 0x227   : > { %v4881_v31 = vsel %vm13724_vm4, %v4876_v16, %v4880_v17  ;;  %v4938_v16 = vrot.slane %v4937_v4, 4  ;;  %v5003_v45 = vshrl.u32 %v11724_v38, 16  ;;  %v5006_v46 = vshll.u32 %v11724_v38, 16 }
 0x228   : > { %v4857_v0 = vsel %vm13724_vm4, %v4852_v54, %v4856_v55  ;;  %v11743_v40 = vcombine.low %v4871_v28, %v4881_v31  ;;  %v4905_v54 = vsel %vm13724_vm4, %v4900_v42, %v4904_v43  ;;  %v4914_v55 = vrot.slane %v4913_v27, 4 }
 0x229   : > { %v4924_v56 = vrot.slane %v4923_v47, 4  ;;  %v11744_v62 = vcombine.low %v4895_v53, %v4905_v54  ;;  %v4943_v26 = vsel %vm13724_vm4, %v4938_v16, %v4942_v60  ;;  %v4976_v50 = vrot.slane %v4974_v33, 5 }
 0x22a   : > { %v4919_v2 = vsel %vm13724_vm4, %v4914_v55, %v4918_v37  ;;  %v4992_v37 = vshrl.u32 %v11722_v25, 16  ;;  %v4981_v42 = vrot.slane %v4979_v34, 4  ;;  %v4984_v43 = vrot.slane %v4982_v35, 5 }
 0x22b   : > { %v4990_v27 = vrot.slane %v4988_v36, 5  ;;  %v5005_v58 = vrot.slane %v5003_v45, 4  ;;  %v5008_v59 = vrot.slane %v5006_v46, 5  ;;  %v11732_v45 = vld [vmem:[%s13615_s5 + $0xbc] sm:$0x1] }
 0x22c   : > { %11756 = vmatmul.mubr.msk.bf16.gmra.mrb[8].mxu0 %vm557_vm1, %v11739_v14  ;;  %11773 = vmatmul.mubr.msk.bf16.gmra.mrb[8].mxu1 %vm557_vm1, %v11739_v14  ;;  %v11742_v14 = vcombine.low %v4847_v63, %v4857_v0  ;;  %v11717_v63 = vld [vmem:[%s13615_s5 + $0x80] sm:$0x1]  ;;  %v11718_v0 = vld [vmem:[%s13615_s5 + $0x84] sm:$0xf]  ;;  %v4994_v47 = vrot.slane %v4992_v37, 4  ;;  %v4985_v55 = vor.u32 %v4984_v43, %v4981_v42 }
 0x22d   : > { %5416 = vmatprep.mubr.bf16.mxu0 %v13523_v6  ;;  %5609 = vmatprep.mubr.bf16.mxu1 %v13523_v6  ;;  %v4950_v8 = vshll.u32 %v11717_v63, 16  ;;  %v4955_v11 = vshrl.u32 %v11718_v0, 16  ;;  %v4958_v12 = vshll.u32 %v11718_v0, 16  ;;  %v11727_v0 = vld [vmem:[%s13615_s5 + $0xa8] sm:$0xf] }
 0x22e   : > { %v5030_v13 = vshll.u32 %v11727_v0, 16  ;;  %v11733_v46 = vld [vmem:[%s13615_s5 + $0xc0] sm:$0xf] }
 0x22f   : > { %v4952_v18 = vrot.slane %v4950_v8, 5  ;;  %v4957_v19 = vrot.slane %v4955_v11, 4  ;;  %v4960_v21 = vrot.slane %v4958_v12, 5  ;;  %v5027_v12 = vshrl.u32 %v11727_v0, 16 }
 0x231   : > { %v4961_v31 = vor.u32 %v4960_v21, %v4957_v19 }
 0x233   : > { %v4962_v20 = vrot.slane %v4961_v31, 4  ;;  %v11731_v31 = vld [vmem:[%s13615_s5 + $0xb8] sm:$0xf] }
 0x234   : > { %11757 = vmatmul.mubr.msk.bf16.gmra.mrb[12].mxu0 %vm557_vm1, %v11740_v39  ;;  %11774 = vmatmul.mubr.msk.bf16.gmra.mrb[12].mxu1 %vm557_vm1, %v11740_v39  ;;  %v11714_v39 = vld [vmem:[%s13615_s5 + $0x74] sm:$0x1] }
 0x235   : > { %5426 = vmatprep.mubr.bf16.mxu0 %v13523_v6  ;;  %5619 = vmatprep.mubr.bf16.mxu1 %v13523_v6  ;;  %v4926_v30 = vshll.u32 %v11714_v39, 16  ;;  %v11725_v39 = vld [vmem:[%s13615_s5 + $0xa0] sm:$0xf]  ;;  %v4967_v53 = vsel %vm13724_vm4, %v4962_v20, %v4966_v52 }
 0x236   : > { %v5012_v49 = vshll.u32 %v11725_v39, 16 }
 0x237   : > { %v4928_v57 = vrot.slane %v4926_v30, 5  ;;  %v11723_v30 = vld [vmem:[%s13615_s5 + $0x98] sm:$0x1] }
 0x239   : > { %v4929_v3 = vsel %vm13724_vm4, %v4924_v56, %v4928_v57  ;;  %v4995_v56 = vor.u32 %v4994_v47, %v4990_v27  ;;  %v4998_v57 = vshll.u32 %v11723_v30, 16 }
 0x23a   : > { %v11745_v15 = vcombine.low %v4919_v2, %v4929_v3  ;;  %v4986_v2 = vrot.slane %v4985_v55, 4 }
 0x23b   : > { %v4996_v3 = vrot.slane %v4995_v56, 4  ;;  %v5000_v4 = vrot.slane %v4998_v57, 5  ;;  %v5070_v56 = vshll.u32 %v11732_v45, 16  ;;  %v5075_v57 = vshrl.u32 %v11733_v46, 16  ;;  %v11793_v45 = vld [vmem:[%s13615_s5 + $0x24] sm:$0xe] }
 0x23c   : > { %11758 = vmatmul.mubr.msk.bf16.gmra.mrb[16].mxu0 %vm557_vm1, %v11741_v51  ;;  %11775 = vmatmul.mubr.msk.bf16.gmra.mrb[16].mxu1 %vm557_vm1, %v11741_v51  ;;  %v4944_v51 = vshrl.u32 %v11716_v41, 16  ;;  %v4991_v16 = vsel %vm13724_vm4, %v4986_v2, %v4990_v27 }
 0x23d   : > { %5436 = vmatprep.mubr.bf16.mxu0 %v13523_v6  ;;  %5629 = vmatprep.mubr.bf16.mxu1 %v13523_v6  ;;  %v5072_v0 = vrot.slane %v5070_v56, 5 }
 0x23e   : > { %v4946_v61 = vrot.slane %v4944_v51, 4  ;;  %v5016_v51 = vshrl.u32 %v11725_v39, 16  ;;  %v5060_v39 = vshll.u32 %v11731_v31, 16 }
 0x240   : > { %v4947_v7 = vor.u32 %v4946_v61, %v4942_v60  ;;  %v5014_v60 = vrot.slane %v5012_v49, 5  ;;  %v5018_v61 = vrot.slane %v5016_v51, 4  ;;  %v5062_v47 = vrot.slane %v5060_v39, 5  ;;  %v11734_v49 = vld [vmem:[%s13615_s5 + $0xc4] sm:$0xf] }
 0x242   : > { %v4948_v17 = vrot.slane %v4947_v7, 4  ;;  %v5009_v7 = vor.u32 %v5008_v59, %v5005_v58  ;;  %v5019_v8 = vor.u32 %v5018_v61, %v5014_v60  ;;  %v5078_v58 = vshll.u32 %v11733_v46, 16  ;;  %v11795_v46 = vld [vmem:[%s13615_s5 + $0x2c] sm:$0x1] }
 0x243   : > { %v5084_v59 = vshll.u32 %v11734_v49, 16  ;;  %v6111_v56 = vrot.slane %v11795_v46, 5  ;;  %v11812_v46 = vld [vmem:[%s13615_s5 + $0x70] sm:$0xf] }
 0x244   : > { %11759 = vmatmul.mubr.msk.bf16.gmra.mrb[20].mxu0 %vm557_vm1, %v11742_v14  ;;  %11776 = vmatmul.mubr.msk.bf16.gmra.mrb[20].mxu1 %vm557_vm1, %v11742_v14  ;;  %v4968_v14 = vshrl.u32 %v11719_v1, 16  ;;  %v4953_v28 = vsel %vm13724_vm4, %v4948_v17, %v4952_v18  ;;  %v11728_v1 = vld [vmem:[%s13615_s5 + $0xac] sm:$0xf]  ;;  %v5001_v17 = vsel %vm13724_vm4, %v4996_v3, %v5000_v4  ;;  %v5010_v18 = vrot.slane %v5009_v7, 4  ;;  %v11735_v7 = vld [vmem:[%s13615_s5 + $0xc8] sm:$0x1] }
 0x245   : > { %5446 = vmatprep.mubr.bf16.mxu0 %v13523_v6  ;;  %5639 = vmatprep.mubr.bf16.mxu1 %v13523_v6  ;;  %v5020_v19 = vrot.slane %v5019_v8, 4  ;;  %v11748_v25 = vcombine.low %v4991_v16, %v5001_v17  ;;  %v5080_v2 = vrot.slane %v5078_v58, 5  ;;  %v5086_v3 = vrot.slane %v5084_v59, 5  ;;  %v11797_v58 = vld [vmem:[%s13615_s5 + $0x34] sm:$0xf] }
 0x246   : > { %v4970_v22 = vrot.slane %v4968_v14, 4  ;;  %v5036_v14 = vshll.u32 %v11728_v1, 16 }
 0x248   : > { %v4971_v32 = vor.u32 %v4970_v22, %v4966_v52  ;;  %v5029_v52 = vrot.slane %v5027_v12, 4  ;;  %v5032_v22 = vrot.slane %v5030_v13, 5  ;;  %v5038_v23 = vrot.slane %v5036_v14, 5 }
 0x249   : > { %v5094_v14 = vshll.u32 %v11735_v7, 16 }
 0x24a   : > { %v4972_v41 = vrot.slane %v4971_v32, 4  ;;  %v5015_v32 = vsel %vm13724_vm4, %v5010_v18, %v5014_v60  ;;  %v5033_v34 = vor.u32 %v5032_v22, %v5029_v52  ;;  %v5088_v60 = vshrl.u32 %v11734_v49, 16 }
 0x24b   : > { %v5096_v18 = vrot.slane %v5094_v14, 5 }
 0x24c   : > { %11760 = vmatmul.mubr.msk.bf16.gmra.mrb[24].mxu0 %vm557_vm1, %v11743_v40  ;;  %11777 = vmatmul.mubr.msk.bf16.gmra.mrb[24].mxu1 %vm557_vm1, %v11743_v40  ;;  %v11746_v40 = vcombine.low %v4943_v26, %v4953_v28  ;;  %v4977_v54 = vsel %vm13724_vm4, %v4972_v41, %v4976_v50  ;;  %v11729_v26 = vld [vmem:[%s13615_s5 + $0xb0] sm:$0x1]  ;;  %v11730_v28 = vld [vmem:[%s13615_s5 + $0xb4] sm:$0xf]  ;;  %v5034_v41 = vrot.slane %v5033_v34, 4  ;;  %v5090_v4 = vrot.slane %v5088_v60, 4 }
 0x24d   : > { %5456 = vmatprep.mubr.bf16.mxu0 %v13523_v6  ;;  %5649 = vmatprep.mubr.bf16.mxu1 %v13523_v6  ;;  %v11747_v63 = vcombine.low %v4967_v53, %v4977_v54  ;;  %v5046_v36 = vshll.u32 %v11729_v26, 16  ;;  %v5051_v37 = vshrl.u32 %v11730_v28, 16  ;;  %v5054_v38 = vshll.u32 %v11730_v28, 16 }
 0x24e   : > { %v5039_v51 = vsel %vm13724_vm4, %v5034_v41, %v5038_v23  ;;  %v5091_v13 = vor.u32 %v5090_v4, %v5086_v3  ;;  %v7412_v41 = vsel %vm606_vm0, %v14248_v44, 0  ;;  %v11800_v4 = vld [vmem:[%s13615_s5 + $0x40] sm:$0xf] }
 0x24f   : > { %v5048_v42 = vrot.slane %v5046_v36, 5  ;;  %v5053_v43 = vrot.slane %v5051_v37, 4  ;;  %v5056_v27 = vrot.slane %v5054_v38, 5  ;;  %v11792_v37 = vld [vmem:[%s13615_s5 + $0x20] sm:$0x1] }
 0x250   : > { %v5092_v17 = vrot.slane %v5091_v13, 4  ;;  %v11801_v13 = vld [vmem:[%s13615_s5 + $0x44] sm:$0x1] }
 0x251   : > { %v5057_v54 = vor.u32 %v5056_v27, %v5053_v43  ;;  %v12033_v27 = vld [vmem:[%s15327_s1 + $0x38] sm:$0xff] }
 0x252   : > { %v5097_v52 = vsel %vm13724_vm4, %v5092_v17, %v5096_v18  ;;  %v6125_v17 = vrot.slane %v11801_v13, 5  ;;  %v11803_v18 = vld [vmem:[%s13615_s5 + $0x4c] sm:$0xf] }
 0x254   : > { %11761 = vmatmul.mubr.msk.bf16.gmra.mrb[28].mxu0 %vm557_vm1, %v11744_v62  ;;  %11778 = vmatmul.mubr.msk.bf16.gmra.mrb[28].mxu1 %vm557_vm1, %v11744_v62  ;;  %v11726_v62 = vld [vmem:[%s13615_s5 + $0xa4] sm:$0x1] }
 0x255   : > { %5466 = vmatprep.mubr.bf16.mxu0 %v13523_v6  ;;  %5659 = vmatprep.mubr.bf16.mxu1 %v13523_v6  ;;  %v5022_v11 = vshll.u32 %v11726_v62, 16  ;;  %v5058_v62 = vrot.slane %v5057_v54, 4  ;;  %v11837_v54 = vrot.slane %v11793_v45, 9 }
 0x257   : > { %v5024_v21 = vrot.slane %v5022_v11, 5  ;;  %v5063_v8 = vsel %vm13724_vm4, %v5058_v62, %v5062_v47  ;;  %v11796_v62 = vld [vmem:[%s13615_s5 + $0x30] sm:$0xe] }
 0x259   : > { %v5025_v33 = vsel %vm13724_vm4, %v5020_v19, %v5024_v21  ;;  %v11788_v19 = vld [vmem:[%s13615_s5 + $0x10] sm:$0xf] }
 0x25a   : > { %v11749_v20 = vcombine.low %v5015_v32, %v5025_v33  ;;  %v6094_v22 = vrot.slane %v11788_v19, 5  ;;  %v11791_v32 = vld [vmem:[%s13615_s5 + $0x1c] sm:$0xf] }
 0x25b   : > { %v6101_v36 = vrot.slane %v11791_v32, 5 }
 0x25c   : > { %11762 = vmatmul.mubr.msk.bf16.gmra.mrb[32].mxu0 %vm557_vm1, %v11745_v15  ;;  %11779 = vmatmul.mubr.msk.bf16.gmra.mrb[32].mxu1 %vm557_vm1, %v11745_v15  ;;  %v5040_v15 = vshrl.u32 %v11728_v1, 16  ;;  %v5077_v1 = vrot.slane %v5075_v57, 4  ;;  %v6096_v28 = vrot.slane %v6094_v22, 4 }
 0x25d   : > { %5476 = vmatprep.mubr.bf16.mxu0 %v13523_v6  ;;  %5669 = vmatprep.mubr.bf16.mxu1 %v13523_v6 }
 0x25e   : > { %v5042_v24 = vrot.slane %v5040_v15, 4  ;;  %v5081_v12 = vor.u32 %v5080_v2, %v5077_v1  ;;  %v11838_v1 = vrot.slane %v11796_v62, 9 }
 0x260   : > { %v5043_v35 = vor.u32 %v5042_v24, %v5038_v23  ;;  %v5082_v16 = vrot.slane %v5081_v12, 4  ;;  %v11787_v23 = vld [vmem:[%s13615_s5 + $0xc] sm:$0xe]  ;;  %v11789_v24 = vld [vmem:[%s13615_s5 + $0x14] sm:$0x1] }
 0x261   : > { %v11835_v26 = vrot.slane %v11787_v23, 9  ;;  %v11799_v12 = vld [vmem:[%s13615_s5 + $0x3c] sm:$0xe]  ;;  %v11804_v23 = vld [vmem:[%s13615_s5 + $0x50] sm:$0x1] }
 0x262   : > { %v5044_v50 = vrot.slane %v5043_v35, 4  ;;  %v5087_v21 = vsel %vm13724_vm4, %v5082_v16, %v5086_v3  ;;  %v11790_v35 = vld [vmem:[%s13615_s5 + $0x18] sm:$0xe] }
 0x263   : > { %v6095_v33 = vsel %vm13920_vm7, %v11835_v26, %v6094_v22  ;;  %v11836_v39 = vrot.slane %v11790_v35, 9  ;;  %v11802_v22 = vld [vmem:[%s13615_s5 + $0x48] sm:$0xe]  ;;  %v11805_v35 = vld [vmem:[%s13615_s5 + $0x54] sm:$0xe] }
 0x264   : > { %11763 = vmatmul.mubr.msk.bf16.gmra.mrb[36].mxu0 %vm557_vm1, %v11746_v40  ;;  %11780 = vmatmul.mubr.msk.bf16.gmra.mrb[36].mxu1 %vm557_vm1, %v11746_v40  ;;  %v5064_v40 = vshrl.u32 %v11731_v31, 16  ;;  %v5049_v53 = vsel %vm13724_vm4, %v5044_v50, %v5048_v42  ;;  %v6097_v31 = vrot.slane %v11789_v24, 5  ;;  %v7418_v50 = vsel %vm606_vm0, %v14257_v48, 0  ;;  %v11794_v42 = vld [vmem:[%s13615_s5 + $0x28] sm:$0xf] }
 0x265   : > { %5486 = vmatprep.mubr.bf16.mxu0 %v13523_v6  ;;  %5679 = vmatprep.mubr.bf16.mxu1 %v13523_v6  ;;  %v11750_v61 = vcombine.low %v5039_v51, %v5049_v53  ;;  %v6102_v43 = vsel %vm13920_vm7, %v11836_v39, %v6101_v36  ;;  %v14439_v48 = vrot.slane %v12033_v27, %v13608_v10 }
 0x266   : > { %v5066_v30 = vrot.slane %v5064_v40, 4  ;;  %v6098_v34 = vsel %vm13920_vm7, %v6096_v28, %v6097_v31  ;;  %v6103_v40 = vrot.slane %v6101_v36, 4  ;;  %v6132_v28 = vrot.slane %v11804_v23, 5  ;;  %v11806_v31 = vld [vmem:[%s13615_s5 + $0x58] sm:$0xf] }
 0x267   : > { %v11852_v38 = vcombine.low %v6095_v33, %v6098_v34  ;;  %v8691_v49 = vcombine.high %v14439_v48, %v14439_v48  ;;  %v6136_v34 = vrot.slane %v11806_v31, 5  ;;  %v11807_v36 = vld [vmem:[%s13615_s5 + $0x5c] sm:$0x1] }
 0x268   : > { %v5067_v55 = vor.u32 %v5066_v30, %v5062_v47  ;;  %v6108_v47 = vrot.slane %v11794_v42, 5  ;;  %v8676_v30 = vcombine.high %v12033_v27, %v12033_v27  ;;  %v11810_v27 = vld [vmem:[%s13615_s5 + $0x68] sm:$0x1] }
 0x269   : > { %v6138_v39 = vrot.slane %v6136_v34, 4  ;;  %v6146_v45 = vrot.slane %v11810_v27, 5 }
 0x26a   : > { %v14448_v51 = vrot.slane %v8676_v30, %v13608_v10  ;;  %v6109_v59 = vsel %vm13920_vm7, %v11837_v54, %v6108_v47  ;;  %v6150_v54 = vrot.slane %v11812_v46, 5 }
 0x26c   : > { %11764 = vmatmul.mubr.msk.bf16.gmra.mrb[40].mxu0 %vm557_vm1, %v11747_v63  ;;  %11781 = vmatmul.mubr.msk.bf16.gmra.mrb[40].mxu1 %vm557_vm1, %v11747_v63  ;;  %v5068_v63 = vrot.slane %v5067_v55, 4  ;;  %v6110_v55 = vrot.slane %v6108_v47, 4  ;;  %v8692_v57 = vcombine.high %v14448_v51, %v14448_v51 }
 0x26d   : > { %5496 = vmatprep.mubr.bf16.mxu0 %v13523_v6  ;;  %5689 = vmatprep.mubr.bf16.mxu1 %v13523_v6 }
 0x26e   : > { %v5073_v11 = vsel %vm13724_vm4, %v5068_v63, %v5072_v0  ;;  %v6112_v60 = vsel %vm13920_vm7, %v6110_v55, %v6111_v56  ;;  %v11798_v63 = vld [vmem:[%s13615_s5 + $0x38] sm:$0x1]  ;;  %v11811_v55 = vld [vmem:[%s13615_s5 + $0x6c] sm:$0xe]  ;;  %v11813_v56 = vld [vmem:[%s13615_s5 + $0x74] sm:$0x1] }
 0x26f   : > { %v11751_v15 = vcombine.low %v5063_v8, %v5073_v11  ;;  %v11854_v0 = vcombine.low %v6109_v59, %v6112_v60  ;;  %v6118_v3 = vrot.slane %v11798_v63, 5  ;;  %v6122_v11 = vrot.slane %v11800_v4, 5 }
 0x270   : > { %v6152_v59 = vrot.slane %v6150_v54, 4  ;;  %v6153_v60 = vrot.slane %v11813_v56, 5 }
 0x271   : > { %v6124_v16 = vrot.slane %v6122_v11, 4 }
 0x272   : > { %v6154_v63 = vsel %vm13920_vm7, %v6152_v59, %v6153_v60  ;;  %v11831_v59 = vld [vmem:[%s13615_s5 + $0xbc] sm:$0x1] }
 0x274   : > { %11765 = vmatmul.mubr.msk.bf16.gmra.mrb[44].mxu0 %vm557_vm1, %v11748_v25  ;;  %11782 = vmatmul.mubr.msk.bf16.gmra.mrb[44].mxu1 %vm557_vm1, %v11748_v25  ;;  %v11752_v25 = vcombine.low %v5087_v21, %v5097_v52  ;;  %v6126_v21 = vsel %vm13920_vm7, %v6124_v16, %v6125_v17  ;;  %v6129_v52 = vrot.slane %v11803_v18, 5  ;;  %v11819_v16 = vld [vmem:[%s13615_s5 + $0x8c] sm:$0x1] }
 0x275   : > { %5506 = vmatprep.mubr.bf16.mxu0 %v13523_v6  ;;  %5699 = vmatprep.mubr.bf16.mxu1 %v13523_v6 }
 0x276   : > { %v6131_v26 = vrot.slane %v6129_v52, 4 }
 0x278   : > { %v6133_v33 = vsel %vm13920_vm7, %v6131_v26, %v6132_v28  ;;  %v11822_v26 = vld [vmem:[%s13615_s5 + $0x98] sm:$0x1] }
 0x27c   : > { %11766 = vmatmul.mubr.msk.bf16.gmra.mrb[48].mxu0 %vm557_vm1, %v11749_v20  ;;  %11783 = vmatmul.mubr.msk.bf16.gmra.mrb[48].mxu1 %vm557_vm1, %v11749_v20  ;;  %v6104_v20 = vrot.slane %v11792_v37, 5 }
 0x27d   : > { %5516 = vmatprep.mubr.bf16.mxu0 %v13523_v6  ;;  %5709 = vmatprep.mubr.bf16.mxu1 %v13523_v6 }
 0x27e   : > { %v6105_v44 = vsel %vm13920_vm7, %v6103_v40, %v6104_v20  ;;  %v6139_v40 = vrot.slane %v11807_v36, 5  ;;  %v11809_v20 = vld [vmem:[%s13615_s5 + $0x64] sm:$0xf] }
 0x27f   : > { %v11853_v53 = vcombine.low %v6102_v43, %v6105_v44  ;;  %v6143_v42 = vrot.slane %v11809_v20, 5  ;;  %v11808_v43 = vld [vmem:[%s13615_s5 + $0x60] sm:$0xe] }
 0x280   : > { %v11842_v47 = vrot.slane %v11808_v43, 9 }
 0x281   : > { %v6145_v30 = vrot.slane %v6143_v42, 4 }
 0x284   : > { %11767 = vmatmul.mubr.msk.bf16.gmra.mrb[52].mxu0 %vm557_vm1, %v11750_v61  ;;  %11784 = vmatmul.mubr.msk.bf16.gmra.mrb[52].mxu1 %vm557_vm1, %v11750_v61  ;;  %v6115_v61 = vrot.slane %v11797_v58, 5  ;;  %v11843_v58 = vrot.slane %v11811_v55, 9 }
 0x285   : > { %5526 = vmatprep.mubr.bf16.mxu0 %v13523_v6  ;;  %5719 = vmatprep.mubr.bf16.mxu1 %v13523_v6 }
 0x286   : > { %v6117_v2 = vrot.slane %v6115_v61, 4  ;;  %v6116_v7 = vsel %vm13920_vm7, %v11838_v1, %v6115_v61  ;;  %v11815_v61 = vld [vmem:[%s13615_s5 + $0x7c] sm:$0xf]  ;;  %v6151_v62 = vsel %vm13920_vm7, %v11843_v58, %v6150_v54  ;;  %v11814_v1 = vld [vmem:[%s13615_s5 + $0x78] sm:$0xe] }
 0x287   : > { %v11844_v4 = vrot.slane %v11814_v1, 9  ;;  %v11830_v54 = vld [vmem:[%s13615_s5 + $0xb8] sm:$0xf]  ;;  %v11829_v58 = vld [vmem:[%s13615_s5 + $0xb4] sm:$0xe] }
 0x288   : > { %v6119_v8 = vsel %vm13920_vm7, %v6117_v2, %v6118_v3  ;;  %v11816_v2 = vld [vmem:[%s13615_s5 + $0x80] sm:$0x1]  ;;  %v11860_v3 = vcombine.low %v6151_v62, %v6154_v63  ;;  %v6195_v63 = vrot.slane %v11831_v59, 5 }
 0x289   : > { %v11855_v14 = vcombine.low %v6116_v7, %v6119_v8  ;;  %v6160_v8 = vrot.slane %v11816_v2, 5 }
 0x28c   : > { %11768 = vmatmul.mubr.msk.bf16.gmra.mrb[56].mxu0 %vm557_vm1, %v11751_v15  ;;  %11785 = vmatmul.mubr.msk.bf16.gmra.mrb[56].mxu1 %vm557_vm1, %v11751_v15  ;;  %v11839_v15 = vrot.slane %v11799_v12, 9 }
 0x28d   : > { %5536 = vmatprep.mubr.bf16.mxu0 %v13523_v6  ;;  %5729 = vmatprep.mubr.bf16.mxu1 %v13523_v6 }
 0x28e   : > { %v6123_v19 = vsel %vm13920_vm7, %v11839_v15, %v6122_v11  ;;  %v11818_v11 = vld [vmem:[%s13615_s5 + $0x88] sm:$0xf]  ;;  %v11817_v15 = vld [vmem:[%s13615_s5 + $0x84] sm:$0xe] }
 0x28f   : > { %v11856_v24 = vcombine.low %v6123_v19, %v6126_v21  ;;  %v11845_v18 = vrot.slane %v11817_v15, 9  ;;  %v6167_v21 = vrot.slane %v11819_v16, 5 }
 0x294   : > { %11769 = vmatmul.mubr.msk.bf16.gmra.mrb[60].mxu0 %vm557_vm1, %v11752_v25  ;;  %11786 = vmatmul.mubr.msk.bf16.gmra.mrb[60].mxu1 %vm557_vm1, %v11752_v25  ;;  %v11840_v25 = vrot.slane %v11802_v22, 9 }
 0x295   : > { %6492 = vmatprep.mubr.bf16.mxu0 %v13523_v6  ;;  %6685 = vmatprep.mubr.bf16.mxu1 %v13523_v6 }
 0x296   : > { %v6130_v32 = vsel %vm13920_vm7, %v11840_v25, %v6129_v52  ;;  %v11821_v52 = vld [vmem:[%s13615_s5 + $0x94] sm:$0xf]  ;;  %v11820_v25 = vld [vmem:[%s13615_s5 + $0x90] sm:$0xe] }
 0x297   : > { %v11857_v37 = vcombine.low %v6130_v32, %v6133_v33  ;;  %v11846_v31 = vrot.slane %v11820_v25, 9  ;;  %v6174_v33 = vrot.slane %v11822_v26, 5  ;;  %v13444_v25 = vld [vmem:[%s13615_s5 + $0x3c] sm:$0xff]   ;;  %v13445_v26 = vld [vmem:[%s13615_s5 + $0x48] sm:$0xff]  }
 0x29c   : > { %11869 = vmatmul.mubr.msk.bf16.vlgmr.msra.gmra.mrb[0].mxu0 %vm557_vm1, %v11852_v38  ;;  %11886 = vmatmul.mubr.msk.bf16.vlgmr.msra.gmra.mrb[0].mxu1 %vm557_vm1, %v11852_v38  ;;  %v11841_v38 = vrot.slane %v11805_v35, 9 }
 0x29d   : > { %7424 = vmatpush1.bf16.msra.mxu0 %v7412_v41  ;;  %7617 = vmatpush1.bf16.msra.mxu1 %v7418_v50  ;;  %v6140_v50 = vsel %vm13920_vm7, %v6138_v39, %v6139_v40  ;;  %v11825_v39 = vld [vmem:[%s13615_s5 + $0xa4] sm:$0x1] }
 0x29e   : > { %6502 = vmatprep.mubr.bf16.mxu0 %v13523_v6  ;;  %6695 = vmatprep.mubr.bf16.mxu1 %v13523_v6  ;;  %v6137_v41 = vsel %vm13920_vm7, %v11841_v38, %v6136_v34  ;;  %v11824_v34 = vld [vmem:[%s13615_s5 + $0xa0] sm:$0xf]  ;;  %v11823_v38 = vld [vmem:[%s13615_s5 + $0x9c] sm:$0xe] }
 0x29f   : > { %12050 = vmatprep.subr.msk.bf16.mxu0 %vm606_vm0, %v8691_v49  ;;  %12067 = vmatprep.subr.msk.bf16.mxu1 %vm606_vm0, %v8692_v57  ;;  %v11858_v44 = vcombine.low %v6137_v41, %v6140_v50  ;;  %v6144_v49 = vsel %vm13920_vm7, %v11842_v47, %v6143_v42  ;;  %v11847_v20 = vrot.slane %v11823_v38, 9  ;;  %v6181_v50 = vrot.slane %v11825_v39, 5  ;;  %v11827_v42 = vld [vmem:[%s13615_s5 + $0xac] sm:$0xf]  ;;  %v11826_v47 = vld [vmem:[%s13615_s5 + $0xa8] sm:$0xe] }
 0x2a0   : > { %v11848_v46 = vrot.slane %v11826_v47, 9  ;;  %v11985_v38 = vld [vmem:[%s13615_s5 + $0x18] sm:$0xf]  ;;  %v11986_v39 = vld [vmem:[%s13615_s5 + $0x1c] sm:$0xf] }
 0x2a4   : > { %11870 = vmatmul.mubr.msk.bf16.gmra.mrb[4].mxu0 %vm557_vm1, %v11853_v53  ;;  %11887 = vmatmul.mubr.msk.bf16.gmra.mrb[4].mxu1 %vm557_vm1, %v11853_v53  ;;  %v6147_v53 = vsel %vm13920_vm7, %v6145_v30, %v6146_v45  ;;  %v11828_v30 = vld [vmem:[%s13615_s5 + $0xb0] sm:$0x1] }
 0x2a5   : > { %6512 = vmatprep.mubr.bf16.mxu0 %v13523_v6  ;;  %6705 = vmatprep.mubr.bf16.mxu1 %v13523_v6  ;;  %v11859_v57 = vcombine.low %v6144_v49, %v6147_v53  ;;  %v6188_v53 = vrot.slane %v11828_v30, 5  ;;  %v11987_v30 = vld [vmem:[%s13615_s5 + $0x20] sm:$0x1] }
 0x2ac   : > { %11871 = vmatmul.mubr.msk.bf16.gmra.mrb[8].mxu0 %vm557_vm1, %v11854_v0  ;;  %11888 = vmatmul.mubr.msk.bf16.gmra.mrb[8].mxu1 %vm557_vm1, %v11854_v0  ;;  %v6157_v0 = vrot.slane %v11815_v61, 5  ;;  %v11849_v61 = vrot.slane %v11829_v58, 9 }
 0x2ad   : > { %6522 = vmatprep.mubr.bf16.mxu0 %v13523_v6  ;;  %6715 = vmatprep.mubr.bf16.mxu1 %v13523_v6 }
 0x2ae   : > { %v6159_v7 = vrot.slane %v6157_v0, 4  ;;  %v6158_v12 = vsel %vm13920_vm7, %v11844_v4, %v6157_v0  ;;  %v11833_v0 = vld [vmem:[%s13615_s5 + $0xc4] sm:$0xf]  ;;  %v11832_v4 = vld [vmem:[%s13615_s5 + $0xc0] sm:$0xe] }
 0x2b0   : > { %v6161_v13 = vsel %vm13920_vm7, %v6159_v7, %v6160_v8  ;;  %v11834_v7 = vld [vmem:[%s13615_s5 + $0xc8] sm:$0x1] }
 0x2b1   : > { %v11861_v17 = vcombine.low %v6158_v12, %v6161_v13  ;;  %v6202_v13 = vrot.slane %v11834_v7, 5  ;;  %v11991_v7 = vld [vmem:[%s13615_s5 + $0x30] sm:$0xf] }
 0x2b4   : > { %11872 = vmatmul.mubr.msk.bf16.gmra.mrb[12].mxu0 %vm557_vm1, %v11855_v14  ;;  %11889 = vmatmul.mubr.msk.bf16.gmra.mrb[12].mxu1 %vm557_vm1, %v11855_v14  ;;  %v6164_v14 = vrot.slane %v11818_v11, 5  ;;  %v11850_v11 = vrot.slane %v11832_v4, 9  ;;  %v11990_v4 = vld [vmem:[%s13615_s5 + $0x2c] sm:$0x1] }
 0x2b5   : > { %6532 = vmatprep.mubr.bf16.mxu0 %v13523_v6  ;;  %6725 = vmatprep.mubr.bf16.mxu1 %v13523_v6 }
 0x2b6   : > { %v6166_v19 = vrot.slane %v6164_v14, 4  ;;  %v6165_v22 = vsel %vm13920_vm7, %v11845_v18, %v6164_v14  ;;  %v8742_v18 = vsel %vm606_vm0, %v14439_v48, 0 }
 0x2b8   : > { %v6168_v23 = vsel %vm13920_vm7, %v6166_v19, %v6167_v21  ;;  %v8748_v19 = vsel %vm606_vm0, %v14448_v51, 0  ;;  %v12148_v21 = vld [vmem:[%s15327_s1 + $0x40] sm:$0xff] }
 0x2b9   : > { %v11862_v28 = vcombine.low %v6165_v22, %v6168_v23  ;;  %v9782_v22 = vcombine.high %v12148_v21, %v12148_v21  ;;  %v13442_v23 = vld [vmem:[%s13615_s5 + $0x24] sm:$0xff]  }
 0x2bb   : > { %v14627_v51 = vrot.slane %v9782_v22, %v13608_v10 }
 0x2bc   : > { %11873 = vmatmul.mubr.msk.bf16.gmra.mrb[16].mxu0 %vm557_vm1, %v11856_v24  ;;  %11890 = vmatmul.mubr.msk.bf16.gmra.mrb[16].mxu1 %vm557_vm1, %v11856_v24  ;;  %v6171_v24 = vrot.slane %v11821_v52, 5  ;;  %v14620_v52 = vrot.slane %v12148_v21, %v13608_v10  ;;  %v13443_v10 = vld [vmem:[%s13615_s5 + $0x30] sm:$0xff]  }
 0x2bd   : > { %6542 = vmatprep.mubr.bf16.mxu0 %v13523_v6  ;;  %6735 = vmatprep.mubr.bf16.mxu1 %v13523_v6 }
 0x2be   : > { %v6173_v32 = vrot.slane %v6171_v24, 4  ;;  %v6172_v35 = vsel %vm13920_vm7, %v11846_v31, %v6171_v24  ;;  %v9797_v48 = vcombine.high %v14620_v52, %v14620_v52  ;;  %v9798_v24 = vcombine.high %v14627_v51, %v14627_v51  ;;  %v13447_v31 = vld [vmem:[%s13615_s5 + $0x60] sm:$0xff]  }
 0x2c0   : > { %v6175_v36 = vsel %vm13920_vm7, %v6173_v32, %v6174_v33  ;;  %v13448_v32 = vld [vmem:[%s13615_s5 + $0x6c] sm:$0xff]   ;;  %v13449_v33 = vld [vmem:[%s13615_s5 + $0x78] sm:$0xff]  }
 0x2c1   : > { %v11863_v40 = vcombine.low %v6172_v35, %v6175_v36  ;;  %v13451_v35 = vld [vmem:[%s13615_s5 + $0x90] sm:$0xff]   ;;  %v13452_v36 = vld [vmem:[%s13615_s5 + $0x9c] sm:$0xff]  }
 0x2c4   : > { %11874 = vmatmul.mubr.msk.bf16.gmra.mrb[20].mxu0 %vm557_vm1, %v11857_v37  ;;  %11891 = vmatmul.mubr.msk.bf16.gmra.mrb[20].mxu1 %vm557_vm1, %v11857_v37  ;;  %v6178_v37 = vrot.slane %v11824_v34, 5  ;;  %v13450_v34 = vld [vmem:[%s13615_s5 + $0x84] sm:$0xff]  }
 0x2c5   : > { %6552 = vmatprep.mubr.bf16.mxu0 %v13523_v6  ;;  %6745 = vmatprep.mubr.bf16.mxu1 %v13523_v6 }
 0x2c6   : > { %v6180_v41 = vrot.slane %v6178_v37, 4  ;;  %v6179_v43 = vsel %vm13920_vm7, %v11847_v20, %v6178_v37  ;;  %v13453_v37 = vld [vmem:[%s13615_s5 + $0xa8] sm:$0xff]   ;;  %v8114_v20 = vshrl.u32 %v11985_v38, 16 }
 0x2c8   : > { %v6182_v27 = vsel %vm13920_vm7, %v6180_v41, %v6181_v50  ;;  %v8117_v41 = vshll.u32 %v11985_v38, 16  ;;  %v8123_v50 = vshll.u32 %v11986_v39, 16 }
 0x2c9   : > { %v11864_v45 = vcombine.low %v6179_v43, %v6182_v27  ;;  %v8116_v43 = vrot.slane %v8114_v20, 4 }
 0x2ca   : > { %v8119_v27 = vrot.slane %v8117_v41, 5  ;;  %v11997_v41 = vld [vmem:[%s13615_s5 + $0x48] sm:$0xf] }
 0x2cc   : > { %11875 = vmatmul.mubr.msk.bf16.gmra.mrb[24].mxu0 %vm557_vm1, %v11858_v44  ;;  %11892 = vmatmul.mubr.msk.bf16.gmra.mrb[24].mxu1 %vm557_vm1, %v11858_v44  ;;  %v6185_v44 = vrot.slane %v11827_v42, 5  ;;  %v8127_v42 = vshrl.u32 %v11986_v39, 16 }
 0x2cd   : > { %6562 = vmatprep.mubr.bf16.mxu0 %v13523_v6  ;;  %6755 = vmatprep.mubr.bf16.mxu1 %v13523_v6 }
 0x2ce   : > { %v6187_v49 = vrot.slane %v6185_v44, 4  ;;  %v6186_v55 = vsel %vm13920_vm7, %v11848_v46, %v6185_v44  ;;  %v8125_v44 = vrot.slane %v8123_v50, 5  ;;  %v8129_v47 = vrot.slane %v8127_v42, 4  ;;  %v11988_v46 = vld [vmem:[%s13615_s5 + $0x24] sm:$0xf] }
 0x2cf   : > { %v11998_v50 = vld [vmem:[%s13615_s5 + $0x4c] sm:$0xf] }
 0x2d0   : > { %v6189_v56 = vsel %vm13920_vm7, %v6187_v49, %v6188_v53  ;;  %v11989_v49 = vld [vmem:[%s13615_s5 + $0x28] sm:$0xf]  ;;  %v8120_v53 = vor.u32 %v8119_v27, %v8116_v43 }
 0x2d1   : > { %v11865_v60 = vcombine.low %v6186_v55, %v6189_v56  ;;  %v8133_v55 = vshll.u32 %v11987_v30, 16  ;;  %v8138_v56 = vshrl.u32 %v11988_v46, 16  ;;  %v8147_v58 = vshll.u32 %v11989_v49, 16 }
 0x2d2   : > { %v8151_v59 = vshrl.u32 %v11989_v49, 16  ;;  %v11996_v49 = vld [vmem:[%s13615_s5 + $0x44] sm:$0x1] }
 0x2d4   : > { %11876 = vmatmul.mubr.msk.bf16.gmra.mrb[28].mxu0 %vm557_vm1, %v11859_v57  ;;  %11893 = vmatmul.mubr.msk.bf16.gmra.mrb[28].mxu1 %vm557_vm1, %v11859_v57  ;;  %v6192_v57 = vrot.slane %v11830_v54, 5  ;;  %v8130_v54 = vor.u32 %v8129_v47, %v8125_v44 }
 0x2d5   : > { %6572 = vmatprep.mubr.bf16.mxu0 %v13523_v6  ;;  %6765 = vmatprep.mubr.bf16.mxu1 %v13523_v6 }
 0x2d6   : > { %v6194_v62 = vrot.slane %v6192_v57, 4  ;;  %v6193_v1 = vsel %vm13920_vm7, %v11849_v61, %v6192_v57  ;;  %v8141_v57 = vshll.u32 %v11988_v46, 16  ;;  %v8131_v61 = vrot.slane %v8130_v54, 4 }
 0x2d7   : > { %v8213_v54 = vshll.u32 %v11997_v41, 16 }
 0x2d8   : > { %v6196_v2 = vsel %vm13920_vm7, %v6194_v62, %v6195_v63  ;;  %v8135_v62 = vrot.slane %v8133_v55, 5  ;;  %v8140_v63 = vrot.slane %v8138_v56, 4  ;;  %v8219_v55 = vshll.u32 %v11998_v50, 16 }
 0x2d9   : > { %v11866_v8 = vcombine.low %v6193_v1, %v6196_v2  ;;  %v8149_v1 = vrot.slane %v8147_v58, 5  ;;  %v8153_v2 = vrot.slane %v8151_v59, 4  ;;  %v8223_v56 = vshrl.u32 %v11998_v50, 16 }
 0x2dc   : > { %11877 = vmatmul.mubr.msk.bf16.gmra.mrb[32].mxu0 %vm557_vm1, %v11860_v3  ;;  %11894 = vmatmul.mubr.msk.bf16.gmra.mrb[32].mxu1 %vm557_vm1, %v11860_v3  ;;  %v6199_v3 = vrot.slane %v11833_v0, 5  ;;  %v8143_v0 = vrot.slane %v8141_v57, 5 }
 0x2dd   : > { %6582 = vmatprep.mubr.bf16.mxu0 %v13523_v6  ;;  %6775 = vmatprep.mubr.bf16.mxu1 %v13523_v6 }
 0x2de   : > { %v6201_v12 = vrot.slane %v6199_v3, 4  ;;  %v6200_v14 = vsel %vm13920_vm7, %v11850_v11, %v6199_v3  ;;  %v13456_v3 = vld [vmem:[%s13615_s5 + $0xcc] sm:$0xff]  }
 0x2e0   : > { %v6203_v15 = vsel %vm13920_vm7, %v6201_v12, %v6202_v13  ;;  %v8136_v12 = vsel %vm13724_vm4, %v8131_v61, %v8135_v62  ;;  %v8144_v13 = vor.u32 %v8143_v0, %v8140_v63  ;;  %v8205_v61 = vshll.u32 %v11996_v49, 16  ;;  %v12007_v49 = vld [vmem:[%s13615_s5 + $0x70] sm:$0xf] }
 0x2e1   : > { %v11867_v16 = vcombine.low %v6200_v14, %v6203_v15  ;;  %v8154_v14 = vor.u32 %v8153_v2, %v8149_v1  ;;  %v8157_v15 = vshll.u32 %v11990_v4, 16  ;;  %v8215_v63 = vrot.slane %v8213_v54, 5  ;;  %v11999_v2 = vld [vmem:[%s13615_s5 + $0x50] sm:$0x1]  ;;  %v12000_v4 = vld [vmem:[%s13615_s5 + $0x54] sm:$0xf] }
 0x2e2   : > { %v8145_v22 = vrot.slane %v8144_v13, 4  ;;  %v8221_v0 = vrot.slane %v8219_v55, 5 }
 0x2e4   : > { %11878 = vmatmul.mubr.msk.bf16.gmra.mrb[36].mxu0 %vm557_vm1, %v11861_v17  ;;  %11895 = vmatmul.mubr.msk.bf16.gmra.mrb[36].mxu1 %vm557_vm1, %v11861_v17  ;;  %v13440_v17 = vld [vmem:[%s13615_s5 + $0x18] sm:$0xff]  }
 0x2e5   : > { %6592 = vmatprep.mubr.bf16.mxu0 %v13523_v6  ;;  %6785 = vmatprep.mubr.bf16.mxu1 %v13523_v6 }
 0x2ec   : > { %11879 = vmatmul.mubr.msk.bf16.gmra.mrb[40].mxu0 %vm557_vm1, %v11862_v28  ;;  %11896 = vmatmul.mubr.msk.bf16.gmra.mrb[40].mxu1 %vm557_vm1, %v11862_v28  ;;  %v13446_v28 = vld [vmem:[%s13615_s5 + $0x54] sm:$0xff]  }
 0x2ed   : > { %6602 = vmatprep.mubr.bf16.mxu0 %v13523_v6  ;;  %6795 = vmatprep.mubr.bf16.mxu1 %v13523_v6 }
 0x2f4   : > { %11880 = vmatmul.mubr.msk.bf16.gmra.mrb[44].mxu0 %vm557_vm1, %v11863_v40  ;;  %11897 = vmatmul.mubr.msk.bf16.gmra.mrb[44].mxu1 %vm557_vm1, %v11863_v40  ;;  %v13454_v40 = vld [vmem:[%s13615_s5 + $0xb4] sm:$0xff]  }
 0x2f5   : > { %6612 = vmatprep.mubr.bf16.mxu0 %v13523_v6  ;;  %6805 = vmatprep.mubr.bf16.mxu1 %v13523_v6 }
 0x2fc   : > { %11881 = vmatmul.mubr.msk.bf16.gmra.mrb[48].mxu0 %vm557_vm1, %v11864_v45  ;;  %11898 = vmatmul.mubr.msk.bf16.gmra.mrb[48].mxu1 %vm557_vm1, %v11864_v45  ;;  %v13455_v45 = vld [vmem:[%s13615_s5 + $0xc0] sm:$0xff]  }
 0x2fd   : > { %6622 = vmatprep.mubr.bf16.mxu0 %v13523_v6  ;;  %6815 = vmatprep.mubr.bf16.mxu1 %v13523_v6 }
 0x304   : > { %11882 = vmatmul.mubr.msk.bf16.gmra.mrb[52].mxu0 %vm557_vm1, %v11865_v60  ;;  %11899 = vmatmul.mubr.msk.bf16.gmra.mrb[52].mxu1 %vm557_vm1, %v11865_v60  ;;  %v8121_v60 = vrot.slane %v8120_v53, 4  ;;  %v8210_v53 = vshrl.u32 %v11997_v41, 16 }
 0x305   : > { %6632 = vmatprep.mubr.bf16.mxu0 %v13523_v6  ;;  %6825 = vmatprep.mubr.bf16.mxu1 %v13523_v6 }
 0x306   : > { %v8126_v11 = vsel %vm13724_vm4, %v8121_v60, %v8125_v44  ;;  %v8212_v62 = vrot.slane %v8210_v53, 4 }
 0x307   : > { %v12034_v21 = vcombine.low %v8126_v11, %v8136_v12  ;;  %v8207_v12 = vrot.slane %v8205_v61, 5  ;;  %v8295_v61 = vshrl.u32 %v12007_v49, 16 }
 0x308   : > { %v8216_v13 = vor.u32 %v8215_v63, %v8212_v62  ;;  %v12009_v62 = vld [vmem:[%s13615_s5 + $0x78] sm:$0xf]  ;;  %v12010_v63 = vld [vmem:[%s13615_s5 + $0x7c] sm:$0xf] }
 0x30c   : > { %11883 = vmatmul.mubr.msk.bf16.gmra.mrb[56].mxu0 %vm557_vm1, %v11866_v8  ;;  %11900 = vmatmul.mubr.msk.bf16.gmra.mrb[56].mxu1 %vm557_vm1, %v11866_v8  ;;  %v11992_v8 = vld [vmem:[%s13615_s5 + $0x34] sm:$0xf] }
 0x30d   : > { %6642 = vmatprep.mubr.bf16.mxu0 %v13523_v6  ;;  %6835 = vmatprep.mubr.bf16.mxu1 %v13523_v6 }
 0x314   : > { %11884 = vmatmul.mubr.msk.bf16.gmra.mrb[60].mxu0 %vm557_vm1, %v11867_v16  ;;  %11901 = vmatmul.mubr.msk.bf16.gmra.mrb[60].mxu1 %vm557_vm1, %v11867_v16  ;;  %v8162_v16 = vshrl.u32 %v11991_v7, 16 }
 0x315   : > { %7455 = vmatprep.mubr.bf16.mxu0 %v13523_v6  ;;  %7648 = vmatprep.mubr.bf16.mxu1 %v13523_v6 }
 0x31c   : > { %11952 = vmatmul.mubr.msk.bf16.vlgmr.msra.gmra.mrb[0].mxu0 %vm557_vm1, %v13440_v17  ;;  %11969 = vmatmul.mubr.msk.bf16.vlgmr.msra.gmra.mrb[0].mxu1 %vm557_vm1, %v13440_v17  ;;  %v8165_v17 = vshll.u32 %v11991_v7, 16  ;;  %v12001_v7 = vld [vmem:[%s13615_s5 + $0x58] sm:$0xf] }
 0x31d   : > { %8754 = vmatpush1.bf16.msra.mxu0 %v8742_v18  ;;  %8947 = vmatpush1.bf16.msra.mxu1 %v8748_v19  ;;  %v8171_v18 = vshll.u32 %v11992_v8, 16  ;;  %v8175_v19 = vshrl.u32 %v11992_v8, 16 }
 0x31e   : > { %7465 = vmatprep.mubr.bf16.mxu0 %v13523_v6  ;;  %7658 = vmatprep.mubr.bf16.mxu1 %v13523_v6 }
 0x31f   : > { %12165 = vmatprep.subr.msk.bf16.mxu0 %vm606_vm0, %v9797_v48  ;;  %12182 = vmatprep.subr.msk.bf16.mxu1 %vm606_vm0, %v9798_v24  ;;  %v8155_v48 = vrot.slane %v8154_v14, 4  ;;  %v8164_v24 = vrot.slane %v8162_v16, 4  ;;  %v8234_v16 = vshrl.u32 %v12000_v4, 16 }
 0x324   : > { %11953 = vmatmul.mubr.msk.bf16.gmra.mrb[4].mxu0 %vm557_vm1, %v13442_v23  ;;  %11970 = vmatmul.mubr.msk.bf16.gmra.mrb[4].mxu1 %vm557_vm1, %v13442_v23  ;;  %v8159_v23 = vrot.slane %v8157_v15, 5  ;;  %v8229_v15 = vshll.u32 %v11999_v2, 16 }
 0x325   : > { %7475 = vmatprep.mubr.bf16.mxu0 %v13523_v6  ;;  %7668 = vmatprep.mubr.bf16.mxu1 %v13523_v6 }
 0x32c   : > { %11954 = vmatmul.mubr.msk.bf16.gmra.mrb[8].mxu0 %vm557_vm1, %v13443_v10  ;;  %11971 = vmatmul.mubr.msk.bf16.gmra.mrb[8].mxu1 %vm557_vm1, %v13443_v10  ;;  %v8167_v10 = vrot.slane %v8165_v17, 5  ;;  %v8237_v17 = vshll.u32 %v12000_v4, 16 }
 0x32d   : > { %7485 = vmatprep.mubr.bf16.mxu0 %v13523_v6  ;;  %7678 = vmatprep.mubr.bf16.mxu1 %v13523_v6 }
 0x334   : > { %11955 = vmatmul.mubr.msk.bf16.gmra.mrb[12].mxu0 %vm557_vm1, %v13444_v25  ;;  %11972 = vmatmul.mubr.msk.bf16.gmra.mrb[12].mxu1 %vm557_vm1, %v13444_v25  ;;  %v8173_v25 = vrot.slane %v8171_v18, 5  ;;  %v8243_v18 = vshll.u32 %v12001_v7, 16 }
 0x335   : > { %7495 = vmatprep.mubr.bf16.mxu0 %v13523_v6  ;;  %7688 = vmatprep.mubr.bf16.mxu1 %v13523_v6 }
 0x33c   : > { %11956 = vmatmul.mubr.msk.bf16.gmra.mrb[16].mxu0 %vm557_vm1, %v13445_v26  ;;  %11973 = vmatmul.mubr.msk.bf16.gmra.mrb[16].mxu1 %vm557_vm1, %v13445_v26  ;;  %v8177_v26 = vrot.slane %v8175_v19, 4  ;;  %v8247_v19 = vshrl.u32 %v12001_v7, 16 }
 0x33d   : > { %7505 = vmatprep.mubr.bf16.mxu0 %v13523_v6  ;;  %7698 = vmatprep.mubr.bf16.mxu1 %v13523_v6 }
 0x33e   : > { %v8178_v38 = vor.u32 %v8177_v26, %v8173_v25  ;;  %v8245_v26 = vrot.slane %v8243_v18, 5 }
 0x340   : > { %v8179_v27 = vrot.slane %v8178_v38, 4 }
 0x344   : > { %11957 = vmatmul.mubr.msk.bf16.gmra.mrb[20].mxu0 %vm557_vm1, %v13446_v28  ;;  %11974 = vmatmul.mubr.msk.bf16.gmra.mrb[20].mxu1 %vm557_vm1, %v13446_v28  ;;  %v11993_v28 = vld [vmem:[%s13615_s5 + $0x38] sm:$0x1] }
 0x345   : > { %7515 = vmatprep.mubr.bf16.mxu0 %v13523_v6  ;;  %7708 = vmatprep.mubr.bf16.mxu1 %v13523_v6 }
 0x34c   : > { %11958 = vmatmul.mubr.msk.bf16.gmra.mrb[24].mxu0 %vm557_vm1, %v13447_v31  ;;  %11975 = vmatmul.mubr.msk.bf16.gmra.mrb[24].mxu1 %vm557_vm1, %v13447_v31  ;;  %v9848_v31 = vsel %vm606_vm0, %v14620_v52, 0  ;;  %v8181_v52 = vshll.u32 %v11993_v28, 16  ;;  %v8249_v28 = vrot.slane %v8247_v19, 4 }
 0x34d   : > { %7525 = vmatprep.mubr.bf16.mxu0 %v13523_v6  ;;  %7718 = vmatprep.mubr.bf16.mxu1 %v13523_v6 }
 0x34e   : > { %v8183_v44 = vrot.slane %v8181_v52, 5  ;;  %v8250_v38 = vor.u32 %v8249_v28, %v8245_v26  ;;  %v12012_v28 = vld [vmem:[%s13615_s5 + $0x84] sm:$0xf] }
 0x350   : > { %v8184_v58 = vsel %vm13724_vm4, %v8179_v27, %v8183_v44 }
 0x354   : > { %11959 = vmatmul.mubr.msk.bf16.gmra.mrb[28].mxu0 %vm557_vm1, %v13448_v32  ;;  %11976 = vmatmul.mubr.msk.bf16.gmra.mrb[28].mxu1 %vm557_vm1, %v13448_v32  ;;  %v9854_v32 = vsel %vm606_vm0, %v14627_v51, 0 }
 0x355   : > { %7535 = vmatprep.mubr.bf16.mxu0 %v13523_v6  ;;  %7728 = vmatprep.mubr.bf16.mxu1 %v13523_v6 }
 0x35c   : > { %11960 = vmatmul.mubr.msk.bf16.gmra.mrb[32].mxu0 %vm557_vm1, %v13449_v33  ;;  %11977 = vmatmul.mubr.msk.bf16.gmra.mrb[32].mxu1 %vm557_vm1, %v13449_v33  ;;  %v11994_v33 = vld [vmem:[%s13615_s5 + $0x3c] sm:$0xf] }
 0x35d   : > { %7545 = vmatprep.mubr.bf16.mxu0 %v13523_v6  ;;  %7738 = vmatprep.mubr.bf16.mxu1 %v13523_v6  ;;  %v8186_v51 = vshrl.u32 %v11994_v33, 16  ;;  %v8189_v39 = vshll.u32 %v11994_v33, 16  ;;  %v12003_v33 = vld [vmem:[%s13615_s5 + $0x60] sm:$0xf] }
 0x35f   : > { %v8188_v47 = vrot.slane %v8186_v51, 4  ;;  %v8191_v30 = vrot.slane %v8189_v39, 5  ;;  %v8258_v51 = vshrl.u32 %v12003_v33, 16  ;;  %v8261_v39 = vshll.u32 %v12003_v33, 16 }
 0x361   : > { %v8192_v59 = vor.u32 %v8191_v30, %v8188_v47  ;;  %v8260_v27 = vrot.slane %v8258_v51, 4  ;;  %v8263_v44 = vrot.slane %v8261_v39, 5 }
 0x363   : > { %v8193_v8 = vrot.slane %v8192_v59, 4  ;;  %v8264_v55 = vor.u32 %v8263_v44, %v8260_v27 }
 0x364   : > { %11961 = vmatmul.mubr.msk.bf16.gmra.mrb[36].mxu0 %vm557_vm1, %v13450_v34  ;;  %11978 = vmatmul.mubr.msk.bf16.gmra.mrb[36].mxu1 %vm557_vm1, %v13450_v34  ;;  %v11995_v34 = vld [vmem:[%s13615_s5 + $0x40] sm:$0xf] }
 0x365   : > { %7555 = vmatprep.mubr.bf16.mxu0 %v13523_v6  ;;  %7748 = vmatprep.mubr.bf16.mxu1 %v13523_v6  ;;  %v8199_v20 = vshrl.u32 %v11995_v34, 16 }
 0x367   : > { %v8201_v46 = vrot.slane %v8199_v20, 4 }
 0x36c   : > { %11962 = vmatmul.mubr.msk.bf16.gmra.mrb[40].mxu0 %vm557_vm1, %v13451_v35  ;;  %11979 = vmatmul.mubr.msk.bf16.gmra.mrb[40].mxu1 %vm557_vm1, %v13451_v35  ;;  %v8150_v35 = vsel %vm13724_vm4, %v8145_v22, %v8149_v1  ;;  %v8225_v1 = vrot.slane %v8223_v56, 4 }
 0x36d   : > { %7565 = vmatprep.mubr.bf16.mxu0 %v13523_v6  ;;  %7758 = vmatprep.mubr.bf16.mxu1 %v13523_v6 }
 0x36e   : > { %v8226_v14 = vor.u32 %v8225_v1, %v8221_v0  ;;  %v8265_v1 = vrot.slane %v8264_v55, 4 }
 0x374   : > { %11963 = vmatmul.mubr.msk.bf16.gmra.mrb[44].mxu0 %vm557_vm1, %v13452_v36  ;;  %11980 = vmatmul.mubr.msk.bf16.gmra.mrb[44].mxu1 %vm557_vm1, %v13452_v36  ;;  %v8160_v36 = vsel %vm13724_vm4, %v8155_v48, %v8159_v23  ;;  %v8217_v48 = vrot.slane %v8216_v13, 4  ;;  %v8227_v23 = vrot.slane %v8226_v14, 4  ;;  %v8306_v13 = vshrl.u32 %v12009_v62, 16 }
 0x375   : > { %7575 = vmatprep.mubr.bf16.mxu0 %v13523_v6  ;;  %7768 = vmatprep.mubr.bf16.mxu1 %v13523_v6  ;;  %v12035_v42 = vcombine.low %v8150_v35, %v8160_v36  ;;  %v8309_v14 = vshll.u32 %v12009_v62, 16 }
 0x376   : > { %v8222_v35 = vsel %vm13724_vm4, %v8217_v48, %v8221_v0  ;;  %v8308_v48 = vrot.slane %v8306_v13, 4 }
 0x37c   : > { %11964 = vmatmul.mubr.msk.bf16.gmra.mrb[48].mxu0 %vm557_vm1, %v13453_v37  ;;  %11981 = vmatmul.mubr.msk.bf16.gmra.mrb[48].mxu1 %vm557_vm1, %v13453_v37  ;;  %v8168_v37 = vor.u32 %v8167_v10, %v8164_v24  ;;  %v8231_v24 = vrot.slane %v8229_v15, 5  ;;  %v8236_v10 = vrot.slane %v8234_v16, 4  ;;  %v8315_v15 = vshll.u32 %v12010_v63, 16 }
 0x37d   : > { %7585 = vmatprep.mubr.bf16.mxu0 %v13523_v6  ;;  %7778 = vmatprep.mubr.bf16.mxu1 %v13523_v6  ;;  %v8319_v16 = vshrl.u32 %v12010_v63, 16 }
 0x37e   : > { %v8169_v43 = vrot.slane %v8168_v37, 4  ;;  %v8232_v36 = vsel %vm13724_vm4, %v8227_v23, %v8231_v24  ;;  %v8311_v23 = vrot.slane %v8309_v14, 5  ;;  %v8317_v24 = vrot.slane %v8315_v15, 5 }
 0x37f   : > { %v12038_v41 = vcombine.low %v8222_v35, %v8232_v36 }
 0x380   : > { %v8174_v57 = vsel %vm13724_vm4, %v8169_v43, %v8173_v25  ;;  %v8239_v25 = vrot.slane %v8237_v17, 5  ;;  %v8312_v35 = vor.u32 %v8311_v23, %v8308_v48  ;;  %v12021_v48 = vld [vmem:[%s13615_s5 + $0xa8] sm:$0xf]  ;;  %v12022_v23 = vld [vmem:[%s13615_s5 + $0xac] sm:$0xf] }
 0x382   : > { %v8240_v37 = vor.u32 %v8239_v25, %v8236_v10  ;;  %v8321_v10 = vrot.slane %v8319_v16, 4  ;;  %v12011_v25 = vld [vmem:[%s13615_s5 + $0x80] sm:$0x1] }
 0x384   : > { %11965 = vmatmul.mubr.msk.bf16.gmra.mrb[52].mxu0 %vm557_vm1, %v13454_v40  ;;  %11982 = vmatmul.mubr.msk.bf16.gmra.mrb[52].mxu1 %vm557_vm1, %v13454_v40  ;;  %v8195_v40 = vshll.u32 %v11995_v34, 16  ;;  %v12004_v34 = vld [vmem:[%s13615_s5 + $0x64] sm:$0xf]  ;;  %v8241_v50 = vrot.slane %v8240_v37, 4  ;;  %v8322_v36 = vor.u32 %v8321_v10, %v8317_v24  ;;  %v8325_v37 = vshll.u32 %v12011_v25, 16 }
 0x385   : > { %7595 = vmatprep.mubr.bf16.mxu0 %v13523_v6  ;;  %7788 = vmatprep.mubr.bf16.mxu1 %v13523_v6  ;;  %v8271_v20 = vshrl.u32 %v12004_v34, 16 }
 0x386   : > { %v8246_v53 = vsel %vm13724_vm4, %v8241_v50, %v8245_v26  ;;  %v8323_v50 = vrot.slane %v8322_v36, 4  ;;  %v8405_v36 = vshll.u32 %v12021_v48, 16 }
 0x387   : > { %v8273_v30 = vrot.slane %v8271_v20, 4 }
 0x38c   : > { %11966 = vmatmul.mubr.msk.bf16.gmra.mrb[56].mxu0 %vm557_vm1, %v13455_v45  ;;  %11983 = vmatmul.mubr.msk.bf16.gmra.mrb[56].mxu1 %vm557_vm1, %v13455_v45  ;;  %v8197_v45 = vrot.slane %v8195_v40, 5  ;;  %v8267_v40 = vshll.u32 %v12004_v34, 16 }
 0x38d   : > { %7605 = vmatprep.mubr.bf16.mxu0 %v13523_v6  ;;  %7798 = vmatprep.mubr.bf16.mxu1 %v13523_v6 }
 0x38e   : > { %v8202_v60 = vor.u32 %v8201_v46, %v8197_v45  ;;  %v8269_v47 = vrot.slane %v8267_v40, 5  ;;  %v12006_v46 = vld [vmem:[%s13615_s5 + $0x6c] sm:$0xf] }
 0x38f   : > { %v8285_v59 = vshll.u32 %v12006_v46, 16 }
 0x390   : > { %v8203_v11 = vrot.slane %v8202_v60, 4  ;;  %v8274_v56 = vor.u32 %v8273_v30, %v8269_v47  ;;  %v8291_v60 = vshll.u32 %v12007_v49, 16  ;;  %v8270_v17 = vsel %vm13724_vm4, %v8265_v1, %v8269_v47  ;;  %v12016_v49 = vld [vmem:[%s13615_s5 + $0x94] sm:$0xf] }
 0x391   : > { %v8287_v7 = vrot.slane %v8285_v59, 5 }
 0x392   : > { %v8208_v22 = vsel %vm13724_vm4, %v8203_v11, %v8207_v12  ;;  %v8275_v2 = vrot.slane %v8274_v56, 4  ;;  %v8297_v11 = vrot.slane %v8295_v61, 4  ;;  %v12008_v12 = vld [vmem:[%s13615_s5 + $0x74] sm:$0x1]  ;;  %v8367_v61 = vshrl.u32 %v12016_v49, 16 }
 0x394   : > { %11967 = vmatmul.mubr.msk.bf16.gmra.mrb[60].mxu0 %vm557_vm1, %v13456_v3  ;;  %11984 = vmatmul.mubr.msk.bf16.gmra.mrb[60].mxu1 %vm557_vm1, %v13456_v3  ;;  %v12036_v3 = vcombine.low %v8174_v57, %v8184_v58  ;;  %v8282_v58 = vshrl.u32 %v12006_v46, 16  ;;  %v12015_v46 = vld [vmem:[%s13615_s5 + $0x90] sm:$0xf] }
 0x395   : > { %8785 = vmatprep.mubr.bf16.mxu0 %v13523_v6  ;;  %8978 = vmatprep.mubr.bf16.mxu1 %v13523_v6  ;;  %v8357_v59 = vshll.u32 %v12015_v46, 16 }
 0x396   : > { %v8284_v4 = vrot.slane %v8282_v58, 4  ;;  %v8354_v58 = vshrl.u32 %v12015_v46, 16 }
 0x398   : > { %v8288_v19 = vor.u32 %v8287_v7, %v8284_v4  ;;  %v8369_v7 = vrot.slane %v8367_v61, 4 }
 0x39c   : > { %12051 = vmatmul.mubr.msk.bf16.vlgmr.msra.gmra.mrb[0].mxu0 %vm557_vm1, %v12034_v21  ;;  %12068 = vmatmul.mubr.msk.bf16.vlgmr.msra.gmra.mrb[0].mxu1 %vm557_vm1, %v12034_v21  ;;  %v8198_v21 = vsel %vm13724_vm4, %v8193_v8, %v8197_v45  ;;  %v12005_v45 = vld [vmem:[%s13615_s5 + $0x68] sm:$0x1]  ;;  %v8293_v8 = vrot.slane %v8291_v60, 5  ;;  %v8363_v60 = vshll.u32 %v12016_v49, 16 }
 0x39d   : > { %9860 = vmatpush1.bf16.msra.mxu0 %v9848_v31  ;;  %10053 = vmatpush1.bf16.msra.mxu1 %v9854_v32  ;;  %v12037_v31 = vcombine.low %v8198_v21, %v8208_v22  ;;  %v12002_v32 = vld [vmem:[%s13615_s5 + $0x5c] sm:$0x1]  ;;  %v8277_v57 = vshll.u32 %v12005_v45, 16  ;;  %v8301_v22 = vshll.u32 %v12008_v12, 16  ;;  %v12014_v45 = vld [vmem:[%s13615_s5 + $0x8c] sm:$0x1] }
 0x39e   : > { %8795 = vmatprep.mubr.bf16.mxu0 %v13523_v6  ;;  %8988 = vmatprep.mubr.bf16.mxu1 %v13523_v6  ;;  %v8253_v52 = vshll.u32 %v12002_v32, 16  ;;  %v8298_v21 = vor.u32 %v8297_v11, %v8293_v8  ;;  %v8289_v32 = vrot.slane %v8288_v19, 4  ;;  %v8365_v4 = vrot.slane %v8363_v60, 5  ;;  %v12018_v11 = vld [vmem:[%s13615_s5 + $0x9c] sm:$0xf] }
 0x39f   : > { %v8303_v34 = vrot.slane %v8301_v22, 5  ;;  %v12019_v12 = vld [vmem:[%s13615_s5 + $0xa0] sm:$0xf]  ;;  %v8381_v19 = vshll.u32 %v12018_v11, 16 }
 0x3a0   : > { %v8255_v43 = vrot.slane %v8253_v52, 5  ;;  %v8299_v33 = vrot.slane %v8298_v21, 4  ;;  %v8333_v52 = vshll.u32 %v12012_v28, 16  ;;  %v8294_v40 = vsel %vm13724_vm4, %v8289_v32, %v8293_v8  ;;  %v12017_v8 = vld [vmem:[%s13615_s5 + $0x98] sm:$0x1] }
 0x3a1   : > { %v8370_v16 = vor.u32 %v8369_v7, %v8365_v4  ;;  %v8387_v21 = vshll.u32 %v12019_v12, 16  ;;  %v8391_v22 = vshrl.u32 %v12019_v12, 16  ;;  %v12028_v12 = vld [vmem:[%s13615_s5 + $0xc4] sm:$0xf] }
 0x3a2   : > { %v8304_v20 = vsel %vm13724_vm4, %v8299_v33, %v8303_v34  ;;  %v8335_v27 = vrot.slane %v8333_v52, 5  ;;  %v12020_v34 = vld [vmem:[%s13615_s5 + $0xa4] sm:$0x1] }
 0x3a3   : > { %v12041_v30 = vcombine.low %v8294_v40, %v8304_v20  ;;  %v8371_v25 = vrot.slane %v8370_v16, 4  ;;  %v8389_v32 = vrot.slane %v8387_v21, 5  ;;  %v8393_v33 = vrot.slane %v8391_v22, 4 }
 0x3a4   : > { %12052 = vmatmul.mubr.msk.bf16.gmra.mrb[4].mxu0 %vm557_vm1, %v12035_v42  ;;  %12069 = vmatmul.mubr.msk.bf16.gmra.mrb[4].mxu1 %vm557_vm1, %v12035_v42  ;;  %v8251_v42 = vrot.slane %v8250_v38, 4  ;;  %v8330_v38 = vshrl.u32 %v12012_v28, 16  ;;  %v8397_v20 = vshll.u32 %v12020_v34, 16  ;;  %v8459_v21 = vshll.u32 %v12028_v12, 16  ;;  %v12031_v34 = vld [vmem:[%s13615_s5 + $0xd0] sm:$0xf] }
 0x3a5   : > { %8805 = vmatprep.mubr.bf16.mxu0 %v13523_v6  ;;  %8998 = vmatprep.mubr.bf16.mxu1 %v13523_v6  ;;  %v8394_v40 = vor.u32 %v8393_v33, %v8389_v32  ;;  %v8463_v22 = vshrl.u32 %v12028_v12, 16  ;;  %v12030_v33 = vld [vmem:[%s13615_s5 + $0xcc] sm:$0xf] }
 0x3a6   : > { %v8256_v54 = vsel %vm13724_vm4, %v8251_v42, %v8255_v43  ;;  %v8327_v42 = vrot.slane %v8325_v37, 5  ;;  %v8332_v43 = vrot.slane %v8330_v38, 4  ;;  %v8411_v37 = vshll.u32 %v12022_v23, 16 }
 0x3a7   : > { %v12039_v0 = vcombine.low %v8246_v53, %v8256_v54  ;;  %v8415_v38 = vshrl.u32 %v12022_v23, 16  ;;  %v8395_v46 = vrot.slane %v8394_v40, 4  ;;  %v8399_v49 = vrot.slane %v8397_v20, 5 }
 0x3a8   : > { %v8328_v54 = vsel %vm13724_vm4, %v8323_v50, %v8327_v42  ;;  %v8336_v55 = vor.u32 %v8335_v27, %v8332_v43  ;;  %v8407_v50 = vrot.slane %v8405_v36, 5  ;;  %v8413_v42 = vrot.slane %v8411_v37, 5  ;;  %v12023_v27 = vld [vmem:[%s13615_s5 + $0xb0] sm:$0x1] }
 0x3a9   : > { %v8417_v43 = vrot.slane %v8415_v38, 4  ;;  %v8400_v61 = vsel %vm13724_vm4, %v8395_v46, %v8399_v49  ;;  %v8483_v40 = vshll.u32 %v12031_v34, 16  ;;  %v8487_v20 = vshrl.u32 %v12031_v34, 16 }
 0x3aa   : > { %v8337_v63 = vrot.slane %v8336_v55, 4  ;;  %v8421_v55 = vshll.u32 %v12023_v27, 16 }
 0x3ac   : > { %12053 = vmatmul.mubr.msk.bf16.gmra.mrb[8].mxu0 %vm557_vm1, %v12036_v3  ;;  %12070 = vmatmul.mubr.msk.bf16.gmra.mrb[8].mxu1 %vm557_vm1, %v12036_v3  ;;  %v8279_v3 = vrot.slane %v8277_v57, 5  ;;  %v8349_v57 = vshll.u32 %v12014_v45, 16 }
 0x3ad   : > { %8815 = vmatprep.mubr.bf16.mxu0 %v13523_v6  ;;  %9008 = vmatprep.mubr.bf16.mxu1 %v13523_v6 }
 0x3ae   : > { %v8280_v18 = vsel %vm13724_vm4, %v8275_v2, %v8279_v3  ;;  %v8351_v1 = vrot.slane %v8349_v57, 5  ;;  %v8356_v2 = vrot.slane %v8354_v58, 4  ;;  %v8359_v3 = vrot.slane %v8357_v59, 5 }
 0x3af   : > { %v12040_v26 = vcombine.low %v8270_v17, %v8280_v18  ;;  %v8373_v17 = vshll.u32 %v12017_v8, 16  ;;  %v8378_v18 = vshrl.u32 %v12018_v11, 16  ;;  %v12026_v8 = vld [vmem:[%s13615_s5 + $0xbc] sm:$0x1]  ;;  %v12027_v11 = vld [vmem:[%s13615_s5 + $0xc0] sm:$0xf] }
 0x3b0   : > { %v8360_v15 = vor.u32 %v8359_v3, %v8356_v2 }
 0x3b1   : > { %v8380_v28 = vrot.slane %v8378_v18, 4  ;;  %v8450_v18 = vshrl.u32 %v12027_v11, 16 }
 0x3b2   : > { %v8361_v10 = vrot.slane %v8360_v15, 4 }
 0x3b4   : > { %12054 = vmatmul.mubr.msk.bf16.gmra.mrb[12].mxu0 %vm557_vm1, %v12037_v31  ;;  %12071 = vmatmul.mubr.msk.bf16.gmra.mrb[12].mxu1 %vm557_vm1, %v12037_v31  ;;  %v12013_v31 = vld [vmem:[%s13615_s5 + $0x88] sm:$0xf]  ;;  %v8366_v52 = vsel %vm13724_vm4, %v8361_v10, %v8365_v4 }
 0x3b5   : > { %8825 = vmatprep.mubr.bf16.mxu0 %v13523_v6  ;;  %9018 = vmatprep.mubr.bf16.mxu1 %v13523_v6  ;;  %v8339_v51 = vshll.u32 %v12013_v31, 16  ;;  %v8343_v39 = vshrl.u32 %v12013_v31, 16  ;;  %v8383_v31 = vrot.slane %v8381_v19, 5  ;;  %v8453_v19 = vshll.u32 %v12027_v11, 16 }
 0x3b7   : > { %v8341_v44 = vrot.slane %v8339_v51, 5  ;;  %v8345_v47 = vrot.slane %v8343_v39, 4  ;;  %v8384_v39 = vor.u32 %v8383_v31, %v8380_v28  ;;  %v8461_v28 = vrot.slane %v8459_v21, 5 }
 0x3b8   : > { %v8465_v31 = vrot.slane %v8463_v22, 4 }
 0x3b9   : > { %v8346_v56 = vor.u32 %v8345_v47, %v8341_v44  ;;  %v8342_v13 = vsel %vm13724_vm4, %v8337_v63, %v8341_v44  ;;  %v12024_v47 = vld [vmem:[%s13615_s5 + $0xb4] sm:$0xf]  ;;  %v8385_v45 = vrot.slane %v8384_v39, 4  ;;  %v8477_v39 = vshll.u32 %v12030_v33, 16 }
 0x3ba   : > { %v8429_v57 = vshll.u32 %v12024_v47, 16  ;;  %v8466_v38 = vor.u32 %v8465_v31, %v8461_v28  ;;  %v12094_v31 = vld [vmem:[%s13615_s5 + $0x40] sm:$0xf] }
 0x3bb   : > { %v8390_v60 = vsel %vm13724_vm4, %v8385_v45, %v8389_v32  ;;  %v12029_v32 = vld [vmem:[%s13615_s5 + $0xc8] sm:$0x1]  ;;  %v12032_v45 = vld [vmem:[%s13615_s5 + $0xd4] sm:$0x1]  ;;  %v9514_v34 = vrot.slane %v12094_v31, 5 }
 0x3bc   : > { %12055 = vmatmul.mubr.msk.bf16.gmra.mrb[16].mxu0 %vm557_vm1, %v12038_v41  ;;  %12072 = vmatmul.mubr.msk.bf16.gmra.mrb[16].mxu1 %vm557_vm1, %v12038_v41  ;;  %v8313_v41 = vrot.slane %v8312_v35, 4  ;;  %v8402_v35 = vshrl.u32 %v12021_v48, 16  ;;  %v8431_v2 = vrot.slane %v8429_v57, 5  ;;  %v12045_v7 = vcombine.low %v8390_v60, %v8400_v61  ;;  %v12085_v60 = vld [vmem:[%s13615_s5 + $0x1c] sm:$0xf] }
 0x3bd   : > { %8835 = vmatprep.mubr.bf16.mxu0 %v13523_v6  ;;  %9028 = vmatprep.mubr.bf16.mxu1 %v13523_v6 }
 0x3be   : > { %v8318_v53 = vsel %vm13724_vm4, %v8313_v41, %v8317_v24  ;;  %v8404_v41 = vrot.slane %v8402_v35, 4 }
 0x3bf   : > { %v12042_v62 = vcombine.low %v8318_v53, %v8328_v54  ;;  %v8418_v54 = vor.u32 %v8417_v43, %v8413_v42 }
 0x3c0   : > { %v8408_v53 = vor.u32 %v8407_v50, %v8404_v41 }
 0x3c1   : > { %v8419_v63 = vrot.slane %v8418_v54, 4 }
 0x3c4   : > { %12056 = vmatmul.mubr.msk.bf16.gmra.mrb[20].mxu0 %vm557_vm1, %v12039_v0  ;;  %12073 = vmatmul.mubr.msk.bf16.gmra.mrb[20].mxu1 %vm557_vm1, %v12039_v0  ;;  %v8347_v0 = vrot.slane %v8346_v56, 4  ;;  %v8426_v56 = vshrl.u32 %v12024_v47, 16  ;;  %v8485_v47 = vrot.slane %v8483_v40, 5 }
 0x3c5   : > { %8845 = vmatprep.mubr.bf16.mxu0 %v13523_v6  ;;  %9038 = vmatprep.mubr.bf16.mxu1 %v13523_v6 }
 0x3c6   : > { %v8352_v14 = vsel %vm13724_vm4, %v8347_v0, %v8351_v1  ;;  %v8423_v0 = vrot.slane %v8421_v55, 5  ;;  %v8428_v1 = vrot.slane %v8426_v56, 4  ;;  %v8493_v55 = vshll.u32 %v12032_v45, 16 }
 0x3c7   : > { %v12043_v24 = vcombine.low %v8342_v13, %v8352_v14 }
 0x3c8   : > { %v8424_v14 = vsel %vm13724_vm4, %v8419_v63, %v8423_v0  ;;  %v8432_v15 = vor.u32 %v8431_v2, %v8428_v1  ;;  %v9493_v63 = vrot.slane %v12085_v60, 5  ;;  %v12084_v0 = vld [vmem:[%s13615_s5 + $0x18] sm:$0xe]  ;;  %v12086_v1 = vld [vmem:[%s13615_s5 + $0x20] sm:$0x1] }
 0x3ca   : > { %v8433_v23 = vrot.slane %v8432_v15, 4 }
 0x3cc   : > { %12057 = vmatmul.mubr.msk.bf16.gmra.mrb[24].mxu0 %vm557_vm1, %v12040_v26  ;;  %12074 = vmatmul.mubr.msk.bf16.gmra.mrb[24].mxu1 %vm557_vm1, %v12040_v26  ;;  %v8375_v26 = vrot.slane %v8373_v17, 5  ;;  %v8445_v17 = vshll.u32 %v12026_v8, 16  ;;  %v12088_v8 = vld [vmem:[%s13615_s5 + $0x28] sm:$0xf] }
 0x3cd   : > { %8855 = vmatprep.mubr.bf16.mxu0 %v13523_v6  ;;  %9048 = vmatprep.mubr.bf16.mxu1 %v13523_v6  ;;  %v9500_v12 = vrot.slane %v12088_v8, 5 }
 0x3ce   : > { %v8376_v51 = vsel %vm13724_vm4, %v8371_v25, %v8375_v26  ;;  %v8447_v10 = vrot.slane %v8445_v17, 5  ;;  %v8452_v25 = vrot.slane %v8450_v18, 4  ;;  %v8455_v26 = vrot.slane %v8453_v19, 5  ;;  %v12091_v19 = vld [vmem:[%s13615_s5 + $0x34] sm:$0xf] }
 0x3cf   : > { %v12044_v44 = vcombine.low %v8366_v52, %v8376_v51  ;;  %v8469_v52 = vshll.u32 %v12029_v32, 16  ;;  %v8474_v51 = vshrl.u32 %v12030_v33, 16  ;;  %v9502_v17 = vrot.slane %v9500_v12, 4 }
 0x3d0   : > { %v8456_v37 = vor.u32 %v8455_v26, %v8452_v25 }
 0x3d1   : > { %v8471_v43 = vrot.slane %v8469_v52, 5  ;;  %v8476_v27 = vrot.slane %v8474_v51, 4  ;;  %v9516_v52 = vrot.slane %v9514_v34, 4 }
 0x3d2   : > { %v8457_v50 = vrot.slane %v8456_v37, 4 }
 0x3d4   : > { %12058 = vmatmul.mubr.msk.bf16.gmra.mrb[28].mxu0 %vm557_vm1, %v12041_v30  ;;  %12075 = vmatmul.mubr.msk.bf16.gmra.mrb[28].mxu1 %vm557_vm1, %v12041_v30  ;;  %v12025_v30 = vld [vmem:[%s13615_s5 + $0xb8] sm:$0xf]  ;;  %v8462_v46 = vsel %vm13724_vm4, %v8457_v50, %v8461_v28  ;;  %v12096_v50 = vld [vmem:[%s13615_s5 + $0x48] sm:$0xe] }
 0x3d5   : > { %8865 = vmatprep.mubr.bf16.mxu0 %v13523_v6  ;;  %9058 = vmatprep.mubr.bf16.mxu1 %v13523_v6  ;;  %v8435_v58 = vshll.u32 %v12025_v30, 16  ;;  %v8439_v59 = vshrl.u32 %v12025_v30, 16  ;;  %v8489_v30 = vrot.slane %v8487_v20, 4 }
 0x3d7   : > { %v8437_v3 = vrot.slane %v8435_v58, 5  ;;  %v8441_v4 = vrot.slane %v8439_v59, 4  ;;  %v8490_v54 = vor.u32 %v8489_v30, %v8485_v47  ;;  %v8495_v59 = vrot.slane %v8493_v55, 5  ;;  %v12100_v30 = vld [vmem:[%s13615_s5 + $0x58] sm:$0xf] }
 0x3d9   : > { %v8442_v16 = vor.u32 %v8441_v4, %v8437_v3  ;;  %v8438_v35 = vsel %vm13724_vm4, %v8433_v23, %v8437_v3  ;;  %v8491_v58 = vrot.slane %v8490_v54, 4  ;;  %v12132_v3 = vrot.slane %v12084_v0, 9  ;;  %v12090_v23 = vld [vmem:[%s13615_s5 + $0x30] sm:$0xe]  ;;  %v12101_v54 = vld [vmem:[%s13615_s5 + $0x5c] sm:$0x1] }
 0x3da   : > { %v9495_v4 = vrot.slane %v9493_v63, 4  ;;  %v12134_v25 = vrot.slane %v12090_v23, 9  ;;  %v12104_v0 = vld [vmem:[%s13615_s5 + $0x68] sm:$0x1]  ;;  %v12110_v23 = vld [vmem:[%s13615_s5 + $0x80] sm:$0x1] }
 0x3db   : > { %v9494_v9 = vsel %vm13920_vm7, %v12132_v3, %v9493_v63  ;;  %v12102_v63 = vld [vmem:[%s13615_s5 + $0x60] sm:$0xe] }
 0x3dc   : > { %12059 = vmatmul.mubr.msk.bf16.gmra.mrb[32].mxu0 %vm557_vm1, %v12042_v62  ;;  %12076 = vmatmul.mubr.msk.bf16.gmra.mrb[32].mxu1 %vm557_vm1, %v12042_v62  ;;  %v8409_v62 = vrot.slane %v8408_v53, 4 }
 0x3dd   : > { %8875 = vmatprep.mubr.bf16.mxu0 %v13523_v6  ;;  %9068 = vmatprep.mubr.bf16.mxu1 %v13523_v6 }
 0x3de   : > { %v8414_v13 = vsel %vm13724_vm4, %v8409_v62, %v8413_v42  ;;  %v8467_v42 = vrot.slane %v8466_v38, 4  ;;  %v8496_v62 = vsel %vm13724_vm4, %v8491_v58, %v8495_v59  ;;  %v9531_v58 = vrot.slane %v12101_v54, 5  ;;  %v12103_v59 = vld [vmem:[%s13615_s5 + $0x64] sm:$0xf] }
 0x3df   : > { %v12046_v48 = vcombine.low %v8414_v13, %v8424_v14  ;;  %v12087_v13 = vld [vmem:[%s13615_s5 + $0x24] sm:$0xe]  ;;  %v12089_v14 = vld [vmem:[%s13615_s5 + $0x2c] sm:$0x1] }
 0x3e0   : > { %v8472_v49 = vsel %vm13724_vm4, %v8467_v42, %v8471_v43  ;;  %v9503_v18 = vrot.slane %v12089_v14, 5  ;;  %v12098_v42 = vld [vmem:[%s13615_s5 + $0x50] sm:$0x1] }
 0x3e1   : > { %v12048_v56 = vcombine.low %v8462_v46, %v8472_v49  ;;  %v9528_v49 = vrot.slane %v12100_v30, 5 }
 0x3e2   : > { %v9504_v22 = vsel %vm13920_vm7, %v9502_v17, %v9503_v18  ;;  %v12109_v18 = vld [vmem:[%s13615_s5 + $0x7c] sm:$0xf] }
 0x3e4   : > { %12060 = vmatmul.mubr.msk.bf16.gmra.mrb[36].mxu0 %vm557_vm1, %v12043_v24  ;;  %12077 = vmatmul.mubr.msk.bf16.gmra.mrb[36].mxu1 %vm557_vm1, %v12043_v24  ;;  %v8443_v24 = vrot.slane %v8442_v16, 4  ;;  %v12133_v16 = vrot.slane %v12087_v13, 9  ;;  %v12107_v13 = vld [vmem:[%s13615_s5 + $0x74] sm:$0x1] }
 0x3e5   : > { %8885 = vmatprep.mubr.bf16.mxu0 %v13523_v6  ;;  %9078 = vmatprep.mubr.bf16.mxu1 %v13523_v6  ;;  %v9545_v17 = vrot.slane %v12107_v13, 5 }
 0x3e6   : > { %v8448_v36 = vsel %vm13724_vm4, %v8443_v24, %v8447_v10  ;;  %v9501_v21 = vsel %vm13920_vm7, %v12133_v16, %v9500_v12  ;;  %v12092_v24 = vld [vmem:[%s13615_s5 + $0x38] sm:$0x1]  ;;  %v12105_v12 = vld [vmem:[%s13615_s5 + $0x6c] sm:$0xe] }
 0x3e7   : > { %v12047_v41 = vcombine.low %v8438_v35, %v8448_v36  ;;  %v12150_v10 = vcombine.low %v9501_v21, %v9504_v22  ;;  %v9510_v28 = vrot.slane %v12092_v24, 5  ;;  %v12093_v35 = vld [vmem:[%s13615_s5 + $0x3c] sm:$0xe]  ;;  %v12095_v36 = vld [vmem:[%s13615_s5 + $0x44] sm:$0x1]  ;;  %v9549_v22 = vrot.slane %v12109_v18, 5 }
 0x3e8   : > { %v12135_v38 = vrot.slane %v12093_v35, 9  ;;  %v9517_v51 = vrot.slane %v12095_v36, 5  ;;  %v12113_v35 = vld [vmem:[%s13615_s5 + $0x8c] sm:$0x1] }
 0x3ea   : > { %v9515_v40 = vsel %vm13920_vm7, %v12135_v38, %v9514_v34  ;;  %v9518_v20 = vsel %vm13920_vm7, %v9516_v52, %v9517_v51  ;;  %v12111_v34 = vld [vmem:[%s13615_s5 + $0x84] sm:$0xe]  ;;  %v9559_v52 = vrot.slane %v12113_v35, 5  ;;  %v12115_v51 = vld [vmem:[%s13615_s5 + $0x94] sm:$0xf] }
 0x3eb   : > { %v12152_v43 = vcombine.low %v9515_v40, %v9518_v20  ;;  %v9563_v20 = vrot.slane %v12115_v51, 5 }
 0x3ec   : > { %12061 = vmatmul.mubr.msk.bf16.gmra.mrb[40].mxu0 %vm557_vm1, %v12044_v44  ;;  %12078 = vmatmul.mubr.msk.bf16.gmra.mrb[40].mxu1 %vm557_vm1, %v12044_v44  ;;  %v8479_v44 = vrot.slane %v8477_v39, 5  ;;  %v12097_v39 = vld [vmem:[%s13615_s5 + $0x4c] sm:$0xf] }
 0x3ed   : > { %8895 = vmatprep.mubr.bf16.mxu0 %v13523_v6  ;;  %9088 = vmatprep.mubr.bf16.mxu1 %v13523_v6 }
 0x3ee   : > { %v8480_v53 = vor.u32 %v8479_v44, %v8476_v27  ;;  %v12136_v27 = vrot.slane %v12096_v50, 9  ;;  %v12116_v50 = vld [vmem:[%s13615_s5 + $0x98] sm:$0x1] }
 0x3f0   : > { %v8481_v57 = vrot.slane %v8480_v53, 4  ;;  %v12099_v53 = vld [vmem:[%s13615_s5 + $0x54] sm:$0xe] }
 0x3f2   : > { %v8486_v61 = vsel %vm13724_vm4, %v8481_v57, %v8485_v47  ;;  %v9524_v47 = vrot.slane %v12098_v42, 5  ;;  %v9530_v57 = vrot.slane %v9528_v49, 4 }
 0x3f3   : > { %v12049_v2 = vcombine.low %v8486_v61, %v8496_v62  ;;  %v9535_v62 = vrot.slane %v12103_v59, 5 }
 0x3f4   : > { %12062 = vmatmul.mubr.msk.bf16.gmra.mrb[44].mxu0 %vm557_vm1, %v12045_v7  ;;  %12079 = vmatmul.mubr.msk.bf16.gmra.mrb[44].mxu1 %vm557_vm1, %v12045_v7  ;;  %v9496_v7 = vrot.slane %v12086_v1, 5  ;;  %v9532_v61 = vsel %vm13920_vm7, %v9530_v57, %v9531_v58  ;;  %v12121_v58 = vld [vmem:[%s13615_s5 + $0xac] sm:$0xf] }
 0x3f5   : > { %8905 = vmatprep.mubr.bf16.mxu0 %v13523_v6  ;;  %9098 = vmatprep.mubr.bf16.mxu1 %v13523_v6  ;;  %v9537_v3 = vrot.slane %v9535_v62, 4 }
 0x3f6   : > { %v9497_v11 = vsel %vm13920_vm7, %v9495_v4, %v9496_v7  ;;  %v9538_v4 = vrot.slane %v12104_v0, 5  ;;  %v12106_v7 = vld [vmem:[%s13615_s5 + $0x70] sm:$0xf] }
 0x3f7   : > { %v12149_v15 = vcombine.low %v9494_v9, %v9497_v11  ;;  %v9542_v11 = vrot.slane %v12106_v7, 5 }
 0x3f8   : > { %v9539_v9 = vsel %vm13920_vm7, %v9537_v3, %v9538_v4  ;;  %v12124_v4 = vld [vmem:[%s13615_s5 + $0xb8] sm:$0xf] }
 0x3f9   : > { %v9544_v16 = vrot.slane %v9542_v11, 4 }
 0x3fb   : > { %v9546_v21 = vsel %vm13920_vm7, %v9544_v16, %v9545_v17  ;;  %v12127_v17 = vld [vmem:[%s13615_s5 + $0xc4] sm:$0xf] }
 0x3fc   : > { %12063 = vmatmul.mubr.msk.bf16.gmra.mrb[48].mxu0 %vm557_vm1, %v12046_v48  ;;  %12080 = vmatmul.mubr.msk.bf16.gmra.mrb[48].mxu1 %vm557_vm1, %v12046_v48  ;;  %v9507_v48 = vrot.slane %v12091_v19, 5 }
 0x3fd   : > { %8915 = vmatprep.mubr.bf16.mxu0 %v13523_v6  ;;  %9108 = vmatprep.mubr.bf16.mxu1 %v13523_v6 }
 0x3fe   : > { %v9509_v26 = vrot.slane %v9507_v48, 4  ;;  %v9508_v32 = vsel %vm13920_vm7, %v12134_v25, %v9507_v48  ;;  %v12108_v48 = vld [vmem:[%s13615_s5 + $0x78] sm:$0xe]  ;;  %v9551_v25 = vrot.slane %v9549_v22, 4 }
 0x400   : > { %v9511_v33 = vsel %vm13920_vm7, %v9509_v26, %v9510_v28  ;;  %v9552_v26 = vrot.slane %v12110_v23, 5  ;;  %v12112_v28 = vld [vmem:[%s13615_s5 + $0x88] sm:$0xf] }
 0x401   : > { %v12151_v37 = vcombine.low %v9508_v32, %v9511_v33  ;;  %v9556_v33 = vrot.slane %v12112_v28, 5 }
 0x402   : > { %v9553_v32 = vsel %vm13920_vm7, %v9551_v25, %v9552_v26  ;;  %v12130_v26 = vld [vmem:[%s13615_s5 + $0xd0] sm:$0xf] }
 0x403   : > { %v9558_v38 = vrot.slane %v9556_v33, 4 }
 0x404   : > { %12064 = vmatmul.mubr.msk.bf16.gmra.mrb[52].mxu0 %vm557_vm1, %v12047_v41  ;;  %12081 = vmatmul.mubr.msk.bf16.gmra.mrb[52].mxu1 %vm557_vm1, %v12047_v41  ;;  %v9521_v41 = vrot.slane %v12097_v39, 5 }
 0x405   : > { %8925 = vmatprep.mubr.bf16.mxu0 %v13523_v6  ;;  %9118 = vmatprep.mubr.bf16.mxu1 %v13523_v6  ;;  %v9560_v40 = vsel %vm13920_vm7, %v9558_v38, %v9559_v52 }
 0x406   : > { %v9523_v44 = vrot.slane %v9521_v41, 4  ;;  %v9522_v45 = vsel %vm13920_vm7, %v12136_v27, %v9521_v41  ;;  %v12114_v41 = vld [vmem:[%s13615_s5 + $0x90] sm:$0xe]  ;;  %v9565_v27 = vrot.slane %v9563_v20, 4 }
 0x408   : > { %v9525_v46 = vsel %vm13920_vm7, %v9523_v44, %v9524_v47  ;;  %v9566_v44 = vrot.slane %v12116_v50, 5  ;;  %v12118_v47 = vld [vmem:[%s13615_s5 + $0xa0] sm:$0xf]  ;;  %v10645_v50 = vsub.s32 3, %v13602_v5 }
 0x409   : > { %v12153_v55 = vcombine.low %v9522_v45, %v9525_v46  ;;  %v9570_v46 = vrot.slane %v12118_v47, 5 }
 0x40a   : > { %v9567_v45 = vsel %vm13920_vm7, %v9565_v27, %v9566_v44 }
 0x40c   : > { %12065 = vmatmul.mubr.msk.bf16.gmra.mrb[56].mxu0 %vm557_vm1, %v12048_v56  ;;  %12082 = vmatmul.mubr.msk.bf16.gmra.mrb[56].mxu1 %vm557_vm1, %v12048_v56  ;;  %v12137_v56 = vrot.slane %v12099_v53, 9  ;;  %v12119_v53 = vld [vmem:[%s13615_s5 + $0xa4] sm:$0x1] }
 0x40d   : > { %8935 = vmatprep.mubr.bf16.mxu0 %v13523_v6  ;;  %9128 = vmatprep.mubr.bf16.mxu1 %v13523_v6  ;;  %v9573_v57 = vrot.slane %v12119_v53, 5 }
 0x40e   : > { %v9529_v60 = vsel %vm13920_vm7, %v12137_v56, %v9528_v49  ;;  %v12117_v49 = vld [vmem:[%s13615_s5 + $0x9c] sm:$0xe]  ;;  %v9572_v56 = vrot.slane %v9570_v46, 4 }
 0x40f   : > { %v12154_v1 = vcombine.low %v9529_v60, %v9532_v61  ;;  %v9577_v61 = vrot.slane %v12121_v58, 5 }
 0x410   : > { %v9574_v60 = vsel %vm13920_vm7, %v9572_v56, %v9573_v57 }
 0x414   : > { %12066 = vmatmul.mubr.msk.bf16.gmra.mrb[60].mxu0 %vm557_vm1, %v12049_v2  ;;  %12083 = vmatmul.mubr.msk.bf16.gmra.mrb[60].mxu1 %vm557_vm1, %v12049_v2  ;;  %v12138_v2 = vrot.slane %v12102_v63, 9  ;;  %v12122_v63 = vld [vmem:[%s13615_s5 + $0xb0] sm:$0x1] }
 0x415   : > { %9891 = vmatprep.mubr.bf16.mxu0 %v13523_v6  ;;  %10084 = vmatprep.mubr.bf16.mxu1 %v13523_v6  ;;  %v9580_v3 = vrot.slane %v12122_v63, 5 }
 0x416   : > { %v9536_v8 = vsel %vm13920_vm7, %v12138_v2, %v9535_v62  ;;  %v12120_v62 = vld [vmem:[%s13615_s5 + $0xa8] sm:$0xe]  ;;  %v9579_v2 = vrot.slane %v9577_v61, 4 }
 0x417   : > { %v12155_v14 = vcombine.low %v9536_v8, %v9539_v9  ;;  %v9584_v9 = vrot.slane %v12124_v4, 5 }
 0x418   : > { %v9581_v8 = vsel %vm13920_vm7, %v9579_v2, %v9580_v3 }
 0x41c   : > { %12166 = vmatmul.mubr.msk.bf16.vlgmr.msra.gmra.mrb[0].mxu0 %vm557_vm1, %v12149_v15  ;;  %12183 = vmatmul.mubr.msk.bf16.vlgmr.msra.gmra.mrb[0].mxu1 %vm557_vm1, %v12149_v15  ;;  %v12139_v15 = vrot.slane %v12105_v12, 9  ;;  %v12125_v12 = vld [vmem:[%s13615_s5 + $0xbc] sm:$0x1] }
 0x41d   : > { %9901 = vmatprep.mubr.bf16.mxu0 %v13523_v6  ;;  %10094 = vmatprep.mubr.bf16.mxu1 %v13523_v6  ;;  %v9587_v16 = vrot.slane %v12125_v12, 5 }
 0x41e   : > { %v9543_v19 = vsel %vm13920_vm7, %v12139_v15, %v9542_v11  ;;  %v12123_v11 = vld [vmem:[%s13615_s5 + $0xb4] sm:$0xe]  ;;  %v9586_v15 = vrot.slane %v9584_v9, 4 }
 0x41f   : > { %v12156_v24 = vcombine.low %v9543_v19, %v9546_v21  ;;  %v9591_v21 = vrot.slane %v12127_v17, 5 }
 0x420   : > { %v9588_v19 = vsel %vm13920_vm7, %v9586_v15, %v9587_v16 }
 0x424   : > { %12167 = vmatmul.mubr.msk.bf16.gmra.mrb[4].mxu0 %vm557_vm1, %v12150_v10  ;;  %12184 = vmatmul.mubr.msk.bf16.gmra.mrb[4].mxu1 %vm557_vm1, %v12150_v10  ;;  %v12140_v10 = vrot.slane %v12108_v48, 9  ;;  %v12128_v48 = vld [vmem:[%s13615_s5 + $0xc8] sm:$0x1] }
 0x425   : > { %9911 = vmatprep.mubr.bf16.mxu0 %v13523_v6  ;;  %10104 = vmatprep.mubr.bf16.mxu1 %v13523_v6  ;;  %v9594_v25 = vrot.slane %v12128_v48, 5 }
 0x426   : > { %v9550_v31 = vsel %vm13920_vm7, %v12140_v10, %v9549_v22  ;;  %v12126_v22 = vld [vmem:[%s13615_s5 + $0xc0] sm:$0xe]  ;;  %v9593_v10 = vrot.slane %v9591_v21, 4 }
 0x427   : > { %v12157_v36 = vcombine.low %v9550_v31, %v9553_v32  ;;  %v9598_v32 = vrot.slane %v12130_v26, 5 }
 0x428   : > { %v9595_v31 = vsel %vm13920_vm7, %v9593_v10, %v9594_v25 }
 0x42c   : > { %12168 = vmatmul.mubr.msk.bf16.gmra.mrb[8].mxu0 %vm557_vm1, %v12151_v37  ;;  %12185 = vmatmul.mubr.msk.bf16.gmra.mrb[8].mxu1 %vm557_vm1, %v12151_v37  ;;  %v12141_v37 = vrot.slane %v12111_v34, 9  ;;  %v12131_v34 = vld [vmem:[%s13615_s5 + $0xd4] sm:$0x1] }
 0x42d   : > { %9921 = vmatprep.mubr.bf16.mxu0 %v13523_v6  ;;  %10114 = vmatprep.mubr.bf16.mxu1 %v13523_v6  ;;  %v9601_v38 = vrot.slane %v12131_v34, 5 }
 0x42e   : > { %v9557_v39 = vsel %vm13920_vm7, %v12141_v37, %v9556_v33  ;;  %v12129_v33 = vld [vmem:[%s13615_s5 + $0xcc] sm:$0xe]  ;;  %v9600_v37 = vrot.slane %v9598_v32, 4  ;;  %s11435_s5 = sshll.u32 %s161_s4, 9 }
 0x42f   : > { %v12158_v42 = vcombine.low %v9557_v39, %v9560_v40  ;;  %v10633_v40 = vsub.s32 0, %v13602_v5  ;;  %s15088_s6 = scalar_lea.vmem [#allocation3], %s11435_s5 }
 0x430   : > { %v9602_v51 = vsel %vm13920_vm7, %v9600_v37, %v9601_v38  ;;  %s11369_s8 = sshll.u32 %s15088_s6, 4  ;;  %s15277_s8 = int_to_ptr.vmem [resolvable:$true] %s11369_s8 }
 0x431   : > { %s13458_s17 = scalar_lea.vmem %s15277_s8, 8192  ;;  %p13465_p0 = scmp.lt.s32.totalorder %s15277_s8, %s13463_s20 }
 0x432   : > { %p13459_p11 = scmp.ne.s32.totalorder %s15277_s8, %s13458_s17  ;;  %p13466_p1 = scmp.lt.s32.totalorder %s13464_s24, %s13458_s17 }
 0x434   : > { %12169 = vmatmul.mubr.msk.bf16.gmra.mrb[12].mxu0 %vm557_vm1, %v12152_v43  ;;  %12186 = vmatmul.mubr.msk.bf16.gmra.mrb[12].mxu1 %vm557_vm1, %v12152_v43  ;;  %v12142_v43 = vrot.slane %v12114_v41, 9  ;;  %v10637_v41 = vsub.s32 1, %v13602_v5  ;;  %p13460_p12 = pnand %p13459_p11, %p13585_p5  ;;  %p13467_p2 = por %p13466_p1, %p13465_p0 }
 0x435   : > { %9931 = vmatprep.mubr.bf16.mxu0 %v13523_v6  ;;  %10124 = vmatprep.mubr.bf16.mxu1 %v13523_v6 }
 0x436   : > { %v9564_v30 = vsel %vm13920_vm7, %v12142_v43, %v9563_v20  ;;  %v10641_v20 = vsub.s32 2, %v13602_v5  ;;  %p13461_p13 = pneg %p13460_p12 }
 0x437   : > { %v12159_v54 = vcombine.low %v9564_v30, %v9567_v45 }
 0x438   : > { %p13468_p3 = pnand %p13467_p2, %p13461_p13 }
 0x43c   : > { %12170 = vmatmul.mubr.msk.bf16.gmra.mrb[16].mxu0 %vm557_vm1, %v12153_v55  ;;  %12187 = vmatmul.mubr.msk.bf16.gmra.mrb[16].mxu1 %vm557_vm1, %v12153_v55  ;;  %v12143_v55 = vrot.slane %v12117_v49, 9 }
 0x43d   : > { %9941 = vmatprep.mubr.bf16.mxu0 %v13523_v6  ;;  %10134 = vmatprep.mubr.bf16.mxu1 %v13523_v6 }
 0x43e   : > { %v9571_v59 = vsel %vm13920_vm7, %v12143_v55, %v9570_v46 }
 0x43f   : > { %v12160_v0 = vcombine.low %v9571_v59, %v9574_v60 }
 0x444   : > { %12171 = vmatmul.mubr.msk.bf16.gmra.mrb[20].mxu0 %vm557_vm1, %v12154_v1  ;;  %12188 = vmatmul.mubr.msk.bf16.gmra.mrb[20].mxu1 %vm557_vm1, %v12154_v1  ;;  %v12144_v1 = vrot.slane %v12120_v62, 9 }
 0x445   : > { %9951 = vmatprep.mubr.bf16.mxu0 %v13523_v6  ;;  %10144 = vmatprep.mubr.bf16.mxu1 %v13523_v6 }
 0x446   : > { %v9578_v7 = vsel %vm13920_vm7, %v12144_v1, %v9577_v61 }
 0x447   : > { %v12161_v13 = vcombine.low %v9578_v7, %v9581_v8 }
 0x44c   : > { %12172 = vmatmul.mubr.msk.bf16.gmra.mrb[24].mxu0 %vm557_vm1, %v12155_v14  ;;  %12189 = vmatmul.mubr.msk.bf16.gmra.mrb[24].mxu1 %vm557_vm1, %v12155_v14  ;;  %v12145_v14 = vrot.slane %v12123_v11, 9 }
 0x44d   : > { %9961 = vmatprep.mubr.bf16.mxu0 %v13523_v6  ;;  %10154 = vmatprep.mubr.bf16.mxu1 %v13523_v6 }
 0x44e   : > { %v9585_v18 = vsel %vm13920_vm7, %v12145_v14, %v9584_v9 }
 0x44f   : > { %v12162_v23 = vcombine.low %v9585_v18, %v9588_v19 }
 0x454   : > { %12173 = vmatmul.mubr.msk.bf16.gmra.mrb[28].mxu0 %vm557_vm1, %v12156_v24  ;;  %12190 = vmatmul.mubr.msk.bf16.gmra.mrb[28].mxu1 %vm557_vm1, %v12156_v24  ;;  %v12146_v24 = vrot.slane %v12126_v22, 9 }
 0x455   : > { %9971 = vmatprep.mubr.bf16.mxu0 %v13523_v6  ;;  %10164 = vmatprep.mubr.bf16.mxu1 %v13523_v6 }
 0x456   : > { %v9592_v28 = vsel %vm13920_vm7, %v12146_v24, %v9591_v21 }
 0x457   : > { %v12163_v35 = vcombine.low %v9592_v28, %v9595_v31 }
 0x45c   : > { %12174 = vmatmul.mubr.msk.bf16.gmra.mrb[32].mxu0 %vm557_vm1, %v12157_v36  ;;  %12191 = vmatmul.mubr.msk.bf16.gmra.mrb[32].mxu1 %vm557_vm1, %v12157_v36  ;;  %v12147_v36 = vrot.slane %v12129_v33, 9 }
 0x45d   : > { %9981 = vmatprep.mubr.bf16.mxu0 %v13523_v6  ;;  %10174 = vmatprep.mubr.bf16.mxu1 %v13523_v6 }
 0x45e   : > { %v9599_v52 = vsel %vm13920_vm7, %v12147_v36, %v9598_v32 }
 0x45f   : > { %v12164_v39 = vcombine.low %v9599_v52, %v9602_v51 }
 0x464   : > { %12175 = vmatmul.mubr.msk.bf16.gmra.mrb[36].mxu0 %vm557_vm1, %v12158_v42  ;;  %12192 = vmatmul.mubr.msk.bf16.gmra.mrb[36].mxu1 %vm557_vm1, %v12158_v42 }
 0x465   : > { %9991 = vmatprep.mubr.bf16.mxu0 %v13523_v6  ;;  %10184 = vmatprep.mubr.bf16.mxu1 %v13523_v6 }
 0x46c   : > { %12176 = vmatmul.mubr.msk.bf16.gmra.mrb[40].mxu0 %vm557_vm1, %v12159_v54  ;;  %12193 = vmatmul.mubr.msk.bf16.gmra.mrb[40].mxu1 %vm557_vm1, %v12159_v54 }
 0x46d   : > { %10001 = vmatprep.mubr.bf16.mxu0 %v13523_v6  ;;  %10194 = vmatprep.mubr.bf16.mxu1 %v13523_v6 }
 0x474   : > { %12177 = vmatmul.mubr.msk.bf16.gmra.mrb[44].mxu0 %vm557_vm1, %v12160_v0  ;;  %12194 = vmatmul.mubr.msk.bf16.gmra.mrb[44].mxu1 %vm557_vm1, %v12160_v0 }
 0x475   : > { %10011 = vmatprep.mubr.bf16.mxu0 %v13523_v6  ;;  %10204 = vmatprep.mubr.bf16.mxu1 %v13523_v6 }
 0x47c   : > { %12178 = vmatmul.mubr.msk.bf16.gmra.mrb[48].mxu0 %vm557_vm1, %v12161_v13  ;;  %12195 = vmatmul.mubr.msk.bf16.gmra.mrb[48].mxu1 %vm557_vm1, %v12161_v13 }
 0x47d   : > { %10021 = vmatprep.mubr.bf16.mxu0 %v13523_v6  ;;  %10214 = vmatprep.mubr.bf16.mxu1 %v13523_v6 }
 0x484   : > { %12179 = vmatmul.mubr.msk.bf16.gmra.mrb[52].mxu0 %vm557_vm1, %v12162_v23  ;;  %12196 = vmatmul.mubr.msk.bf16.gmra.mrb[52].mxu1 %vm557_vm1, %v12162_v23 }
 0x485   : > { %10031 = vmatprep.mubr.bf16.mxu0 %v13523_v6  ;;  %10224 = vmatprep.mubr.bf16.mxu1 %v13523_v6 }
 0x48c   : > { %12180 = vmatmul.mubr.msk.bf16.gmra.mrb[56].mxu0 %vm557_vm1, %v12163_v35  ;;  %12197 = vmatmul.mubr.msk.bf16.gmra.mrb[56].mxu1 %vm557_vm1, %v12163_v35 }
 0x48d   : > { %10041 = vmatprep.mubr.bf16.mxu0 %v13523_v6  ;;  %10234 = vmatprep.mubr.bf16.mxu1 %v13523_v6  ;;  %v10629_v6 = vld [vmem:[%s15328_s2] sm:$0xf] }
 0x48e   : > { %v15069_v29 = vrot.slane %v10629_v6, %v10633_v40  ;;  %v15071_v42 = vrot.slane %v10629_v6, %v10641_v20  ;;  %v15073_v43 = vrot.slane %v10629_v6, %v10637_v41  ;;  %v15075_v27 = vrot.slane %v10629_v6, %v10645_v50 }
 0x494   : > { %12181 = vmatmul.mubr.msk.bf16.gmra.mrb[60].mxu0 %vm557_vm1, %v12164_v39  ;;  %12198 = vmatmul.mubr.msk.bf16.gmra.mrb[60].mxu1 %vm557_vm1, %v12164_v39 }
 0x4ef   : > { %v9893_v44 = vpop.f32.mrb[0].mxu0  ;;  %v10086_v47 = vpop.f32.mrb[0].mxu1 }
 0x4f0   : > { %v10651_v30 = vadd.f32 %v15069_v29, %v9893_v44  ;;  %v10653_v45 = vadd.f32 %v15071_v42, %v10086_v47  ;;  %v9895_v46 = vpop.f32.mrb[1].mxu0  ;;  %v10088_v49 = vpop.f32.mrb[1].mxu1 }
 0x4f1   : > { %v10652_v5 = vadd.f32 %v15073_v43, %v9895_v46  ;;  %v10654_v53 = vadd.f32 %v15075_v27, %v10088_v49  ;;  %v9897_v54 = vpop.f32.mrb[2].mxu0  ;;  %v10090_v55 = vpop.f32.mrb[2].mxu1 }
 0x4f2   : > { %v10779_v56 = vmax.f32 %v10651_v30, 0.0  ;;  %v10781_v57 = vmax.f32 %v10653_v45, 0.0  ;;  %v10655_v58 = vadd.f32 %v15069_v29, %v9897_v54  ;;  %v10657_v59 = vadd.f32 %v15071_v42, %v10090_v55  ;;  %v9899_v60 = vpop.f32.mrb[3].mxu0  ;;  %v10092_v61 = vpop.f32.mrb[3].mxu1 }
 0x4f3   : > { %v10780_v62 = vmax.f32 %v10652_v5, 0.0  ;;  %v10782_v63 = vmax.f32 %v10654_v53, 0.0  ;;  %v10656_v0 = vadd.f32 %v15073_v43, %v9899_v60  ;;  %v10658_v1 = vadd.f32 %v15075_v27, %v10092_v61 }
 0x4f4   : > { %v10783_v2 = vmax.f32 %v10655_v58, 0.0  ;;  %v10785_v3 = vmax.f32 %v10657_v59, 0.0 }
 0x4f5   : > { %v12268_v4 = vpack.c.bf16 %v10780_v62, %v10779_v56  ;;  %v12269_v7 = vpack.c.bf16 %v10782_v63, %v10781_v57  ;;  %v10784_v8 = vmax.f32 %v10656_v0, 0.0  ;;  %v10786_v9 = vmax.f32 %v10658_v1, 0.0 }
 0x4f7   : > { %11291 = vst [vmem:[%s15088_s6] sm:$0xff] %v12268_v4  ;;  %11292 = vst [vmem:[%s15088_s6 + $0x8] sm:$0xff] %v12269_v7  ;;  %v12270_v11 = vpack.c.bf16 %v10784_v8, %v10783_v2  ;;  %v12271_v12 = vpack.c.bf16 %v10786_v9, %v10785_v3  ;;  %v9903_v13 = vpop.f32.mrb[4].mxu0  ;;  %v10096_v14 = vpop.f32.mrb[4].mxu1 }
 0x4f8   : > { %v10659_v15 = vadd.f32 %v15069_v29, %v9903_v13  ;;  %v10661_v16 = vadd.f32 %v15071_v42, %v10096_v14  ;;  %v9905_v17 = vpop.f32.mrb[5].mxu0  ;;  %v10098_v18 = vpop.f32.mrb[5].mxu1 }
 0x4f9   : > { %11293 = vst [vmem:[%s15088_s6 + $0x10] sm:$0xff] %v12270_v11  ;;  %11294 = vst [vmem:[%s15088_s6 + $0x18] sm:$0xff] %v12271_v12  ;;  %v10660_v19 = vadd.f32 %v15073_v43, %v9905_v17  ;;  %v10662_v21 = vadd.f32 %v15075_v27, %v10098_v18  ;;  %v9907_v22 = vpop.f32.mrb[6].mxu0  ;;  %v10100_v48 = vpop.f32.mrb[6].mxu1 }
 0x4fa   : > { %v10787_v23 = vmax.f32 %v10659_v15, 0.0  ;;  %v10789_v24 = vmax.f32 %v10661_v16, 0.0  ;;  %v10663_v10 = vadd.f32 %v15069_v29, %v9907_v22  ;;  %v10665_v25 = vadd.f32 %v15071_v42, %v10100_v48  ;;  %v9909_v26 = vpop.f32.mrb[7].mxu0  ;;  %v10102_v28 = vpop.f32.mrb[7].mxu1 }
 0x4fb   : > { %v10788_v31 = vmax.f32 %v10660_v19, 0.0  ;;  %v10790_v32 = vmax.f32 %v10662_v21, 0.0  ;;  %v10664_v33 = vadd.f32 %v15073_v43, %v9909_v26  ;;  %v10666_v34 = vadd.f32 %v15075_v27, %v10102_v28 }
 0x4fc   : > { %v10791_v35 = vmax.f32 %v10663_v10, 0.0  ;;  %v10793_v36 = vmax.f32 %v10665_v25, 0.0 }
 0x4fd   : > { %v12272_v37 = vpack.c.bf16 %v10788_v31, %v10787_v23  ;;  %v12273_v38 = vpack.c.bf16 %v10790_v32, %v10789_v24  ;;  %v10792_v52 = vmax.f32 %v10664_v33, 0.0  ;;  %v10794_v51 = vmax.f32 %v10666_v34, 0.0 }
 0x4ff   : > { %11295 = vst [vmem:[%s15088_s6 + $0x20] sm:$0xff] %v12272_v37  ;;  %11296 = vst [vmem:[%s15088_s6 + $0x28] sm:$0xff] %v12273_v38  ;;  %v12274_v39 = vpack.c.bf16 %v10792_v52, %v10791_v35  ;;  %v12275_v40 = vpack.c.bf16 %v10794_v51, %v10793_v36  ;;  %v9913_v20 = vpop.f32.mrb[8].mxu0  ;;  %v10106_v6 = vpop.f32.mrb[8].mxu1 }
 0x500   : > { %v10667_v41 = vadd.f32 %v15069_v29, %v9913_v20  ;;  %v10669_v50 = vadd.f32 %v15071_v42, %v10106_v6  ;;  %v9915_v44 = vpop.f32.mrb[9].mxu0  ;;  %v10108_v47 = vpop.f32.mrb[9].mxu1 }
 0x501   : > { %11297 = vst [vmem:[%s15088_s6 + $0x30] sm:$0xff] %v12274_v39  ;;  %11298 = vst [vmem:[%s15088_s6 + $0x38] sm:$0xff] %v12275_v40  ;;  %v10668_v30 = vadd.f32 %v15073_v43, %v9915_v44  ;;  %v10670_v45 = vadd.f32 %v15075_v27, %v10108_v47  ;;  %v9917_v46 = vpop.f32.mrb[10].mxu0  ;;  %v10110_v49 = vpop.f32.mrb[10].mxu1 }
 0x502   : > { %v10795_v5 = vmax.f32 %v10667_v41, 0.0  ;;  %v10797_v53 = vmax.f32 %v10669_v50, 0.0  ;;  %v10671_v54 = vadd.f32 %v15069_v29, %v9917_v46  ;;  %v10673_v55 = vadd.f32 %v15071_v42, %v10110_v49  ;;  %v9919_v56 = vpop.f32.mrb[11].mxu0  ;;  %v10112_v57 = vpop.f32.mrb[11].mxu1 }
 0x503   : > { %v10796_v58 = vmax.f32 %v10668_v30, 0.0  ;;  %v10798_v59 = vmax.f32 %v10670_v45, 0.0  ;;  %v10672_v60 = vadd.f32 %v15073_v43, %v9919_v56  ;;  %v10674_v61 = vadd.f32 %v15075_v27, %v10112_v57 }
 0x504   : > { %v10799_v62 = vmax.f32 %v10671_v54, 0.0  ;;  %v10801_v63 = vmax.f32 %v10673_v55, 0.0 }
 0x505   : > { %v12276_v0 = vpack.c.bf16 %v10796_v58, %v10795_v5  ;;  %v12277_v1 = vpack.c.bf16 %v10798_v59, %v10797_v53  ;;  %v10800_v2 = vmax.f32 %v10672_v60, 0.0  ;;  %v10802_v3 = vmax.f32 %v10674_v61, 0.0 }
 0x507   : > { %11299 = vst [vmem:[%s15088_s6 + $0x40] sm:$0xff] %v12276_v0  ;;  %11300 = vst [vmem:[%s15088_s6 + $0x48] sm:$0xff] %v12277_v1  ;;  %v12278_v4 = vpack.c.bf16 %v10800_v2, %v10799_v62  ;;  %v12279_v7 = vpack.c.bf16 %v10802_v3, %v10801_v63  ;;  %v9923_v8 = vpop.f32.mrb[12].mxu0  ;;  %v10116_v9 = vpop.f32.mrb[12].mxu1 }
 0x508   : > { %v10675_v11 = vadd.f32 %v15069_v29, %v9923_v8  ;;  %v10677_v12 = vadd.f32 %v15071_v42, %v10116_v9  ;;  %v9925_v13 = vpop.f32.mrb[13].mxu0  ;;  %v10118_v14 = vpop.f32.mrb[13].mxu1 }
 0x509   : > { %11301 = vst [vmem:[%s15088_s6 + $0x50] sm:$0xff] %v12278_v4  ;;  %11302 = vst [vmem:[%s15088_s6 + $0x58] sm:$0xff] %v12279_v7  ;;  %v10676_v15 = vadd.f32 %v15073_v43, %v9925_v13  ;;  %v10678_v16 = vadd.f32 %v15075_v27, %v10118_v14  ;;  %v9927_v17 = vpop.f32.mrb[14].mxu0  ;;  %v10120_v18 = vpop.f32.mrb[14].mxu1 }
 0x50a   : > { %v10803_v19 = vmax.f32 %v10675_v11, 0.0  ;;  %v10805_v21 = vmax.f32 %v10677_v12, 0.0  ;;  %v10679_v22 = vadd.f32 %v15069_v29, %v9927_v17  ;;  %v10681_v48 = vadd.f32 %v15071_v42, %v10120_v18  ;;  %v9929_v23 = vpop.f32.mrb[15].mxu0  ;;  %v10122_v24 = vpop.f32.mrb[15].mxu1 }
 0x50b   : > { %v10804_v10 = vmax.f32 %v10676_v15, 0.0  ;;  %v10806_v25 = vmax.f32 %v10678_v16, 0.0  ;;  %v10680_v26 = vadd.f32 %v15073_v43, %v9929_v23  ;;  %v10682_v28 = vadd.f32 %v15075_v27, %v10122_v24 }
 0x50c   : > { %v10807_v31 = vmax.f32 %v10679_v22, 0.0  ;;  %v10809_v32 = vmax.f32 %v10681_v48, 0.0 }
 0x50d   : > { %v12280_v33 = vpack.c.bf16 %v10804_v10, %v10803_v19  ;;  %v12281_v34 = vpack.c.bf16 %v10806_v25, %v10805_v21  ;;  %v10808_v35 = vmax.f32 %v10680_v26, 0.0  ;;  %v10810_v36 = vmax.f32 %v10682_v28, 0.0 }
 0x50f   : > { %11303 = vst [vmem:[%s15088_s6 + $0x60] sm:$0xff] %v12280_v33  ;;  %11304 = vst [vmem:[%s15088_s6 + $0x68] sm:$0xff] %v12281_v34  ;;  %v12282_v37 = vpack.c.bf16 %v10808_v35, %v10807_v31  ;;  %v12283_v38 = vpack.c.bf16 %v10810_v36, %v10809_v32  ;;  %v9933_v52 = vpop.f32.mrb[16].mxu0  ;;  %v10126_v51 = vpop.f32.mrb[16].mxu1 }
 0x510   : > { %v10683_v39 = vadd.f32 %v15069_v29, %v9933_v52  ;;  %v10685_v40 = vadd.f32 %v15071_v42, %v10126_v51  ;;  %v9935_v20 = vpop.f32.mrb[17].mxu0  ;;  %v10128_v6 = vpop.f32.mrb[17].mxu1 }
 0x511   : > { %11305 = vst [vmem:[%s15088_s6 + $0x70] sm:$0xff] %v12282_v37  ;;  %11306 = vst [vmem:[%s15088_s6 + $0x78] sm:$0xff] %v12283_v38  ;;  %v10684_v41 = vadd.f32 %v15073_v43, %v9935_v20  ;;  %v10686_v50 = vadd.f32 %v15075_v27, %v10128_v6  ;;  %v9937_v44 = vpop.f32.mrb[18].mxu0  ;;  %v10130_v47 = vpop.f32.mrb[18].mxu1 }
 0x512   : > { %v10811_v30 = vmax.f32 %v10683_v39, 0.0  ;;  %v10813_v45 = vmax.f32 %v10685_v40, 0.0  ;;  %v10687_v46 = vadd.f32 %v15069_v29, %v9937_v44  ;;  %v10689_v49 = vadd.f32 %v15071_v42, %v10130_v47  ;;  %v9939_v5 = vpop.f32.mrb[19].mxu0  ;;  %v10132_v53 = vpop.f32.mrb[19].mxu1 }
 0x513   : > { %v10812_v54 = vmax.f32 %v10684_v41, 0.0  ;;  %v10814_v55 = vmax.f32 %v10686_v50, 0.0  ;;  %v10688_v56 = vadd.f32 %v15073_v43, %v9939_v5  ;;  %v10690_v57 = vadd.f32 %v15075_v27, %v10132_v53 }
 0x514   : > { %v10815_v58 = vmax.f32 %v10687_v46, 0.0  ;;  %v10817_v59 = vmax.f32 %v10689_v49, 0.0 }
 0x515   : > { %v12284_v60 = vpack.c.bf16 %v10812_v54, %v10811_v30  ;;  %v12285_v61 = vpack.c.bf16 %v10814_v55, %v10813_v45  ;;  %v10816_v62 = vmax.f32 %v10688_v56, 0.0  ;;  %v10818_v63 = vmax.f32 %v10690_v57, 0.0 }
 0x517   : > { %11307 = vst [vmem:[%s15088_s6 + $0x80] sm:$0xff] %v12284_v60  ;;  %11308 = vst [vmem:[%s15088_s6 + $0x88] sm:$0xff] %v12285_v61  ;;  %v12286_v0 = vpack.c.bf16 %v10816_v62, %v10815_v58  ;;  %v12287_v1 = vpack.c.bf16 %v10818_v63, %v10817_v59  ;;  %v9943_v2 = vpop.f32.mrb[20].mxu0  ;;  %v10136_v3 = vpop.f32.mrb[20].mxu1 }
 0x518   : > { %v10691_v4 = vadd.f32 %v15069_v29, %v9943_v2  ;;  %v10693_v7 = vadd.f32 %v15071_v42, %v10136_v3  ;;  %v9945_v8 = vpop.f32.mrb[21].mxu0  ;;  %v10138_v9 = vpop.f32.mrb[21].mxu1 }
 0x519   : > { %11309 = vst [vmem:[%s15088_s6 + $0x90] sm:$0xff] %v12286_v0  ;;  %11310 = vst [vmem:[%s15088_s6 + $0x98] sm:$0xff] %v12287_v1  ;;  %v10692_v11 = vadd.f32 %v15073_v43, %v9945_v8  ;;  %v10694_v12 = vadd.f32 %v15075_v27, %v10138_v9  ;;  %v9947_v13 = vpop.f32.mrb[22].mxu0  ;;  %v10140_v14 = vpop.f32.mrb[22].mxu1 }
 0x51a   : > { %v10819_v15 = vmax.f32 %v10691_v4, 0.0  ;;  %v10821_v16 = vmax.f32 %v10693_v7, 0.0  ;;  %v10695_v17 = vadd.f32 %v15069_v29, %v9947_v13  ;;  %v10697_v18 = vadd.f32 %v15071_v42, %v10140_v14  ;;  %v9949_v19 = vpop.f32.mrb[23].mxu0  ;;  %v10142_v21 = vpop.f32.mrb[23].mxu1 }
 0x51b   : > { %v10820_v22 = vmax.f32 %v10692_v11, 0.0  ;;  %v10822_v48 = vmax.f32 %v10694_v12, 0.0  ;;  %v10696_v23 = vadd.f32 %v15073_v43, %v9949_v19  ;;  %v10698_v24 = vadd.f32 %v15075_v27, %v10142_v21 }
 0x51c   : > { %v10823_v10 = vmax.f32 %v10695_v17, 0.0  ;;  %v10825_v25 = vmax.f32 %v10697_v18, 0.0 }
 0x51d   : > { %v12288_v26 = vpack.c.bf16 %v10820_v22, %v10819_v15  ;;  %v12289_v28 = vpack.c.bf16 %v10822_v48, %v10821_v16  ;;  %v10824_v31 = vmax.f32 %v10696_v23, 0.0  ;;  %v10826_v32 = vmax.f32 %v10698_v24, 0.0 }
 0x51f   : > { %11311 = vst [vmem:[%s15088_s6 + $0xa0] sm:$0xff] %v12288_v26  ;;  %11312 = vst [vmem:[%s15088_s6 + $0xa8] sm:$0xff] %v12289_v28  ;;  %v12290_v33 = vpack.c.bf16 %v10824_v31, %v10823_v10  ;;  %v12291_v34 = vpack.c.bf16 %v10826_v32, %v10825_v25  ;;  %v9953_v35 = vpop.f32.mrb[24].mxu0  ;;  %v10146_v36 = vpop.f32.mrb[24].mxu1 }
 0x520   : > { %v10699_v37 = vadd.f32 %v15069_v29, %v9953_v35  ;;  %v10701_v38 = vadd.f32 %v15071_v42, %v10146_v36  ;;  %v9955_v52 = vpop.f32.mrb[25].mxu0  ;;  %v10148_v51 = vpop.f32.mrb[25].mxu1 }
 0x521   : > { %11313 = vst [vmem:[%s15088_s6 + $0xb0] sm:$0xff] %v12290_v33  ;;  %11314 = vst [vmem:[%s15088_s6 + $0xb8] sm:$0xff] %v12291_v34  ;;  %v10700_v39 = vadd.f32 %v15073_v43, %v9955_v52  ;;  %v10702_v40 = vadd.f32 %v15075_v27, %v10148_v51  ;;  %v9957_v20 = vpop.f32.mrb[26].mxu0  ;;  %v10150_v6 = vpop.f32.mrb[26].mxu1 }
 0x522   : > { %v10827_v41 = vmax.f32 %v10699_v37, 0.0  ;;  %v10829_v50 = vmax.f32 %v10701_v38, 0.0  ;;  %v10703_v44 = vadd.f32 %v15069_v29, %v9957_v20  ;;  %v10705_v47 = vadd.f32 %v15071_v42, %v10150_v6  ;;  %v9959_v30 = vpop.f32.mrb[27].mxu0  ;;  %v10152_v45 = vpop.f32.mrb[27].mxu1 }
 0x523   : > { %v10828_v46 = vmax.f32 %v10700_v39, 0.0  ;;  %v10830_v49 = vmax.f32 %v10702_v40, 0.0  ;;  %v10704_v5 = vadd.f32 %v15073_v43, %v9959_v30  ;;  %v10706_v53 = vadd.f32 %v15075_v27, %v10152_v45 }
 0x524   : > { %v10831_v54 = vmax.f32 %v10703_v44, 0.0  ;;  %v10833_v55 = vmax.f32 %v10705_v47, 0.0 }
 0x525   : > { %v12292_v56 = vpack.c.bf16 %v10828_v46, %v10827_v41  ;;  %v12293_v57 = vpack.c.bf16 %v10830_v49, %v10829_v50  ;;  %v10832_v58 = vmax.f32 %v10704_v5, 0.0  ;;  %v10834_v59 = vmax.f32 %v10706_v53, 0.0 }
 0x527   : > { %11315 = vst [vmem:[%s15088_s6 + $0xc0] sm:$0xff] %v12292_v56  ;;  %11316 = vst [vmem:[%s15088_s6 + $0xc8] sm:$0xff] %v12293_v57  ;;  %v12294_v60 = vpack.c.bf16 %v10832_v58, %v10831_v54  ;;  %v12295_v61 = vpack.c.bf16 %v10834_v59, %v10833_v55  ;;  %v9963_v62 = vpop.f32.mrb[28].mxu0  ;;  %v10156_v63 = vpop.f32.mrb[28].mxu1 }
 0x528   : > { %v10707_v0 = vadd.f32 %v15069_v29, %v9963_v62  ;;  %v10709_v1 = vadd.f32 %v15071_v42, %v10156_v63  ;;  %v9965_v2 = vpop.f32.mrb[29].mxu0  ;;  %v10158_v3 = vpop.f32.mrb[29].mxu1 }
 0x529   : > { %11317 = vst [vmem:[%s15088_s6 + $0xd0] sm:$0xff] %v12294_v60  ;;  %11318 = vst [vmem:[%s15088_s6 + $0xd8] sm:$0xff] %v12295_v61  ;;  %v10708_v4 = vadd.f32 %v15073_v43, %v9965_v2  ;;  %v10710_v7 = vadd.f32 %v15075_v27, %v10158_v3  ;;  %v9967_v8 = vpop.f32.mrb[30].mxu0  ;;  %v10160_v9 = vpop.f32.mrb[30].mxu1 }
 0x52a   : > { %v10835_v11 = vmax.f32 %v10707_v0, 0.0  ;;  %v10837_v12 = vmax.f32 %v10709_v1, 0.0  ;;  %v10711_v13 = vadd.f32 %v15069_v29, %v9967_v8  ;;  %v10713_v14 = vadd.f32 %v15071_v42, %v10160_v9  ;;  %v9969_v15 = vpop.f32.mrb[31].mxu0  ;;  %v10162_v16 = vpop.f32.mrb[31].mxu1 }
 0x52b   : > { %v10836_v17 = vmax.f32 %v10708_v4, 0.0  ;;  %v10838_v18 = vmax.f32 %v10710_v7, 0.0  ;;  %v10712_v19 = vadd.f32 %v15073_v43, %v9969_v15  ;;  %v10714_v21 = vadd.f32 %v15075_v27, %v10162_v16 }
 0x52c   : > { %v10839_v22 = vmax.f32 %v10711_v13, 0.0  ;;  %v10841_v48 = vmax.f32 %v10713_v14, 0.0 }
 0x52d   : > { %v12296_v23 = vpack.c.bf16 %v10836_v17, %v10835_v11  ;;  %v12297_v24 = vpack.c.bf16 %v10838_v18, %v10837_v12  ;;  %v10840_v10 = vmax.f32 %v10712_v19, 0.0  ;;  %v10842_v25 = vmax.f32 %v10714_v21, 0.0 }
 0x52f   : > { %11319 = vst [vmem:[%s15088_s6 + $0xe0] sm:$0xff] %v12296_v23  ;;  %11320 = vst [vmem:[%s15088_s6 + $0xe8] sm:$0xff] %v12297_v24  ;;  %v12298_v26 = vpack.c.bf16 %v10840_v10, %v10839_v22  ;;  %v12299_v28 = vpack.c.bf16 %v10842_v25, %v10841_v48  ;;  %v9973_v31 = vpop.f32.mrb[32].mxu0  ;;  %v10166_v32 = vpop.f32.mrb[32].mxu1 }
 0x530   : > { %v10715_v33 = vadd.f32 %v15069_v29, %v9973_v31  ;;  %v10717_v34 = vadd.f32 %v15071_v42, %v10166_v32  ;;  %v9975_v35 = vpop.f32.mrb[33].mxu0  ;;  %v10168_v36 = vpop.f32.mrb[33].mxu1 }
 0x531   : > { %11321 = vst [vmem:[%s15088_s6 + $0xf0] sm:$0xff] %v12298_v26  ;;  %11322 = vst [vmem:[%s15088_s6 + $0xf8] sm:$0xff] %v12299_v28  ;;  %v10716_v37 = vadd.f32 %v15073_v43, %v9975_v35  ;;  %v10718_v38 = vadd.f32 %v15075_v27, %v10168_v36  ;;  %v9977_v52 = vpop.f32.mrb[34].mxu0  ;;  %v10170_v51 = vpop.f32.mrb[34].mxu1 }
 0x532   : > { %v10843_v39 = vmax.f32 %v10715_v33, 0.0  ;;  %v10845_v40 = vmax.f32 %v10717_v34, 0.0  ;;  %v10719_v20 = vadd.f32 %v15069_v29, %v9977_v52  ;;  %v10721_v6 = vadd.f32 %v15071_v42, %v10170_v51  ;;  %v9979_v41 = vpop.f32.mrb[35].mxu0  ;;  %v10172_v50 = vpop.f32.mrb[35].mxu1 }
 0x533   : > { %v10844_v44 = vmax.f32 %v10716_v37, 0.0  ;;  %v10846_v47 = vmax.f32 %v10718_v38, 0.0  ;;  %v10720_v30 = vadd.f32 %v15073_v43, %v9979_v41  ;;  %v10722_v45 = vadd.f32 %v15075_v27, %v10172_v50 }
 0x534   : > { %v10847_v46 = vmax.f32 %v10719_v20, 0.0  ;;  %v10849_v49 = vmax.f32 %v10721_v6, 0.0 }
 0x535   : > { %v12300_v5 = vpack.c.bf16 %v10844_v44, %v10843_v39  ;;  %v12301_v53 = vpack.c.bf16 %v10846_v47, %v10845_v40  ;;  %v10848_v54 = vmax.f32 %v10720_v30, 0.0  ;;  %v10850_v55 = vmax.f32 %v10722_v45, 0.0 }
 0x537   : > { %11323 = vst [vmem:[%s15088_s6 + $0x100] sm:$0xff] %v12300_v5  ;;  %11324 = vst [vmem:[%s15088_s6 + $0x108] sm:$0xff] %v12301_v53  ;;  %v12302_v56 = vpack.c.bf16 %v10848_v54, %v10847_v46  ;;  %v12303_v57 = vpack.c.bf16 %v10850_v55, %v10849_v49  ;;  %v9983_v58 = vpop.f32.mrb[36].mxu0  ;;  %v10176_v59 = vpop.f32.mrb[36].mxu1 }
 0x538   : > { %v10723_v60 = vadd.f32 %v15069_v29, %v9983_v58  ;;  %v10725_v61 = vadd.f32 %v15071_v42, %v10176_v59  ;;  %v9985_v62 = vpop.f32.mrb[37].mxu0  ;;  %v10178_v63 = vpop.f32.mrb[37].mxu1 }
 0x539   : > { %11325 = vst [vmem:[%s15088_s6 + $0x110] sm:$0xff] %v12302_v56  ;;  %11326 = vst [vmem:[%s15088_s6 + $0x118] sm:$0xff] %v12303_v57  ;;  %v10724_v0 = vadd.f32 %v15073_v43, %v9985_v62  ;;  %v10726_v1 = vadd.f32 %v15075_v27, %v10178_v63  ;;  %v9987_v2 = vpop.f32.mrb[38].mxu0  ;;  %v10180_v3 = vpop.f32.mrb[38].mxu1 }
 0x53a   : > { %v10851_v4 = vmax.f32 %v10723_v60, 0.0  ;;  %v10853_v7 = vmax.f32 %v10725_v61, 0.0  ;;  %v10727_v8 = vadd.f32 %v15069_v29, %v9987_v2  ;;  %v10729_v9 = vadd.f32 %v15071_v42, %v10180_v3  ;;  %v9989_v11 = vpop.f32.mrb[39].mxu0  ;;  %v10182_v12 = vpop.f32.mrb[39].mxu1 }
 0x53b   : > { %v10852_v13 = vmax.f32 %v10724_v0, 0.0  ;;  %v10854_v14 = vmax.f32 %v10726_v1, 0.0  ;;  %v10728_v15 = vadd.f32 %v15073_v43, %v9989_v11  ;;  %v10730_v16 = vadd.f32 %v15075_v27, %v10182_v12 }
 0x53c   : > { %v10855_v17 = vmax.f32 %v10727_v8, 0.0  ;;  %v10857_v18 = vmax.f32 %v10729_v9, 0.0 }
 0x53d   : > { %v12304_v19 = vpack.c.bf16 %v10852_v13, %v10851_v4  ;;  %v12305_v21 = vpack.c.bf16 %v10854_v14, %v10853_v7  ;;  %v10856_v22 = vmax.f32 %v10728_v15, 0.0  ;;  %v10858_v48 = vmax.f32 %v10730_v16, 0.0 }
 0x53f   : > { %11327 = vst [vmem:[%s15088_s6 + $0x120] sm:$0xff] %v12304_v19  ;;  %11328 = vst [vmem:[%s15088_s6 + $0x128] sm:$0xff] %v12305_v21  ;;  %v12306_v23 = vpack.c.bf16 %v10856_v22, %v10855_v17  ;;  %v12307_v24 = vpack.c.bf16 %v10858_v48, %v10857_v18  ;;  %v9993_v10 = vpop.f32.mrb[40].mxu0  ;;  %v10186_v25 = vpop.f32.mrb[40].mxu1 }
 0x540   : > { %v10731_v26 = vadd.f32 %v15069_v29, %v9993_v10  ;;  %v10733_v28 = vadd.f32 %v15071_v42, %v10186_v25  ;;  %v9995_v31 = vpop.f32.mrb[41].mxu0  ;;  %v10188_v32 = vpop.f32.mrb[41].mxu1 }
 0x541   : > { %11329 = vst [vmem:[%s15088_s6 + $0x130] sm:$0xff] %v12306_v23  ;;  %11330 = vst [vmem:[%s15088_s6 + $0x138] sm:$0xff] %v12307_v24  ;;  %v10732_v33 = vadd.f32 %v15073_v43, %v9995_v31  ;;  %v10734_v34 = vadd.f32 %v15075_v27, %v10188_v32  ;;  %v9997_v35 = vpop.f32.mrb[42].mxu0  ;;  %v10190_v36 = vpop.f32.mrb[42].mxu1 }
 0x542   : > { %v10859_v37 = vmax.f32 %v10731_v26, 0.0  ;;  %v10861_v38 = vmax.f32 %v10733_v28, 0.0  ;;  %v10735_v52 = vadd.f32 %v15069_v29, %v9997_v35  ;;  %v10737_v51 = vadd.f32 %v15071_v42, %v10190_v36  ;;  %v9999_v39 = vpop.f32.mrb[43].mxu0  ;;  %v10192_v40 = vpop.f32.mrb[43].mxu1 }
 0x543   : > { %v10860_v20 = vmax.f32 %v10732_v33, 0.0  ;;  %v10862_v6 = vmax.f32 %v10734_v34, 0.0  ;;  %v10736_v41 = vadd.f32 %v15073_v43, %v9999_v39  ;;  %v10738_v50 = vadd.f32 %v15075_v27, %v10192_v40 }
 0x544   : > { %v10863_v44 = vmax.f32 %v10735_v52, 0.0  ;;  %v10865_v47 = vmax.f32 %v10737_v51, 0.0 }
 0x545   : > { %v12308_v30 = vpack.c.bf16 %v10860_v20, %v10859_v37  ;;  %v12309_v45 = vpack.c.bf16 %v10862_v6, %v10861_v38  ;;  %v10864_v46 = vmax.f32 %v10736_v41, 0.0  ;;  %v10866_v49 = vmax.f32 %v10738_v50, 0.0 }
 0x547   : > { %11331 = vst [vmem:[%s15088_s6 + $0x140] sm:$0xff] %v12308_v30  ;;  %11332 = vst [vmem:[%s15088_s6 + $0x148] sm:$0xff] %v12309_v45  ;;  %v12310_v5 = vpack.c.bf16 %v10864_v46, %v10863_v44  ;;  %v12311_v53 = vpack.c.bf16 %v10866_v49, %v10865_v47  ;;  %v10003_v54 = vpop.f32.mrb[44].mxu0  ;;  %v10196_v55 = vpop.f32.mrb[44].mxu1 }
 0x548   : > { %v10739_v56 = vadd.f32 %v15069_v29, %v10003_v54  ;;  %v10741_v57 = vadd.f32 %v15071_v42, %v10196_v55  ;;  %v10005_v58 = vpop.f32.mrb[45].mxu0  ;;  %v10198_v59 = vpop.f32.mrb[45].mxu1 }
 0x549   : > { %11333 = vst [vmem:[%s15088_s6 + $0x150] sm:$0xff] %v12310_v5  ;;  %11334 = vst [vmem:[%s15088_s6 + $0x158] sm:$0xff] %v12311_v53  ;;  %v10740_v60 = vadd.f32 %v15073_v43, %v10005_v58  ;;  %v10742_v61 = vadd.f32 %v15075_v27, %v10198_v59  ;;  %v10007_v62 = vpop.f32.mrb[46].mxu0  ;;  %v10200_v63 = vpop.f32.mrb[46].mxu1 }
 0x54a   : > { %v10867_v0 = vmax.f32 %v10739_v56, 0.0  ;;  %v10869_v1 = vmax.f32 %v10741_v57, 0.0  ;;  %v10743_v2 = vadd.f32 %v15069_v29, %v10007_v62  ;;  %v10745_v3 = vadd.f32 %v15071_v42, %v10200_v63  ;;  %v10009_v4 = vpop.f32.mrb[47].mxu0  ;;  %v10202_v7 = vpop.f32.mrb[47].mxu1 }
 0x54b   : > { %v10868_v8 = vmax.f32 %v10740_v60, 0.0  ;;  %v10870_v9 = vmax.f32 %v10742_v61, 0.0  ;;  %v10744_v11 = vadd.f32 %v15073_v43, %v10009_v4  ;;  %v10746_v12 = vadd.f32 %v15075_v27, %v10202_v7 }
 0x54c   : > { %v10871_v13 = vmax.f32 %v10743_v2, 0.0  ;;  %v10873_v14 = vmax.f32 %v10745_v3, 0.0 }
 0x54d   : > { %v12312_v15 = vpack.c.bf16 %v10868_v8, %v10867_v0  ;;  %v12313_v16 = vpack.c.bf16 %v10870_v9, %v10869_v1  ;;  %v10872_v17 = vmax.f32 %v10744_v11, 0.0  ;;  %v10874_v18 = vmax.f32 %v10746_v12, 0.0 }
 0x54f   : > { %11335 = vst [vmem:[%s15088_s6 + $0x160] sm:$0xff] %v12312_v15  ;;  %11336 = vst [vmem:[%s15088_s6 + $0x168] sm:$0xff] %v12313_v16  ;;  %v12314_v19 = vpack.c.bf16 %v10872_v17, %v10871_v13  ;;  %v12315_v21 = vpack.c.bf16 %v10874_v18, %v10873_v14  ;;  %v10013_v22 = vpop.f32.mrb[48].mxu0  ;;  %v10206_v48 = vpop.f32.mrb[48].mxu1 }
 0x550   : > { %v10747_v23 = vadd.f32 %v15069_v29, %v10013_v22  ;;  %v10749_v24 = vadd.f32 %v15071_v42, %v10206_v48  ;;  %v10015_v10 = vpop.f32.mrb[49].mxu0  ;;  %v10208_v25 = vpop.f32.mrb[49].mxu1 }
 0x551   : > { %11337 = vst [vmem:[%s15088_s6 + $0x170] sm:$0xff] %v12314_v19  ;;  %11338 = vst [vmem:[%s15088_s6 + $0x178] sm:$0xff] %v12315_v21  ;;  %v10748_v26 = vadd.f32 %v15073_v43, %v10015_v10  ;;  %v10750_v28 = vadd.f32 %v15075_v27, %v10208_v25  ;;  %v10017_v31 = vpop.f32.mrb[50].mxu0  ;;  %v10210_v32 = vpop.f32.mrb[50].mxu1 }
 0x552   : > { %v10875_v33 = vmax.f32 %v10747_v23, 0.0  ;;  %v10877_v34 = vmax.f32 %v10749_v24, 0.0  ;;  %v10751_v35 = vadd.f32 %v15069_v29, %v10017_v31  ;;  %v10753_v36 = vadd.f32 %v15071_v42, %v10210_v32  ;;  %v10019_v37 = vpop.f32.mrb[51].mxu0  ;;  %v10212_v38 = vpop.f32.mrb[51].mxu1 }
 0x553   : > { %v10876_v52 = vmax.f32 %v10748_v26, 0.0  ;;  %v10878_v51 = vmax.f32 %v10750_v28, 0.0  ;;  %v10752_v39 = vadd.f32 %v15073_v43, %v10019_v37  ;;  %v10754_v40 = vadd.f32 %v15075_v27, %v10212_v38 }
 0x554   : > { %v10879_v20 = vmax.f32 %v10751_v35, 0.0  ;;  %v10881_v6 = vmax.f32 %v10753_v36, 0.0 }
 0x555   : > { %v12316_v41 = vpack.c.bf16 %v10876_v52, %v10875_v33  ;;  %v12317_v50 = vpack.c.bf16 %v10878_v51, %v10877_v34  ;;  %v10880_v44 = vmax.f32 %v10752_v39, 0.0  ;;  %v10882_v47 = vmax.f32 %v10754_v40, 0.0 }
 0x557   : > { %11339 = vst [vmem:[%s15088_s6 + $0x180] sm:$0xff] %v12316_v41  ;;  %11340 = vst [vmem:[%s15088_s6 + $0x188] sm:$0xff] %v12317_v50  ;;  %v12318_v30 = vpack.c.bf16 %v10880_v44, %v10879_v20  ;;  %v12319_v45 = vpack.c.bf16 %v10882_v47, %v10881_v6  ;;  %v10023_v46 = vpop.f32.mrb[52].mxu0  ;;  %v10216_v49 = vpop.f32.mrb[52].mxu1 }
 0x558   : > { %v10755_v5 = vadd.f32 %v15069_v29, %v10023_v46  ;;  %v10757_v53 = vadd.f32 %v15071_v42, %v10216_v49  ;;  %v10025_v54 = vpop.f32.mrb[53].mxu0  ;;  %v10218_v55 = vpop.f32.mrb[53].mxu1 }
 0x559   : > { %11341 = vst [vmem:[%s15088_s6 + $0x190] sm:$0xff] %v12318_v30  ;;  %11342 = vst [vmem:[%s15088_s6 + $0x198] sm:$0xff] %v12319_v45  ;;  %v10756_v56 = vadd.f32 %v15073_v43, %v10025_v54  ;;  %v10758_v57 = vadd.f32 %v15075_v27, %v10218_v55  ;;  %v10027_v58 = vpop.f32.mrb[54].mxu0  ;;  %v10220_v59 = vpop.f32.mrb[54].mxu1 }
 0x55a   : > { %v10883_v60 = vmax.f32 %v10755_v5, 0.0  ;;  %v10885_v61 = vmax.f32 %v10757_v53, 0.0  ;;  %v10759_v62 = vadd.f32 %v15069_v29, %v10027_v58  ;;  %v10761_v63 = vadd.f32 %v15071_v42, %v10220_v59  ;;  %v10029_v0 = vpop.f32.mrb[55].mxu0  ;;  %v10222_v1 = vpop.f32.mrb[55].mxu1 }
 0x55b   : > { %v10884_v2 = vmax.f32 %v10756_v56, 0.0  ;;  %v10886_v3 = vmax.f32 %v10758_v57, 0.0  ;;  %v10760_v4 = vadd.f32 %v15073_v43, %v10029_v0  ;;  %v10762_v7 = vadd.f32 %v15075_v27, %v10222_v1 }
 0x55c   : > { %v10887_v8 = vmax.f32 %v10759_v62, 0.0  ;;  %v10889_v9 = vmax.f32 %v10761_v63, 0.0 }
 0x55d   : > { %v12320_v11 = vpack.c.bf16 %v10884_v2, %v10883_v60  ;;  %v12321_v12 = vpack.c.bf16 %v10886_v3, %v10885_v61  ;;  %v10888_v13 = vmax.f32 %v10760_v4, 0.0  ;;  %v10890_v14 = vmax.f32 %v10762_v7, 0.0 }
 0x55f   : > { %11343 = vst [vmem:[%s15088_s6 + $0x1a0] sm:$0xff] %v12320_v11  ;;  %11344 = vst [vmem:[%s15088_s6 + $0x1a8] sm:$0xff] %v12321_v12  ;;  %v12322_v15 = vpack.c.bf16 %v10888_v13, %v10887_v8  ;;  %v12323_v16 = vpack.c.bf16 %v10890_v14, %v10889_v9  ;;  %v10033_v17 = vpop.f32.mrb[56].mxu0  ;;  %v10226_v18 = vpop.f32.mrb[56].mxu1 }
 0x560   : > { %v10763_v19 = vadd.f32 %v15069_v29, %v10033_v17  ;;  %v10765_v21 = vadd.f32 %v15071_v42, %v10226_v18  ;;  %v10035_v22 = vpop.f32.mrb[57].mxu0  ;;  %v10228_v48 = vpop.f32.mrb[57].mxu1 }
 0x561   : > { %11345 = vst [vmem:[%s15088_s6 + $0x1b0] sm:$0xff] %v12322_v15  ;;  %11346 = vst [vmem:[%s15088_s6 + $0x1b8] sm:$0xff] %v12323_v16  ;;  %v10764_v23 = vadd.f32 %v15073_v43, %v10035_v22  ;;  %v10766_v24 = vadd.f32 %v15075_v27, %v10228_v48  ;;  %v10037_v10 = vpop.f32.mrb[58].mxu0  ;;  %v10230_v25 = vpop.f32.mrb[58].mxu1 }
 0x562   : > { %v10891_v26 = vmax.f32 %v10763_v19, 0.0  ;;  %v10893_v28 = vmax.f32 %v10765_v21, 0.0  ;;  %v10767_v31 = vadd.f32 %v15069_v29, %v10037_v10  ;;  %v10769_v32 = vadd.f32 %v15071_v42, %v10230_v25  ;;  %v10039_v33 = vpop.f32.mrb[59].mxu0  ;;  %v10232_v34 = vpop.f32.mrb[59].mxu1 }
 0x563   : > { %v10892_v35 = vmax.f32 %v10764_v23, 0.0  ;;  %v10894_v36 = vmax.f32 %v10766_v24, 0.0  ;;  %v10768_v37 = vadd.f32 %v15073_v43, %v10039_v33  ;;  %v10770_v38 = vadd.f32 %v15075_v27, %v10232_v34 }
 0x564   : > { %v10895_v52 = vmax.f32 %v10767_v31, 0.0  ;;  %v10897_v51 = vmax.f32 %v10769_v32, 0.0 }
 0x565   : > { %v12324_v39 = vpack.c.bf16 %v10892_v35, %v10891_v26  ;;  %v12325_v40 = vpack.c.bf16 %v10894_v36, %v10893_v28  ;;  %v10896_v20 = vmax.f32 %v10768_v37, 0.0  ;;  %v10898_v6 = vmax.f32 %v10770_v38, 0.0 }
 0x567   : > { %11347 = vst [vmem:[%s15088_s6 + $0x1c0] sm:$0xff] %v12324_v39  ;;  %11348 = vst [vmem:[%s15088_s6 + $0x1c8] sm:$0xff] %v12325_v40  ;;  %v12326_v41 = vpack.c.bf16 %v10896_v20, %v10895_v52  ;;  %v12327_v50 = vpack.c.bf16 %v10898_v6, %v10897_v51  ;;  %v10043_v44 = vpop.f32.mrb[60].mxu0  ;;  %v10236_v47 = vpop.f32.mrb[60].mxu1 }
 0x568   : > { %v10771_v30 = vadd.f32 %v15069_v29, %v10043_v44  ;;  %v10773_v45 = vadd.f32 %v15071_v42, %v10236_v47  ;;  %v10045_v46 = vpop.f32.mrb[61].mxu0  ;;  %v10238_v49 = vpop.f32.mrb[61].mxu1 }
 0x569   : > { %11349 = vst [vmem:[%s15088_s6 + $0x1d0] sm:$0xff] %v12326_v41  ;;  %11350 = vst [vmem:[%s15088_s6 + $0x1d8] sm:$0xff] %v12327_v50  ;;  %v10772_v5 = vadd.f32 %v15073_v43, %v10045_v46  ;;  %v10774_v53 = vadd.f32 %v15075_v27, %v10238_v49  ;;  %v10047_v54 = vpop.f32.mrb[62].mxu0  ;;  %v10240_v55 = vpop.f32.mrb[62].mxu1 }
 0x56a   : > { %v10899_v56 = vmax.f32 %v10771_v30, 0.0  ;;  %v10901_v57 = vmax.f32 %v10773_v45, 0.0  ;;  %v10775_v58 = vadd.f32 %v15069_v29, %v10047_v54  ;;  %v10777_v59 = vadd.f32 %v15071_v42, %v10240_v55  ;;  %v10049_v60 = vpop.f32.mrb[63].mxu0  ;;  %v10242_v61 = vpop.f32.mrb[63].mxu1 }
 0x56b   : > { %v10900_v62 = vmax.f32 %v10772_v5, 0.0  ;;  %v10902_v63 = vmax.f32 %v10774_v53, 0.0  ;;  %v10776_v0 = vadd.f32 %v15073_v43, %v10049_v60  ;;  %v10778_v1 = vadd.f32 %v15075_v27, %v10242_v61 }
 0x56c   : > { %v10903_v2 = vmax.f32 %v10775_v58, 0.0  ;;  %v10905_v3 = vmax.f32 %v10777_v59, 0.0 }
 0x56d   : > { %v12328_v29 = vpack.c.bf16 %v10900_v62, %v10899_v56  ;;  %v12329_v42 = vpack.c.bf16 %v10902_v63, %v10901_v57  ;;  %v10904_v4 = vmax.f32 %v10776_v0, 0.0  ;;  %v10906_v7 = vmax.f32 %v10778_v1, 0.0 }
 0x56f   : > { %11351 = vst [vmem:[%s15088_s6 + $0x1e0] sm:$0xff] %v12328_v29  ;;  %11352 = vst [vmem:[%s15088_s6 + $0x1e8] sm:$0xff] %v12329_v42  ;;  %v12330_v43 = vpack.c.bf16 %v10904_v4, %v10903_v2  ;;  %v12331_v27 = vpack.c.bf16 %v10906_v7, %v10905_v3 }
 0x571   : > { %11353 = vst [vmem:[%s15088_s6 + $0x1f0] sm:$0xff] %v12330_v43  ;;  %11354 = vst [vmem:[%s15088_s6 + $0x1f8] sm:$0xff] %v12331_v27 }
 0x572   : > { %13471 = shalt.err (!%p13468_p3)
}
 0x573   : > { %s13472_s25 = scalar_lea.hbm %s15275_s11, 8192  ;;  %s13476_s28 = scalar_lea.hbm %s15329_s3, 16384 }
 0x574   : > { %p13473_p4 = scmp.ne.s32.totalorder %s15275_s11, %s13472_s25  ;;  %p13477_p9 = scmp.lt.u32.totalorder %s15275_s11, %s15329_s3 }
 0x575   : > { %p13478_p10 = scmp.lt.u32.totalorder %s13476_s28, %s13472_s25  ;;  %p13480_p12 = scmp.lt.u32.totalorder %s13472_s25, %s15275_s11 }
 0x576   : > { %p13474_p7 = pnand %p13473_p4, %p13585_p5 }
 0x577   : > { %p13479_p11 = por %p13478_p10, %p13477_p9 }
 0x578   : > { %p13475_p8 = pneg %p13474_p7 }
 0x579   : > { %p13481_p13 = por %p13480_p12, %p13479_p11 }
 0x57b   : > { %p13482_p0 = pnand %p13481_p13, %p13475_p8 }
 0x57d   : > { %13485 = shalt.err (!%p13482_p0)
}
 0x57e   : > { %s13525_s4 = smov 256   ;;  %s13526_s5 = smov 16  }
 0x57f   : > { %13358 = dma.vmem_to_hbm [thread:$0]  (%p13585_p5), %s15277_s8, 8192, %s15275_s11, %s15285_s16, %s13525_s4, %s13525_s4, %s13526_s5  }
 0x580 PF: > { %p13364_p1 = scmp.ge.s32.totalorder %s13520_s15, 2  ;;  %s11384_s6 = sand.u32 1, %s13508_s12  }
 0x581   : > { %s11385_s7 = scalar_lea.sflag [#allocation4], %s11384_s6 }
 0x582   : > { %p13361_p2 = pnand %p13364_p1, %p13589_p6 }
 0x584   : > { %13503 = dma.done.wait (!%p13361_p2), %s11385_s7, 8192  }
 0x585   : > { %13505 = vsyncadd (!%p13361_p2), %s11385_s7, 4294959104  ;;  %p13_p3 = scmp.ge.s32.totalorder %s13572_s18, 4   ;;  %s15336_s12 = smov %s13512_s13 }
 0x586   : > { %s15337_s13 = smov %s13516_s14  ;;  %s15338_s14 = smov %s13583_s21 }
 0x587   : > { %s15339_s15 = smov %s13572_s18  ;;  %15 = sbr.rel (!%p13_p3) target bundleno = 3 (0x3), region = 77 }
 0x58e   :  { %11390 = vsyncpa [#allocation4], 1 }
 0x58f   :  { %11392 = vsyncpa [#allocation4 + $0x1], 1 }

</bundles_post_ra>
